<compile_context>
chip_gen: v6e
topology: v6e:2x2x1
jax: 0.10.0
libtpu: 0.0.40
codegen_flags: <defaults>
</compile_context>

<pallas_src>
import functools

import jax
import jax.numpy as jnp
from jax import lax
from jax.experimental import pallas as pl
from jax.experimental.pallas import tpu as pltpu


def _round_up(x, m):
    return (x + m - 1) // m * m


def _fused_conv_kernel(p_ref, w_ref, g_ref, b_ref, o_ref, *, mode):
    """One (sample, channel-tile): (HoWo, K) @ (K, CT) matmul + layer epilogue.

    p_ref: (HoWo, K)  per-sample im2col patches (batch dim squeezed by BlockSpec)
    w_ref: (K, CT)    dense conv weight, one 128-lane channel tile
    g_ref: (1, CT)    InstanceNorm gamma (unused for the bias-only modes)
    b_ref: (1, CT)    InstanceNorm beta / conv bias
    o_ref: (HoWo, CT) per-sample output channel tile

    mode:
      'bias_lrelu' : conv bias + LeakyReLU(0.2)                 (first layer)
      'in_lrelu'   : InstanceNorm2d(affine=True) + LeakyReLU    (middle blocks)
      'bias'       : conv bias only                             (final layer)
    """
    acc = jnp.dot(p_ref[...], w_ref[...], preferred_element_type=jnp.float32)
    if mode == "in_lrelu":
        # InstanceNorm2d: per-sample, per-channel stats over spatial positions,
        # i.e. axis 0 of this per-sample (HoWo, CT) block. Biased variance,
        # eps=1e-5 (PyTorch defaults, track_running_stats=False).
        mean = jnp.mean(acc, axis=0, keepdims=True)
        var = jnp.mean(jnp.square(acc - mean), axis=0, keepdims=True)
        y = g_ref[...] * (acc - mean) * lax.rsqrt(var + 1e-5) + b_ref[...]
        o_ref[...] = jnp.where(y >= 0.0, y, 0.2 * y)  # LeakyReLU(0.2)
    elif mode == "bias_lrelu":
        y = acc + b_ref[...]
        o_ref[...] = jnp.where(y >= 0.0, y, 0.2 * y)
    else:  # 'bias': final Conv2d with bias, no activation
        o_ref[...] = acc + b_ref[...]


def _conv2d_fused(x_nhwc, w, gamma, beta, *, stride, padding, mode):
    """One discriminator layer. x_nhwc: (N, H, W, Cin); w: PyTorch Conv2d weight
    of shape (Cout, Cin, kH, kW). Returns NHWC output (N, Ho, Wo, Cout)."""
    N, H, W, Cin = x_nhwc.shape
    Cout, _, kH, kW = w.shape
    Ho = (H + 2 * padding - kH) // stride + 1
    Wo = (W + 2 * padding - kW) // stride + 1

    # ---- JAX glue (pure data movement): pad + im2col -> per-sample patches ----
    xp = jnp.pad(x_nhwc, ((0, 0), (padding, padding), (padding, padding), (0, 0)))
    cols = [
        xp[:, kh : kh + stride * (Ho - 1) + 1 : stride,
              kw : kw + stride * (Wo - 1) + 1 : stride, :]
        for kh in range(kH) for kw in range(kW)
    ]
    K = kH * kW * Cin
    # (N, Ho, Wo, kH*kW, Cin) -> (N, Ho*Wo, K); K ordered (kh, kw) major, cin minor.
    patches = jnp.stack(cols, axis=3).reshape(N, Ho * Wo, K)

    # Lane-dense output: Cout padded to a multiple of 128 so kernel stores are
    # unmasked full-lane vst. K is deliberately left unpadded (block spans the
    # full K extent) to avoid an extra HBM copy of the large patches array.
    CT = 128
    Cp = _round_up(Cout, CT)
    n_ct = Cp // CT
    w2d = jnp.transpose(w, (2, 3, 1, 0)).reshape(K, Cout)       # rows (kh,kw,cin)
    w2d = jnp.pad(w2d, ((0, 0), (0, Cp - Cout)))
    g2d = jnp.pad(gamma.reshape(1, Cout), ((0, 0), (0, Cp - Cout)))
    b2d = jnp.pad(beta.reshape(1, Cout), ((0, 0), (0, Cp - Cout)))

    out = pl.pallas_call(
        functools.partial(_fused_conv_kernel, mode=mode),
        out_shape=jax.ShapeDtypeStruct((N, Ho * Wo, Cp), jnp.float32),
        grid_spec=pltpu.PrefetchScalarGridSpec(
            num_scalar_prefetch=0,
            # n outer, c inner: patch block is revisited across the c loop and
            # stays VMEM-resident; every (n, c) pair is independent work.
            grid=(N, n_ct),
            in_specs=[
                pl.BlockSpec((None, Ho * Wo, K), lambda n, c: (n, 0, 0)),
                pl.BlockSpec((K, CT), lambda n, c: (0, c)),
                pl.BlockSpec((1, CT), lambda n, c: (0, c)),
                pl.BlockSpec((1, CT), lambda n, c: (0, c)),
            ],
            out_specs=pl.BlockSpec((None, Ho * Wo, CT), lambda n, c: (n, 0, c)),
        ),
        compiler_params=pltpu.CompilerParams(
            dimension_semantics=("parallel", "parallel"),
        ),
    )(patches, w2d, g2d, b2d)

    return out[:, :, :Cout].reshape(N, Ho, Wo, Cout)


def init_discriminator_params(key, img_channels, disc_features):
    """Deterministic synthetic parameters matching the PyTorch module's shapes."""
    df = disc_features
    dims = [img_channels, df, 2 * df, 4 * df, 8 * df, 1]
    params = []
    for i in range(5):
        key, kw_, kg, kb = jax.random.split(key, 4)
        cin, cout = dims[i], dims[i + 1]
        w = 0.05 * jax.random.normal(kw_, (cout, cin, 4, 4), jnp.float32)
        if i in (1, 2, 3):
            # InstanceNorm2d(affine=True) scale/shift; conv has no bias.
            gamma = 1.0 + 0.1 * jax.random.normal(kg, (cout,), jnp.float32)
            beta = 0.1 * jax.random.normal(kb, (cout,), jnp.float32)
        else:
            gamma = jnp.ones((cout,), jnp.float32)  # unused (no norm on this layer)
            beta = 0.05 * jax.random.normal(kb, (cout,), jnp.float32)  # conv bias
        params.append((w, gamma, beta))
    return params


def discriminator_forward(params, x_nchw):
    # layout: NCHW in / NCHW out (PyTorch convention); NHWC inside.
    x = jnp.transpose(x_nchw, (0, 2, 3, 1)).astype(jnp.float32)
    strides = (2, 2, 2, 2, 2)
    pads = (1, 1, 1, 1, 0)
    modes = ("bias_lrelu", "in_lrelu", "in_lrelu", "in_lrelu", "bias")
    for (w, g, b), s, p, m in zip(params, strides, pads, modes):
        x = _conv2d_fused(x, w, g, b, stride=s, padding=p, mode=m)
    return jnp.transpose(x, (0, 3, 1, 2))


if __name__ == "__main__":
    key = jax.random.PRNGKey(0)
    kp, kx = jax.random.split(key)

    img_channels, disc_features, batch = 3, 8, 2
    params = init_discriminator_params(kp, img_channels, disc_features)
    # 64x64 input so the stack of five stride-2 convs ends at 1x1 (as in WGAN).
    x = jax.random.normal(kx, (batch, img_channels, 64, 64), jnp.float32)

    out = jax.jit(discriminator_forward)(params, x)
    out = jax.block_until_ready(out)

    assert out.shape == (batch, 1, 1, 1), out.shape
    assert bool(jnp.all(jnp.isfinite(out)))
    print("KERNEL_OK")
</pallas_src>

<mosaic_0001>
module attributes {stable_mosaic.version = 11 : i64} {
  func.func @_fused_conv_kernel(%arg0: i32, %arg1: i32, %arg2: memref<1x1024x48xf32, #tpu.memory_space<vmem>>, %arg3: memref<48x128xf32, #tpu.memory_space<vmem>>, %arg4: memref<1x128xf32, #tpu.memory_space<vmem>>, %arg5: memref<1x128xf32, #tpu.memory_space<vmem>>, %arg6: memref<1x1024x128xf32, #tpu.memory_space<vmem>>) attributes {dimension_semantics = [#tpu.dimension_semantics<parallel>, #tpu.dimension_semantics<parallel>], iteration_bounds = array<i64: 2, 1>, scalar_prefetch = 0 : i64, scratch_operands = 0 : i64, tpu.core_type = #tpu.core_type<tc>, window_params = [{transform_indices = @transform_0, window_bounds = array<i64: 1, 1024, 48>}, {transform_indices = @transform_1, window_bounds = array<i64: 48, 128>}, {transform_indices = @transform_2, window_bounds = array<i64: 1, 128>}, {transform_indices = @transform_3, window_bounds = array<i64: 1, 128>}, {transform_indices = @transform_4, window_bounds = array<i64: 1, 1024, 128>}]} {
    %c0 = arith.constant 0 : index
    %c0_0 = arith.constant 0 : index
    %c0_1 = arith.constant 0 : index
    %0 = vector.load %arg2[%c0, %c0_0, %c0_1] : memref<1x1024x48xf32, #tpu.memory_space<vmem>>, vector<1x1024x48xf32>
    %1 = vector.shape_cast %0 : vector<1x1024x48xf32> to vector<1024x48xf32>
    %c0_2 = arith.constant 0 : index
    %c0_3 = arith.constant 0 : index
    %2 = vector.load %arg3[%c0_2, %c0_3] : memref<48x128xf32, #tpu.memory_space<vmem>>, vector<48x128xf32>
    %cst = arith.constant dense<0.000000e+00> : vector<1024x128xf32>
    %3 = tpu.matmul %1, %2, %cst {dimension_numbers = #tpu.dot_dimension_numbers<[1], [0], [0], [1], [0, 0, 1, 1], [], []>} : vector<1024x48xf32>, vector<48x128xf32>, vector<1024x128xf32> -> vector<1024x128xf32>
    %c0_4 = arith.constant 0 : index
    %c0_5 = arith.constant 0 : index
    %4 = vector.load %arg5[%c0_4, %c0_5] : memref<1x128xf32, #tpu.memory_space<vmem>>, vector<1x128xf32>
    %5 = vector.broadcast %4 : vector<1x128xf32> to vector<1024x128xf32>
    %6 = arith.addf %3, %5 : vector<1024x128xf32>
    %cst_6 = arith.constant 0.000000e+00 : f32
    %7 = vector.broadcast %cst_6 : f32 to vector<1024x128xf32>
    %8 = arith.cmpf oge, %6, %7 : vector<1024x128xf32>
    %cst_7 = arith.constant 2.000000e-01 : f32
    %9 = vector.broadcast %cst_7 : f32 to vector<1024x128xf32>
    %10 = arith.mulf %9, %6 : vector<1024x128xf32>
    %11 = arith.select %8, %6, %10 : vector<1024x128xi1>, vector<1024x128xf32>
    %c0_8 = arith.constant 0 : index
    %c0_9 = arith.constant 0 : index
    %c0_10 = arith.constant 0 : index
    %12 = vector.load %arg6[%c0_8, %c0_9, %c0_10] : memref<1x1024x128xf32, #tpu.memory_space<vmem>>, vector<1x1024x128xf32>
    %13 = vector.shape_cast %12 : vector<1x1024x128xf32> to vector<1024x128xf32>
    %14 = vector.shape_cast %11 : vector<1024x128xf32> to vector<1x1024x128xf32>
    tpu.vector_store %arg6[%c0_8, %c0_9, %c0_10], %14 {strides = array<i32>} : memref<1x1024x128xf32, #tpu.memory_space<vmem>>, vector<1x1024x128xf32>,
    return
  }
  func.func @transform_0(%arg0: i32, %arg1: i32) -> (i32, i32, i32) {
    %c0_i32 = arith.constant 0 : i32
    %c0_i32_0 = arith.constant 0 : i32
    %c0_i32_1 = arith.constant 0 : i32
    return %arg0, %c0_i32, %c0_i32_0 : i32, i32, i32
  }
  func.func @transform_1(%arg0: i32, %arg1: i32) -> (i32, i32) {
    %c0_i32 = arith.constant 0 : i32
    %c0_i32_0 = arith.constant 0 : i32
    return %c0_i32, %arg1 : i32, i32
  }
  func.func @transform_2(%arg0: i32, %arg1: i32) -> (i32, i32) {
    %c0_i32 = arith.constant 0 : i32
    %c0_i32_0 = arith.constant 0 : i32
    return %c0_i32, %arg1 : i32, i32
  }
  func.func @transform_3(%arg0: i32, %arg1: i32) -> (i32, i32) {
    %c0_i32 = arith.constant 0 : i32
    %c0_i32_0 = arith.constant 0 : i32
    return %c0_i32, %arg1 : i32, i32
  }
  func.func @transform_4(%arg0: i32, %arg1: i32) -> (i32, i32, i32) {
    %c0_i32 = arith.constant 0 : i32
    %c0_i32_0 = arith.constant 0 : i32
    return %arg0, %c0_i32, %arg1 : i32, i32, i32
  }
}

module attributes {stable_mosaic.version = 11 : i64} {
  func.func @_fused_conv_kernel(%arg0: i32, %arg1: i32, %arg2: memref<1x256x128xf32, #tpu.memory_space<vmem>>, %arg3: memref<128x128xf32, #tpu.memory_space<vmem>>, %arg4: memref<1x128xf32, #tpu.memory_space<vmem>>, %arg5: memref<1x128xf32, #tpu.memory_space<vmem>>, %arg6: memref<1x256x128xf32, #tpu.memory_space<vmem>>) attributes {dimension_semantics = [#tpu.dimension_semantics<parallel>, #tpu.dimension_semantics<parallel>], iteration_bounds = array<i64: 2, 1>, scalar_prefetch = 0 : i64, scratch_operands = 0 : i64, tpu.core_type = #tpu.core_type<tc>, window_params = [{transform_indices = @transform_0, window_bounds = array<i64: 1, 256, 128>}, {transform_indices = @transform_1, window_bounds = array<i64: 128, 128>}, {transform_indices = @transform_2, window_bounds = array<i64: 1, 128>}, {transform_indices = @transform_3, window_bounds = array<i64: 1, 128>}, {transform_indices = @transform_4, window_bounds = array<i64: 1, 256, 128>}]} {
    %c0 = arith.constant 0 : index
    %c0_0 = arith.constant 0 : index
    %c0_1 = arith.constant 0 : index
    %0 = vector.load %arg2[%c0, %c0_0, %c0_1] : memref<1x256x128xf32, #tpu.memory_space<vmem>>, vector<1x256x128xf32>
    %1 = vector.shape_cast %0 : vector<1x256x128xf32> to vector<256x128xf32>
    %c0_2 = arith.constant 0 : index
    %c0_3 = arith.constant 0 : index
    %2 = vector.load %arg3[%c0_2, %c0_3] : memref<128x128xf32, #tpu.memory_space<vmem>>, vector<128x128xf32>
    %cst = arith.constant dense<0.000000e+00> : vector<256x128xf32>
    %3 = tpu.matmul %1, %2, %cst {dimension_numbers = #tpu.dot_dimension_numbers<[1], [0], [0], [1], [0, 0, 1, 1], [], []>} : vector<256x128xf32>, vector<128x128xf32>, vector<256x128xf32> -> vector<256x128xf32>
    %cst_4 = arith.constant dense<0.000000e+00> : vector<128xf32>
    %4 = vector.multi_reduction <add>, %3, %cst_4 [0] : vector<256x128xf32> to vector<128xf32>
    %5 = vector.shape_cast %4 : vector<128xf32> to vector<1x128xf32>
    %cst_5 = arith.constant 2.560000e+02 : f32
    %6 = vector.broadcast %cst_5 : f32 to vector<1x128xf32>
    %7 = arith.divf %5, %6 : vector<1x128xf32>
    %8 = vector.broadcast %7 : vector<1x128xf32> to vector<256x128xf32>
    %9 = arith.subf %3, %8 : vector<256x128xf32>
    %10 = arith.mulf %9, %9 : vector<256x128xf32>
    %cst_6 = arith.constant dense<0.000000e+00> : vector<128xf32>
    %11 = vector.multi_reduction <add>, %10, %cst_6 [0] : vector<256x128xf32> to vector<128xf32>
    %12 = vector.shape_cast %11 : vector<128xf32> to vector<1x128xf32>
    %cst_7 = arith.constant 2.560000e+02 : f32
    %13 = vector.broadcast %cst_7 : f32 to vector<1x128xf32>
    %14 = arith.divf %12, %13 : vector<1x128xf32>
    %c0_8 = arith.constant 0 : index
    %c0_9 = arith.constant 0 : index
    %15 = vector.load %arg4[%c0_8, %c0_9] : memref<1x128xf32, #tpu.memory_space<vmem>>, vector<1x128xf32>
    %16 = vector.broadcast %7 : vector<1x128xf32> to vector<256x128xf32>
    %17 = arith.subf %3, %16 : vector<256x128xf32>
    %18 = vector.broadcast %15 : vector<1x128xf32> to vector<256x128xf32>
    %19 = arith.mulf %18, %17 : vector<256x128xf32>
    %cst_10 = arith.constant 9.99999974E-6 : f32
    %20 = vector.broadcast %cst_10 : f32 to vector<1x128xf32>
    %21 = arith.addf %14, %20 : vector<1x128xf32>
    %22 = math.rsqrt %21 : vector<1x128xf32>
    %23 = vector.broadcast %22 : vector<1x128xf32> to vector<256x128xf32>
    %24 = arith.mulf %19, %23 : vector<256x128xf32>
    %c0_11 = arith.constant 0 : index
    %c0_12 = arith.constant 0 : index
    %25 = vector.load %arg5[%c0_11, %c0_12] : memref<1x128xf32, #tpu.memory_space<vmem>>, vector<1x128xf32>
    %26 = vector.broadcast %25 : vector<1x128xf32> to vector<256x128xf32>
    %27 = arith.addf %24, %26 : vector<256x128xf32>
    %cst_13 = arith.constant 0.000000e+00 : f32
    %28 = vector.broadcast %cst_13 : f32 to vector<256x128xf32>
    %29 = arith.cmpf oge, %27, %28 : vector<256x128xf32>
    %cst_14 = arith.constant 2.000000e-01 : f32
    %30 = vector.broadcast %cst_14 : f32 to vector<256x128xf32>
    %31 = arith.mulf %30, %27 : vector<256x128xf32>
    %32 = arith.select %29, %27, %31 : vector<256x128xi1>, vector<256x128xf32>
    %c0_15 = arith.constant 0 : index
    %c0_16 = arith.constant 0 : index
    %c0_17 = arith.constant 0 : index
    %33 = vector.load %arg6[%c0_15, %c0_16, %c0_17] : memref<1x256x128xf32, #tpu.memory_space<vmem>>, vector<1x256x128xf32>
    %34 = vector.shape_cast %33 : vector<1x256x128xf32> to vector<256x128xf32>
    %35 = vector.shape_cast %32 : vector<256x128xf32> to vector<1x256x128xf32>
    tpu.vector_store %arg6[%c0_15, %c0_16, %c0_17], %35 {strides = array<i32>} : memref<1x256x128xf32, #tpu.memory_space<vmem>>, vector<1x256x128xf32>,
    return
  }
  func.func @transform_0(%arg0: i32, %arg1: i32) -> (i32, i32, i32) {
    %c0_i32 = arith.constant 0 : i32
    %c0_i32_0 = arith.constant 0 : i32
    %c0_i32_1 = arith.constant 0 : i32
    return %arg0, %c0_i32, %c0_i32_0 : i32, i32, i32
  }
  func.func @transform_1(%arg0: i32, %arg1: i32) -> (i32, i32) {
    %c0_i32 = arith.constant 0 : i32
    %c0_i32_0 = arith.constant 0 : i32
    return %c0_i32, %arg1 : i32, i32
  }
  func.func @transform_2(%arg0: i32, %arg1: i32) -> (i32, i32) {
    %c0_i32 = arith.constant 0 : i32
    %c0_i32_0 = arith.constant 0 : i32
    return %c0_i32, %arg1 : i32, i32
  }
  func.func @transform_3(%arg0: i32, %arg1: i32) -> (i32, i32) {
    %c0_i32 = arith.constant 0 : i32
    %c0_i32_0 = arith.constant 0 : i32
    return %c0_i32, %arg1 : i32, i32
  }
  func.func @transform_4(%arg0: i32, %arg1: i32) -> (i32, i32, i32) {
    %c0_i32 = arith.constant 0 : i32
    %c0_i32_0 = arith.constant 0 : i32
    return %arg0, %c0_i32, %arg1 : i32, i32, i32
  }
}

module attributes {stable_mosaic.version = 11 : i64} {
  func.func @_fused_conv_kernel(%arg0: i32, %arg1: i32, %arg2: memref<1x64x256xf32, #tpu.memory_space<vmem>>, %arg3: memref<256x128xf32, #tpu.memory_space<vmem>>, %arg4: memref<1x128xf32, #tpu.memory_space<vmem>>, %arg5: memref<1x128xf32, #tpu.memory_space<vmem>>, %arg6: memref<1x64x128xf32, #tpu.memory_space<vmem>>) attributes {dimension_semantics = [#tpu.dimension_semantics<parallel>, #tpu.dimension_semantics<parallel>], iteration_bounds = array<i64: 2, 1>, scalar_prefetch = 0 : i64, scratch_operands = 0 : i64, tpu.core_type = #tpu.core_type<tc>, window_params = [{transform_indices = @transform_0, window_bounds = array<i64: 1, 64, 256>}, {transform_indices = @transform_1, window_bounds = array<i64: 256, 128>}, {transform_indices = @transform_2, window_bounds = array<i64: 1, 128>}, {transform_indices = @transform_3, window_bounds = array<i64: 1, 128>}, {transform_indices = @transform_4, window_bounds = array<i64: 1, 64, 128>}]} {
    %c0 = arith.constant 0 : index
    %c0_0 = arith.constant 0 : index
    %c0_1 = arith.constant 0 : index
    %0 = vector.load %arg2[%c0, %c0_0, %c0_1] : memref<1x64x256xf32, #tpu.memory_space<vmem>>, vector<1x64x256xf32>
    %1 = vector.shape_cast %0 : vector<1x64x256xf32> to vector<64x256xf32>
    %c0_2 = arith.constant 0 : index
    %c0_3 = arith.constant 0 : index
    %2 = vector.load %arg3[%c0_2, %c0_3] : memref<256x128xf32, #tpu.memory_space<vmem>>, vector<256x128xf32>
    %cst = arith.constant dense<0.000000e+00> : vector<64x128xf32>
    %3 = tpu.matmul %1, %2, %cst {dimension_numbers = #tpu.dot_dimension_numbers<[1], [0], [0], [1], [0, 0, 1, 1], [], []>} : vector<64x256xf32>, vector<256x128xf32>, vector<64x128xf32> -> vector<64x128xf32>
    %cst_4 = arith.constant dense<0.000000e+00> : vector<128xf32>
    %4 = vector.multi_reduction <add>, %3, %cst_4 [0] : vector<64x128xf32> to vector<128xf32>
    %5 = vector.shape_cast %4 : vector<128xf32> to vector<1x128xf32>
    %cst_5 = arith.constant 6.400000e+01 : f32
    %6 = vector.broadcast %cst_5 : f32 to vector<1x128xf32>
    %7 = arith.divf %5, %6 : vector<1x128xf32>
    %8 = vector.broadcast %7 : vector<1x128xf32> to vector<64x128xf32>
    %9 = arith.subf %3, %8 : vector<64x128xf32>
    %10 = arith.mulf %9, %9 : vector<64x128xf32>
    %cst_6 = arith.constant dense<0.000000e+00> : vector<128xf32>
    %11 = vector.multi_reduction <add>, %10, %cst_6 [0] : vector<64x128xf32> to vector<128xf32>
    %12 = vector.shape_cast %11 : vector<128xf32> to vector<1x128xf32>
    %cst_7 = arith.constant 6.400000e+01 : f32
    %13 = vector.broadcast %cst_7 : f32 to vector<1x128xf32>
    %14 = arith.divf %12, %13 : vector<1x128xf32>
    %c0_8 = arith.constant 0 : index
    %c0_9 = arith.constant 0 : index
    %15 = vector.load %arg4[%c0_8, %c0_9] : memref<1x128xf32, #tpu.memory_space<vmem>>, vector<1x128xf32>
    %16 = vector.broadcast %7 : vector<1x128xf32> to vector<64x128xf32>
    %17 = arith.subf %3, %16 : vector<64x128xf32>
    %18 = vector.broadcast %15 : vector<1x128xf32> to vector<64x128xf32>
    %19 = arith.mulf %18, %17 : vector<64x128xf32>
    %cst_10 = arith.constant 9.99999974E-6 : f32
    %20 = vector.broadcast %cst_10 : f32 to vector<1x128xf32>
    %21 = arith.addf %14, %20 : vector<1x128xf32>
    %22 = math.rsqrt %21 : vector<1x128xf32>
    %23 = vector.broadcast %22 : vector<1x128xf32> to vector<64x128xf32>
    %24 = arith.mulf %19, %23 : vector<64x128xf32>
    %c0_11 = arith.constant 0 : index
    %c0_12 = arith.constant 0 : index
    %25 = vector.load %arg5[%c0_11, %c0_12] : memref<1x128xf32, #tpu.memory_space<vmem>>, vector<1x128xf32>
    %26 = vector.broadcast %25 : vector<1x128xf32> to vector<64x128xf32>
    %27 = arith.addf %24, %26 : vector<64x128xf32>
    %cst_13 = arith.constant 0.000000e+00 : f32
    %28 = vector.broadcast %cst_13 : f32 to vector<64x128xf32>
    %29 = arith.cmpf oge, %27, %28 : vector<64x128xf32>
    %cst_14 = arith.constant 2.000000e-01 : f32
    %30 = vector.broadcast %cst_14 : f32 to vector<64x128xf32>
    %31 = arith.mulf %30, %27 : vector<64x128xf32>
    %32 = arith.select %29, %27, %31 : vector<64x128xi1>, vector<64x128xf32>
    %c0_15 = arith.constant 0 : index
    %c0_16 = arith.constant 0 : index
    %c0_17 = arith.constant 0 : index
    %33 = vector.load %arg6[%c0_15, %c0_16, %c0_17] : memref<1x64x128xf32, #tpu.memory_space<vmem>>, vector<1x64x128xf32>
    %34 = vector.shape_cast %33 : vector<1x64x128xf32> to vector<64x128xf32>
    %35 = vector.shape_cast %32 : vector<64x128xf32> to vector<1x64x128xf32>
    tpu.vector_store %arg6[%c0_15, %c0_16, %c0_17], %35 {strides = array<i32>} : memref<1x64x128xf32, #tpu.memory_space<vmem>>, vector<1x64x128xf32>,
    return
  }
  func.func @transform_0(%arg0: i32, %arg1: i32) -> (i32, i32, i32) {
    %c0_i32 = arith.constant 0 : i32
    %c0_i32_0 = arith.constant 0 : i32
    %c0_i32_1 = arith.constant 0 : i32
    return %arg0, %c0_i32, %c0_i32_0 : i32, i32, i32
  }
  func.func @transform_1(%arg0: i32, %arg1: i32) -> (i32, i32) {
    %c0_i32 = arith.constant 0 : i32
    %c0_i32_0 = arith.constant 0 : i32
    return %c0_i32, %arg1 : i32, i32
  }
  func.func @transform_2(%arg0: i32, %arg1: i32) -> (i32, i32) {
    %c0_i32 = arith.constant 0 : i32
    %c0_i32_0 = arith.constant 0 : i32
    return %c0_i32, %arg1 : i32, i32
  }
  func.func @transform_3(%arg0: i32, %arg1: i32) -> (i32, i32) {
    %c0_i32 = arith.constant 0 : i32
    %c0_i32_0 = arith.constant 0 : i32
    return %c0_i32, %arg1 : i32, i32
  }
  func.func @transform_4(%arg0: i32, %arg1: i32) -> (i32, i32, i32) {
    %c0_i32 = arith.constant 0 : i32
    %c0_i32_0 = arith.constant 0 : i32
    return %arg0, %c0_i32, %arg1 : i32, i32, i32
  }
}

module attributes {stable_mosaic.version = 11 : i64} {
  func.func @_fused_conv_kernel(%arg0: i32, %arg1: i32, %arg2: memref<1x16x512xf32, #tpu.memory_space<vmem>>, %arg3: memref<512x128xf32, #tpu.memory_space<vmem>>, %arg4: memref<1x128xf32, #tpu.memory_space<vmem>>, %arg5: memref<1x128xf32, #tpu.memory_space<vmem>>, %arg6: memref<1x16x128xf32, #tpu.memory_space<vmem>>) attributes {dimension_semantics = [#tpu.dimension_semantics<parallel>, #tpu.dimension_semantics<parallel>], iteration_bounds = array<i64: 2, 1>, scalar_prefetch = 0 : i64, scratch_operands = 0 : i64, tpu.core_type = #tpu.core_type<tc>, window_params = [{transform_indices = @transform_0, window_bounds = array<i64: 1, 16, 512>}, {transform_indices = @transform_1, window_bounds = array<i64: 512, 128>}, {transform_indices = @transform_2, window_bounds = array<i64: 1, 128>}, {transform_indices = @transform_3, window_bounds = array<i64: 1, 128>}, {transform_indices = @transform_4, window_bounds = array<i64: 1, 16, 128>}]} {
    %c0 = arith.constant 0 : index
    %c0_0 = arith.constant 0 : index
    %c0_1 = arith.constant 0 : index
    %0 = vector.load %arg2[%c0, %c0_0, %c0_1] : memref<1x16x512xf32, #tpu.memory_space<vmem>>, vector<1x16x512xf32>
    %1 = vector.shape_cast %0 : vector<1x16x512xf32> to vector<16x512xf32>
    %c0_2 = arith.constant 0 : index
    %c0_3 = arith.constant 0 : index
    %2 = vector.load %arg3[%c0_2, %c0_3] : memref<512x128xf32, #tpu.memory_space<vmem>>, vector<512x128xf32>
    %cst = arith.constant dense<0.000000e+00> : vector<16x128xf32>
    %3 = tpu.matmul %1, %2, %cst {dimension_numbers = #tpu.dot_dimension_numbers<[1], [0], [0], [1], [0, 0, 1, 1], [], []>} : vector<16x512xf32>, vector<512x128xf32>, vector<16x128xf32> -> vector<16x128xf32>
    %cst_4 = arith.constant dense<0.000000e+00> : vector<128xf32>
    %4 = vector.multi_reduction <add>, %3, %cst_4 [0] : vector<16x128xf32> to vector<128xf32>
    %5 = vector.shape_cast %4 : vector<128xf32> to vector<1x128xf32>
    %cst_5 = arith.constant 1.600000e+01 : f32
    %6 = vector.broadcast %cst_5 : f32 to vector<1x128xf32>
    %7 = arith.divf %5, %6 : vector<1x128xf32>
    %8 = vector.broadcast %7 : vector<1x128xf32> to vector<16x128xf32>
    %9 = arith.subf %3, %8 : vector<16x128xf32>
    %10 = arith.mulf %9, %9 : vector<16x128xf32>
    %cst_6 = arith.constant dense<0.000000e+00> : vector<128xf32>
    %11 = vector.multi_reduction <add>, %10, %cst_6 [0] : vector<16x128xf32> to vector<128xf32>
    %12 = vector.shape_cast %11 : vector<128xf32> to vector<1x128xf32>
    %cst_7 = arith.constant 1.600000e+01 : f32
    %13 = vector.broadcast %cst_7 : f32 to vector<1x128xf32>
    %14 = arith.divf %12, %13 : vector<1x128xf32>
    %c0_8 = arith.constant 0 : index
    %c0_9 = arith.constant 0 : index
    %15 = vector.load %arg4[%c0_8, %c0_9] : memref<1x128xf32, #tpu.memory_space<vmem>>, vector<1x128xf32>
    %16 = vector.broadcast %7 : vector<1x128xf32> to vector<16x128xf32>
    %17 = arith.subf %3, %16 : vector<16x128xf32>
    %18 = vector.broadcast %15 : vector<1x128xf32> to vector<16x128xf32>
    %19 = arith.mulf %18, %17 : vector<16x128xf32>
    %cst_10 = arith.constant 9.99999974E-6 : f32
    %20 = vector.broadcast %cst_10 : f32 to vector<1x128xf32>
    %21 = arith.addf %14, %20 : vector<1x128xf32>
    %22 = math.rsqrt %21 : vector<1x128xf32>
    %23 = vector.broadcast %22 : vector<1x128xf32> to vector<16x128xf32>
    %24 = arith.mulf %19, %23 : vector<16x128xf32>
    %c0_11 = arith.constant 0 : index
    %c0_12 = arith.constant 0 : index
    %25 = vector.load %arg5[%c0_11, %c0_12] : memref<1x128xf32, #tpu.memory_space<vmem>>, vector<1x128xf32>
    %26 = vector.broadcast %25 : vector<1x128xf32> to vector<16x128xf32>
    %27 = arith.addf %24, %26 : vector<16x128xf32>
    %cst_13 = arith.constant 0.000000e+00 : f32
    %28 = vector.broadcast %cst_13 : f32 to vector<16x128xf32>
    %29 = arith.cmpf oge, %27, %28 : vector<16x128xf32>
    %cst_14 = arith.constant 2.000000e-01 : f32
    %30 = vector.broadcast %cst_14 : f32 to vector<16x128xf32>
    %31 = arith.mulf %30, %27 : vector<16x128xf32>
    %32 = arith.select %29, %27, %31 : vector<16x128xi1>, vector<16x128xf32>
    %c0_15 = arith.constant 0 : index
    %c0_16 = arith.constant 0 : index
    %c0_17 = arith.constant 0 : index
    %33 = vector.load %arg6[%c0_15, %c0_16, %c0_17] : memref<1x16x128xf32, #tpu.memory_space<vmem>>, vector<1x16x128xf32>
    %34 = vector.shape_cast %33 : vector<1x16x128xf32> to vector<16x128xf32>
    %35 = vector.shape_cast %32 : vector<16x128xf32> to vector<1x16x128xf32>
    tpu.vector_store %arg6[%c0_15, %c0_16, %c0_17], %35 {strides = array<i32>} : memref<1x16x128xf32, #tpu.memory_space<vmem>>, vector<1x16x128xf32>,
    return
  }
  func.func @transform_0(%arg0: i32, %arg1: i32) -> (i32, i32, i32) {
    %c0_i32 = arith.constant 0 : i32
    %c0_i32_0 = arith.constant 0 : i32
    %c0_i32_1 = arith.constant 0 : i32
    return %arg0, %c0_i32, %c0_i32_0 : i32, i32, i32
  }
  func.func @transform_1(%arg0: i32, %arg1: i32) -> (i32, i32) {
    %c0_i32 = arith.constant 0 : i32
    %c0_i32_0 = arith.constant 0 : i32
    return %c0_i32, %arg1 : i32, i32
  }
  func.func @transform_2(%arg0: i32, %arg1: i32) -> (i32, i32) {
    %c0_i32 = arith.constant 0 : i32
    %c0_i32_0 = arith.constant 0 : i32
    return %c0_i32, %arg1 : i32, i32
  }
  func.func @transform_3(%arg0: i32, %arg1: i32) -> (i32, i32) {
    %c0_i32 = arith.constant 0 : i32
    %c0_i32_0 = arith.constant 0 : i32
    return %c0_i32, %arg1 : i32, i32
  }
  func.func @transform_4(%arg0: i32, %arg1: i32) -> (i32, i32, i32) {
    %c0_i32 = arith.constant 0 : i32
    %c0_i32_0 = arith.constant 0 : i32
    return %arg0, %c0_i32, %arg1 : i32, i32, i32
  }
}

module attributes {stable_mosaic.version = 11 : i64} {
  func.func @_fused_conv_kernel(%arg0: i32, %arg1: i32, %arg2: memref<1x1x1024xf32, #tpu.memory_space<vmem>>, %arg3: memref<1024x128xf32, #tpu.memory_space<vmem>>, %arg4: memref<1x128xf32, #tpu.memory_space<vmem>>, %arg5: memref<1x128xf32, #tpu.memory_space<vmem>>, %arg6: memref<1x1x128xf32, #tpu.memory_space<vmem>>) attributes {dimension_semantics = [#tpu.dimension_semantics<parallel>, #tpu.dimension_semantics<parallel>], iteration_bounds = array<i64: 2, 1>, scalar_prefetch = 0 : i64, scratch_operands = 0 : i64, tpu.core_type = #tpu.core_type<tc>, window_params = [{transform_indices = @transform_0, window_bounds = array<i64: 1, 1, 1024>}, {transform_indices = @transform_1, window_bounds = array<i64: 1024, 128>}, {transform_indices = @transform_2, window_bounds = array<i64: 1, 128>}, {transform_indices = @transform_3, window_bounds = array<i64: 1, 128>}, {transform_indices = @transform_4, window_bounds = array<i64: 1, 1, 128>}]} {
    %c0 = arith.constant 0 : index
    %c0_0 = arith.constant 0 : index
    %c0_1 = arith.constant 0 : index
    %0 = vector.load %arg2[%c0, %c0_0, %c0_1] : memref<1x1x1024xf32, #tpu.memory_space<vmem>>, vector<1x1x1024xf32>
    %1 = vector.shape_cast %0 : vector<1x1x1024xf32> to vector<1x1024xf32>
    %c0_2 = arith.constant 0 : index
    %c0_3 = arith.constant 0 : index
    %2 = vector.load %arg3[%c0_2, %c0_3] : memref<1024x128xf32, #tpu.memory_space<vmem>>, vector<1024x128xf32>
    %cst = arith.constant dense<0.000000e+00> : vector<1x128xf32>
    %3 = tpu.matmul %1, %2, %cst {dimension_numbers = #tpu.dot_dimension_numbers<[1], [0], [0], [1], [0, 0, 1, 1], [], []>} : vector<1x1024xf32>, vector<1024x128xf32>, vector<1x128xf32> -> vector<1x128xf32>
    %c0_4 = arith.constant 0 : index
    %c0_5 = arith.constant 0 : index
    %4 = vector.load %arg5[%c0_4, %c0_5] : memref<1x128xf32, #tpu.memory_space<vmem>>, vector<1x128xf32>
    %5 = arith.addf %3, %4 : vector<1x128xf32>
    %c0_6 = arith.constant 0 : index
    %c0_7 = arith.constant 0 : index
    %c0_8 = arith.constant 0 : index
    %6 = vector.load %arg6[%c0_6, %c0_7, %c0_8] : memref<1x1x128xf32, #tpu.memory_space<vmem>>, vector<1x1x128xf32>
    %7 = vector.shape_cast %6 : vector<1x1x128xf32> to vector<1x128xf32>
    %8 = vector.shape_cast %5 : vector<1x128xf32> to vector<1x1x128xf32>
    tpu.vector_store %arg6[%c0_6, %c0_7, %c0_8], %8 {strides = array<i32>} : memref<1x1x128xf32, #tpu.memory_space<vmem>>, vector<1x1x128xf32>,
    return
  }
  func.func @transform_0(%arg0: i32, %arg1: i32) -> (i32, i32, i32) {
    %c0_i32 = arith.constant 0 : i32
    %c0_i32_0 = arith.constant 0 : i32
    %c0_i32_1 = arith.constant 0 : i32
    return %arg0, %c0_i32, %c0_i32_0 : i32, i32, i32
  }
  func.func @transform_1(%arg0: i32, %arg1: i32) -> (i32, i32) {
    %c0_i32 = arith.constant 0 : i32
    %c0_i32_0 = arith.constant 0 : i32
    return %c0_i32, %arg1 : i32, i32
  }
  func.func @transform_2(%arg0: i32, %arg1: i32) -> (i32, i32) {
    %c0_i32 = arith.constant 0 : i32
    %c0_i32_0 = arith.constant 0 : i32
    return %c0_i32, %arg1 : i32, i32
  }
  func.func @transform_3(%arg0: i32, %arg1: i32) -> (i32, i32) {
    %c0_i32 = arith.constant 0 : i32
    %c0_i32_0 = arith.constant 0 : i32
    return %c0_i32, %arg1 : i32, i32
  }
  func.func @transform_4(%arg0: i32, %arg1: i32) -> (i32, i32, i32) {
    %c0_i32 = arith.constant 0 : i32
    %c0_i32_0 = arith.constant 0 : i32
    return %arg0, %c0_i32, %arg1 : i32, i32, i32
  }
}

</mosaic_0001>

<bundles_post_ra>
// kernel: discriminator_forward.5
= control target key start
LH: loop header
LB: loop body
LE: loop exit
PB: predicated region body
PF: predicated region fallthrough
CT: control target
= control target key end

     0   :  { %s2692_s15 = smov 0   ;;  %s2694_s16 = smov 0   ;;  %s3276_s0 = inlined_call_operand.vmem [shape: f32[2,1024,48], index: 0, kind: input, shape index: {}]   ;;  %s3277_s1 = inlined_call_operand.vmem [shape: f32[48,128], index: 1, kind: input, shape index: {}]   ;;  %s3278_s2 = inlined_call_operand.vmem [shape: f32[1,128], index: 2, kind: input, shape index: {}]   ;;  %s3279_s3 = inlined_call_operand.vmem [shape: f32[1,128], index: 3, kind: input, shape index: {}]   ;;  %s3280_s4 = inlined_call_operand.vmem [shape: f32[2,1024,128], index: 4, kind: output, shape index: {}]  }
   0x1   :  { %s2696_s17 = smov 0  }
   0x2 LB: > { %s26_s2 = sadd.s32 1, %s2661_s16  ;;  %p2130_p0 = scmp.ge.s32.totalorder %s2665_s17, 1  ;;  %s2665_s17 = sphi %s2696_s17, %s14_s17   ;;  %s2661_s16 = sphi %s2694_s16, %s3282_s16   ;;  %s2657_s15 = sphi %s2692_s15, %s3281_s15  }
   0x3   : > { %p28_p1 = scmp.ge.s32.totalorder %s26_s2, 2  ;;  %p201_p2 = scmp.lt.s32.totalorder %s2665_s17, 3 }
   0x5   : > { %s3284_s2 = smov (%p28_p1, %s26_s2), 0  ;;  %p202_p3 = pnand %p2130_p0, %p201_p2 }
   0x6   : > { %p240_p4 = scmp.lt.s32.totalorder (!%p202_p3), %s2657_s15, 1 }
   0x7   : > { %205 = sbr.rel (%p202_p3) target bundleno = 352 (0x160), region = 36 }
   0xc   : > { %v396_v0 = vld [vmem:[%s3277_s1 + $0x28] sm:$0xff]  ;;  %v395_v1 = vld [vmem:[%s3277_s1 + $0x20] sm:$0xff]  ;;  %v394_v2 = vld [vmem:[%s3277_s1 + $0x18] sm:$0xff]  ;;  %s3286_s15 = smov (!%p240_p4, %s2657_s15), 1  ;;  %vm404_vm0 = vcmask 392192  }
   0xd   : > { %2402 = vmatprep.subr.mxu0 %v396_v0  ;;  %2606 = vmatprep.subr.mxu1 %v396_v0  ;;  %v393_v3 = vld [vmem:[%s3277_s1 + $0x10] sm:$0xff]  ;;  %s2266_s26 = sshll.u32 %s3286_s15, 10  ;;  %v392_v4 = vld [vmem:[%s3277_s1 + $0x8] sm:$0xff]  ;;  %v391_v5 = vld [vmem:[%s3277_s1] sm:$0xff] }
   0xe   : > { %2403 = vmatpush3.msra.mxu0 %v396_v0  ;;  %2612 = vmatpush3.msra.mxu1 %v396_v0  ;;  %s2733_s5 = scalar_lea.vmem %s3276_s0, %s2266_s26  ;;  %s3006_s12 = scalar_lea.vmem %s3280_s4, %s2266_s26 }
   0xf   : > { %2404 = vmatprep.subr.mxu0 %v395_v1  ;;  %2607 = vmatprep.subr.mxu1 %v395_v1  ;;  %v263_v6 = vld [vmem:[%s2733_s5] sm:$0xff]  ;;  %v264_v8 = vld [vmem:[%s2733_s5 + $0x8] sm:$0xff]  ;;  %v265_v10 = vld [vmem:[%s2733_s5 + $0x10] sm:$0xff] }
  0x10   : > { %2405 = vmatpush3.msra.mxu0 %v395_v1  ;;  %2613 = vmatpush3.msra.mxu1 %v395_v1  ;;  %v327_v7 = vld [vmem:[%s2733_s5 + $0x200] sm:$0xff]  ;;  %v328_v9 = vld [vmem:[%s2733_s5 + $0x208] sm:$0xff]  ;;  %v329_v11 = vld [vmem:[%s2733_s5 + $0x210] sm:$0xff] }
  0x11   : > { %2406 = vmatprep.subr.mxu0 %v394_v2  ;;  %2608 = vmatprep.subr.mxu1 %v394_v2  ;;  %v266_v12 = vld [vmem:[%s2733_s5 + $0x18] sm:$0xff]  ;;  %v267_v14 = vld [vmem:[%s2733_s5 + $0x20] sm:$0xff]  ;;  %v268_v16 = vld [vmem:[%s2733_s5 + $0x28] sm:$0xff] }
  0x12   : > { %2407 = vmatpush3.msra.mxu0 %v394_v2  ;;  %2614 = vmatpush3.msra.mxu1 %v394_v2  ;;  %v330_v13 = vld [vmem:[%s2733_s5 + $0x218] sm:$0xff]  ;;  %v331_v15 = vld [vmem:[%s2733_s5 + $0x220] sm:$0xff]  ;;  %v332_v17 = vld [vmem:[%s2733_s5 + $0x228] sm:$0xff] }
  0x13   : > { %2408 = vmatprep.subr.mxu0 %v393_v3  ;;  %2609 = vmatprep.subr.mxu1 %v393_v3  ;;  %v269_v18 = vld [vmem:[%s2733_s5 + $0x30] sm:$0xff]  ;;  %v270_v20 = vld [vmem:[%s2733_s5 + $0x38] sm:$0xff]  ;;  %v271_v22 = vld [vmem:[%s2733_s5 + $0x40] sm:$0xff] }
  0x14   : > { %2409 = vmatpush3.msra.mxu0 %v393_v3  ;;  %2615 = vmatpush3.msra.mxu1 %v393_v3  ;;  %v333_v19 = vld [vmem:[%s2733_s5 + $0x230] sm:$0xff]  ;;  %v334_v21 = vld [vmem:[%s2733_s5 + $0x238] sm:$0xff]  ;;  %v335_v23 = vld [vmem:[%s2733_s5 + $0x240] sm:$0xff] }
  0x15   : > { %2410 = vmatprep.subr.mxu0 %v392_v4  ;;  %2610 = vmatprep.subr.mxu1 %v392_v4  ;;  %v272_v24 = vld [vmem:[%s2733_s5 + $0x48] sm:$0xff]  ;;  %v273_v26 = vld [vmem:[%s2733_s5 + $0x50] sm:$0xff]  ;;  %v274_v28 = vld [vmem:[%s2733_s5 + $0x58] sm:$0xff] }
  0x16   : > { %2411 = vmatpush3.msra.mxu0 %v392_v4  ;;  %2616 = vmatpush3.msra.mxu1 %v392_v4  ;;  %v336_v25 = vld [vmem:[%s2733_s5 + $0x248] sm:$0xff]  ;;  %v337_v27 = vld [vmem:[%s2733_s5 + $0x250] sm:$0xff]  ;;  %v338_v29 = vld [vmem:[%s2733_s5 + $0x258] sm:$0xff] }
  0x17   : > { %2412 = vmatprep.subr.mxu0 %v391_v5  ;;  %2611 = vmatprep.subr.mxu1 %v391_v5  ;;  %v275_v30 = vld [vmem:[%s2733_s5 + $0x60] sm:$0xff]  ;;  %v276_v32 = vld [vmem:[%s2733_s5 + $0x68] sm:$0xff]  ;;  %v277_v34 = vld [vmem:[%s2733_s5 + $0x70] sm:$0xff] }
  0x18   : > { %2413 = vmatpush3.msra.mxu0 %v391_v5  ;;  %2617 = vmatpush3.msra.mxu1 %v391_v5  ;;  %v339_v31 = vld [vmem:[%s2733_s5 + $0x260] sm:$0xff]  ;;  %v340_v33 = vld [vmem:[%s2733_s5 + $0x268] sm:$0xff]  ;;  %v341_v35 = vld [vmem:[%s2733_s5 + $0x270] sm:$0xff] }
  0x19   : > { %2414 = vmatprep.mubr.msk.f32.mxu0 %vm404_vm0, %v263_v6  ;;  %2510 = vmatprep.mubr.msk.f32.mxu1 %vm404_vm0, %v327_v7  ;;  %v278_v36 = vld [vmem:[%s2733_s5 + $0x78] sm:$0xff]  ;;  %v279_v38 = vld [vmem:[%s2733_s5 + $0x80] sm:$0xff]  ;;  %v280_v40 = vld [vmem:[%s2733_s5 + $0x88] sm:$0xff] }
  0x1a   : > { %2415 = vmatmul.mubr.msk.f32.vlgmr.msra.gmra.mxu0 %vm404_vm0, %v264_v8  ;;  %2511 = vmatmul.mubr.msk.f32.vlgmr.msra.gmra.mxu1 %vm404_vm0, %v328_v9  ;;  %v342_v37 = vld [vmem:[%s2733_s5 + $0x278] sm:$0xff]  ;;  %v343_v39 = vld [vmem:[%s2733_s5 + $0x280] sm:$0xff]  ;;  %v344_v41 = vld [vmem:[%s2733_s5 + $0x288] sm:$0xff] }
  0x1b   : > { %2417 = vmatprep.mubr.msk.f32.mxu0 %vm404_vm0, %v265_v10  ;;  %2513 = vmatprep.mubr.msk.f32.mxu1 %vm404_vm0, %v329_v11  ;;  %v281_v42 = vld [vmem:[%s2733_s5 + $0x90] sm:$0xff]  ;;  %v282_v44 = vld [vmem:[%s2733_s5 + $0x98] sm:$0xff]  ;;  %v283_v46 = vld [vmem:[%s2733_s5 + $0xa0] sm:$0xff] }
  0x1c   : > { %v345_v43 = vld [vmem:[%s2733_s5 + $0x290] sm:$0xff]  ;;  %v346_v45 = vld [vmem:[%s2733_s5 + $0x298] sm:$0xff]  ;;  %v347_v47 = vld [vmem:[%s2733_s5 + $0x2a0] sm:$0xff] }
  0x1d   : > { %v284_v48 = vld [vmem:[%s2733_s5 + $0xa8] sm:$0xff]  ;;  %v285_v50 = vld [vmem:[%s2733_s5 + $0xb0] sm:$0xff]  ;;  %v286_v52 = vld [vmem:[%s2733_s5 + $0xb8] sm:$0xff] }
  0x1e   : > { %2418 = vmatmul.mubr.msk.f32.gmra.mxu0 %vm404_vm0, %v266_v12  ;;  %2514 = vmatmul.mubr.msk.f32.gmra.mxu1 %vm404_vm0, %v330_v13  ;;  %v348_v49 = vld [vmem:[%s2733_s5 + $0x2a8] sm:$0xff]  ;;  %v349_v51 = vld [vmem:[%s2733_s5 + $0x2b0] sm:$0xff]  ;;  %v350_v53 = vld [vmem:[%s2733_s5 + $0x2b8] sm:$0xff] }
  0x1f   : > { %2420 = vmatprep.mubr.msk.f32.mxu0 %vm404_vm0, %v267_v14  ;;  %2516 = vmatprep.mubr.msk.f32.mxu1 %vm404_vm0, %v331_v15  ;;  %v287_v54 = vld [vmem:[%s2733_s5 + $0xc0] sm:$0xff]  ;;  %v288_v56 = vld [vmem:[%s2733_s5 + $0xc8] sm:$0xff]  ;;  %v289_v58 = vld [vmem:[%s2733_s5 + $0xd0] sm:$0xff] }
  0x20   : > { %v351_v55 = vld [vmem:[%s2733_s5 + $0x2c0] sm:$0xff]  ;;  %v352_v57 = vld [vmem:[%s2733_s5 + $0x2c8] sm:$0xff]  ;;  %v353_v59 = vld [vmem:[%s2733_s5 + $0x2d0] sm:$0xff] }
  0x21   : > { %v290_v60 = vld [vmem:[%s2733_s5 + $0xd8] sm:$0xff]  ;;  %v291_v62 = vld [vmem:[%s2733_s5 + $0xe0] sm:$0xff]  ;;  %v292_v0 = vld [vmem:[%s2733_s5 + $0xe8] sm:$0xff] }
  0x22   : > { %2421 = vmatmul.mubr.msk.f32.gmra.mxu0 %vm404_vm0, %v268_v16  ;;  %2517 = vmatmul.mubr.msk.f32.gmra.mxu1 %vm404_vm0, %v332_v17  ;;  %v354_v61 = vld [vmem:[%s2733_s5 + $0x2d8] sm:$0xff]  ;;  %v355_v63 = vld [vmem:[%s2733_s5 + $0x2e0] sm:$0xff]  ;;  %v356_v1 = vld [vmem:[%s2733_s5 + $0x2e8] sm:$0xff] }
  0x23   : > { %2423 = vmatprep.mubr.msk.f32.mxu0 %vm404_vm0, %v269_v18  ;;  %2519 = vmatprep.mubr.msk.f32.mxu1 %vm404_vm0, %v333_v19  ;;  %v293_v2 = vld [vmem:[%s2733_s5 + $0xf0] sm:$0xff]  ;;  %v294_v4 = vld [vmem:[%s2733_s5 + $0xf8] sm:$0xff]  ;;  %v295_v6 = vld [vmem:[%s2733_s5 + $0x100] sm:$0xff] }
  0x24   : > { %v357_v3 = vld [vmem:[%s2733_s5 + $0x2f0] sm:$0xff]  ;;  %v358_v5 = vld [vmem:[%s2733_s5 + $0x2f8] sm:$0xff]  ;;  %v359_v7 = vld [vmem:[%s2733_s5 + $0x300] sm:$0xff] }
  0x25   : > { %v296_v8 = vld [vmem:[%s2733_s5 + $0x108] sm:$0xff]  ;;  %v297_v10 = vld [vmem:[%s2733_s5 + $0x110] sm:$0xff]  ;;  %v298_v12 = vld [vmem:[%s2733_s5 + $0x118] sm:$0xff] }
  0x26   : > { %2424 = vmatmul.mubr.msk.f32.gmra.mxu0 %vm404_vm0, %v270_v20  ;;  %2520 = vmatmul.mubr.msk.f32.gmra.mxu1 %vm404_vm0, %v334_v21  ;;  %v360_v9 = vld [vmem:[%s2733_s5 + $0x308] sm:$0xff]  ;;  %v361_v11 = vld [vmem:[%s2733_s5 + $0x310] sm:$0xff]  ;;  %v362_v13 = vld [vmem:[%s2733_s5 + $0x318] sm:$0xff] }
  0x27   : > { %2426 = vmatprep.mubr.msk.f32.mxu0 %vm404_vm0, %v271_v22  ;;  %2522 = vmatprep.mubr.msk.f32.mxu1 %vm404_vm0, %v335_v23  ;;  %v299_v14 = vld [vmem:[%s2733_s5 + $0x120] sm:$0xff]  ;;  %v300_v16 = vld [vmem:[%s2733_s5 + $0x128] sm:$0xff]  ;;  %v301_v18 = vld [vmem:[%s2733_s5 + $0x130] sm:$0xff] }
  0x28   : > { %v363_v15 = vld [vmem:[%s2733_s5 + $0x320] sm:$0xff]  ;;  %v364_v17 = vld [vmem:[%s2733_s5 + $0x328] sm:$0xff]  ;;  %v365_v19 = vld [vmem:[%s2733_s5 + $0x330] sm:$0xff] }
  0x29   : > { %v302_v20 = vld [vmem:[%s2733_s5 + $0x138] sm:$0xff]  ;;  %v303_v22 = vld [vmem:[%s2733_s5 + $0x140] sm:$0xff] }
  0x2a   : > { %2427 = vmatmul.mubr.msk.f32.gmra.mxu0 %vm404_vm0, %v272_v24  ;;  %2523 = vmatmul.mubr.msk.f32.gmra.mxu1 %vm404_vm0, %v336_v25  ;;  %v366_v21 = vld [vmem:[%s2733_s5 + $0x338] sm:$0xff]  ;;  %v367_v23 = vld [vmem:[%s2733_s5 + $0x340] sm:$0xff]  ;;  %v304_v24 = vld [vmem:[%s2733_s5 + $0x148] sm:$0xff] }
  0x2b   : > { %2429 = vmatprep.mubr.msk.f32.mxu0 %vm404_vm0, %v273_v26  ;;  %2525 = vmatprep.mubr.msk.f32.mxu1 %vm404_vm0, %v337_v27  ;;  %v368_v25 = vld [vmem:[%s2733_s5 + $0x348] sm:$0xff]  ;;  %v305_v26 = vld [vmem:[%s2733_s5 + $0x150] sm:$0xff] }
  0x2c   : > { %v369_v27 = vld [vmem:[%s2733_s5 + $0x350] sm:$0xff] }
  0x2e   : > { %2430 = vmatmul.mubr.msk.f32.gmra.mxu0 %vm404_vm0, %v274_v28  ;;  %2526 = vmatmul.mubr.msk.f32.gmra.mxu1 %vm404_vm0, %v338_v29  ;;  %v306_v28 = vld [vmem:[%s2733_s5 + $0x158] sm:$0xff] }
  0x2f   : > { %2432 = vmatprep.mubr.msk.f32.mxu0 %vm404_vm0, %v275_v30  ;;  %2528 = vmatprep.mubr.msk.f32.mxu1 %vm404_vm0, %v339_v31  ;;  %v370_v29 = vld [vmem:[%s2733_s5 + $0x358] sm:$0xff]  ;;  %v307_v30 = vld [vmem:[%s2733_s5 + $0x160] sm:$0xff] }
  0x30   : > { %v371_v31 = vld [vmem:[%s2733_s5 + $0x360] sm:$0xff] }
  0x32   : > { %2433 = vmatmul.mubr.msk.f32.gmra.mxu0 %vm404_vm0, %v276_v32  ;;  %2529 = vmatmul.mubr.msk.f32.gmra.mxu1 %vm404_vm0, %v340_v33  ;;  %v308_v32 = vld [vmem:[%s2733_s5 + $0x168] sm:$0xff] }
  0x33   : > { %2435 = vmatprep.mubr.msk.f32.mxu0 %vm404_vm0, %v277_v34  ;;  %2531 = vmatprep.mubr.msk.f32.mxu1 %vm404_vm0, %v341_v35  ;;  %v372_v33 = vld [vmem:[%s2733_s5 + $0x368] sm:$0xff]  ;;  %v309_v34 = vld [vmem:[%s2733_s5 + $0x170] sm:$0xff] }
  0x34   : > { %v373_v35 = vld [vmem:[%s2733_s5 + $0x370] sm:$0xff] }
  0x36   : > { %2436 = vmatmul.mubr.msk.f32.gmra.mxu0 %vm404_vm0, %v278_v36  ;;  %2532 = vmatmul.mubr.msk.f32.gmra.mxu1 %vm404_vm0, %v342_v37  ;;  %v310_v36 = vld [vmem:[%s2733_s5 + $0x178] sm:$0xff] }
  0x37   : > { %2438 = vmatprep.mubr.msk.f32.mxu0 %vm404_vm0, %v279_v38  ;;  %2534 = vmatprep.mubr.msk.f32.mxu1 %vm404_vm0, %v343_v39  ;;  %v374_v37 = vld [vmem:[%s2733_s5 + $0x378] sm:$0xff]  ;;  %v311_v38 = vld [vmem:[%s2733_s5 + $0x180] sm:$0xff] }
  0x38   : > { %v375_v39 = vld [vmem:[%s2733_s5 + $0x380] sm:$0xff] }
  0x3a   : > { %2439 = vmatmul.mubr.msk.f32.gmra.mxu0 %vm404_vm0, %v280_v40  ;;  %2535 = vmatmul.mubr.msk.f32.gmra.mxu1 %vm404_vm0, %v344_v41  ;;  %v312_v40 = vld [vmem:[%s2733_s5 + $0x188] sm:$0xff] }
  0x3b   : > { %2441 = vmatprep.mubr.msk.f32.mxu0 %vm404_vm0, %v281_v42  ;;  %2537 = vmatprep.mubr.msk.f32.mxu1 %vm404_vm0, %v345_v43  ;;  %v376_v41 = vld [vmem:[%s2733_s5 + $0x388] sm:$0xff]  ;;  %v313_v42 = vld [vmem:[%s2733_s5 + $0x190] sm:$0xff] }
  0x3c   : > { %v377_v43 = vld [vmem:[%s2733_s5 + $0x390] sm:$0xff] }
  0x3e   : > { %2442 = vmatmul.mubr.msk.f32.gmra.mxu0 %vm404_vm0, %v282_v44  ;;  %2538 = vmatmul.mubr.msk.f32.gmra.mxu1 %vm404_vm0, %v346_v45  ;;  %v314_v44 = vld [vmem:[%s2733_s5 + $0x198] sm:$0xff] }
  0x3f   : > { %2444 = vmatprep.mubr.msk.f32.mxu0 %vm404_vm0, %v283_v46  ;;  %2540 = vmatprep.mubr.msk.f32.mxu1 %vm404_vm0, %v347_v47  ;;  %v378_v45 = vld [vmem:[%s2733_s5 + $0x398] sm:$0xff]  ;;  %v315_v46 = vld [vmem:[%s2733_s5 + $0x1a0] sm:$0xff] }
  0x40   : > { %v379_v47 = vld [vmem:[%s2733_s5 + $0x3a0] sm:$0xff] }
  0x42   : > { %2445 = vmatmul.mubr.msk.f32.gmra.mxu0 %vm404_vm0, %v284_v48  ;;  %2541 = vmatmul.mubr.msk.f32.gmra.mxu1 %vm404_vm0, %v348_v49  ;;  %v316_v48 = vld [vmem:[%s2733_s5 + $0x1a8] sm:$0xff] }
  0x43   : > { %2447 = vmatprep.mubr.msk.f32.mxu0 %vm404_vm0, %v285_v50  ;;  %2543 = vmatprep.mubr.msk.f32.mxu1 %vm404_vm0, %v349_v51  ;;  %v380_v49 = vld [vmem:[%s2733_s5 + $0x3a8] sm:$0xff]  ;;  %v317_v50 = vld [vmem:[%s2733_s5 + $0x1b0] sm:$0xff] }
  0x44   : > { %v381_v51 = vld [vmem:[%s2733_s5 + $0x3b0] sm:$0xff] }
  0x46   : > { %2448 = vmatmul.mubr.msk.f32.gmra.mxu0 %vm404_vm0, %v286_v52  ;;  %2544 = vmatmul.mubr.msk.f32.gmra.mxu1 %vm404_vm0, %v350_v53  ;;  %v318_v52 = vld [vmem:[%s2733_s5 + $0x1b8] sm:$0xff] }
  0x47   : > { %2450 = vmatprep.mubr.msk.f32.mxu0 %vm404_vm0, %v287_v54  ;;  %2546 = vmatprep.mubr.msk.f32.mxu1 %vm404_vm0, %v351_v55  ;;  %v382_v53 = vld [vmem:[%s2733_s5 + $0x3b8] sm:$0xff]  ;;  %v319_v54 = vld [vmem:[%s2733_s5 + $0x1c0] sm:$0xff] }
  0x48   : > { %v383_v55 = vld [vmem:[%s2733_s5 + $0x3c0] sm:$0xff] }
  0x4a   : > { %2451 = vmatmul.mubr.msk.f32.gmra.mxu0 %vm404_vm0, %v288_v56  ;;  %2547 = vmatmul.mubr.msk.f32.gmra.mxu1 %vm404_vm0, %v352_v57  ;;  %v320_v56 = vld [vmem:[%s2733_s5 + $0x1c8] sm:$0xff] }
  0x4b   : > { %2453 = vmatprep.mubr.msk.f32.mxu0 %vm404_vm0, %v289_v58  ;;  %2549 = vmatprep.mubr.msk.f32.mxu1 %vm404_vm0, %v353_v59  ;;  %v384_v57 = vld [vmem:[%s2733_s5 + $0x3c8] sm:$0xff]  ;;  %v321_v58 = vld [vmem:[%s2733_s5 + $0x1d0] sm:$0xff] }
  0x4c   : > { %v385_v59 = vld [vmem:[%s2733_s5 + $0x3d0] sm:$0xff] }
  0x4e   : > { %2454 = vmatmul.mubr.msk.f32.gmra.mxu0 %vm404_vm0, %v290_v60  ;;  %2550 = vmatmul.mubr.msk.f32.gmra.mxu1 %vm404_vm0, %v354_v61  ;;  %v322_v60 = vld [vmem:[%s2733_s5 + $0x1d8] sm:$0xff] }
  0x4f   : > { %2456 = vmatprep.mubr.msk.f32.mxu0 %vm404_vm0, %v291_v62  ;;  %2552 = vmatprep.mubr.msk.f32.mxu1 %vm404_vm0, %v355_v63  ;;  %v386_v61 = vld [vmem:[%s2733_s5 + $0x3d8] sm:$0xff]  ;;  %v323_v62 = vld [vmem:[%s2733_s5 + $0x1e0] sm:$0xff] }
  0x50   : > { %v387_v63 = vld [vmem:[%s2733_s5 + $0x3e0] sm:$0xff] }
  0x52   : > { %2457 = vmatmul.mubr.msk.f32.gmra.mxu0 %vm404_vm0, %v292_v0  ;;  %2553 = vmatmul.mubr.msk.f32.gmra.mxu1 %vm404_vm0, %v356_v1  ;;  %v324_v0 = vld [vmem:[%s2733_s5 + $0x1e8] sm:$0xff] }
  0x53   : > { %2459 = vmatprep.mubr.msk.f32.mxu0 %vm404_vm0, %v293_v2  ;;  %2555 = vmatprep.mubr.msk.f32.mxu1 %vm404_vm0, %v357_v3  ;;  %v388_v1 = vld [vmem:[%s2733_s5 + $0x3e8] sm:$0xff]  ;;  %v325_v2 = vld [vmem:[%s2733_s5 + $0x1f0] sm:$0xff] }
  0x54   : > { %v389_v3 = vld [vmem:[%s2733_s5 + $0x3f0] sm:$0xff] }
  0x56   : > { %2460 = vmatmul.mubr.msk.f32.gmra.mxu0 %vm404_vm0, %v294_v4  ;;  %2556 = vmatmul.mubr.msk.f32.gmra.mxu1 %vm404_vm0, %v358_v5  ;;  %v326_v4 = vld [vmem:[%s2733_s5 + $0x1f8] sm:$0xff] }
  0x57   : > { %2462 = vmatprep.mubr.msk.f32.mxu0 %vm404_vm0, %v295_v6  ;;  %2558 = vmatprep.mubr.msk.f32.mxu1 %vm404_vm0, %v359_v7  ;;  %v390_v5 = vld [vmem:[%s2733_s5 + $0x3f8] sm:$0xff]  ;;  %v2997_v6 = vld [vmem:[%s3279_s3] ss:$0 sm:$0xff] }
  0x5a   : > { %2463 = vmatmul.mubr.msk.f32.gmra.mxu0 %vm404_vm0, %v296_v8  ;;  %2559 = vmatmul.mubr.msk.f32.gmra.mxu1 %vm404_vm0, %v360_v9 }
  0x5b   : > { %2465 = vmatprep.mubr.msk.f32.mxu0 %vm404_vm0, %v297_v10  ;;  %2561 = vmatprep.mubr.msk.f32.mxu1 %vm404_vm0, %v361_v11 }
  0x5e   : > { %2466 = vmatmul.mubr.msk.f32.gmra.mxu0 %vm404_vm0, %v298_v12  ;;  %2562 = vmatmul.mubr.msk.f32.gmra.mxu1 %vm404_vm0, %v362_v13 }
  0x5f   : > { %2468 = vmatprep.mubr.msk.f32.mxu0 %vm404_vm0, %v299_v14  ;;  %2564 = vmatprep.mubr.msk.f32.mxu1 %vm404_vm0, %v363_v15 }
  0x62   : > { %2469 = vmatmul.mubr.msk.f32.gmra.mxu0 %vm404_vm0, %v300_v16  ;;  %2565 = vmatmul.mubr.msk.f32.gmra.mxu1 %vm404_vm0, %v364_v17 }
  0x63   : > { %2471 = vmatprep.mubr.msk.f32.mxu0 %vm404_vm0, %v301_v18  ;;  %2567 = vmatprep.mubr.msk.f32.mxu1 %vm404_vm0, %v365_v19 }
  0x66   : > { %2472 = vmatmul.mubr.msk.f32.gmra.mxu0 %vm404_vm0, %v302_v20  ;;  %2568 = vmatmul.mubr.msk.f32.gmra.mxu1 %vm404_vm0, %v366_v21 }
  0x67   : > { %2474 = vmatprep.mubr.msk.f32.mxu0 %vm404_vm0, %v303_v22  ;;  %2570 = vmatprep.mubr.msk.f32.mxu1 %vm404_vm0, %v367_v23 }
  0x6a   : > { %2475 = vmatmul.mubr.msk.f32.gmra.mxu0 %vm404_vm0, %v304_v24  ;;  %2571 = vmatmul.mubr.msk.f32.gmra.mxu1 %vm404_vm0, %v368_v25 }
  0x6b   : > { %2477 = vmatprep.mubr.msk.f32.mxu0 %vm404_vm0, %v305_v26  ;;  %2573 = vmatprep.mubr.msk.f32.mxu1 %vm404_vm0, %v369_v27 }
  0x6e   : > { %2478 = vmatmul.mubr.msk.f32.gmra.mxu0 %vm404_vm0, %v306_v28  ;;  %2574 = vmatmul.mubr.msk.f32.gmra.mxu1 %vm404_vm0, %v370_v29 }
  0x6f   : > { %2480 = vmatprep.mubr.msk.f32.mxu0 %vm404_vm0, %v307_v30  ;;  %2576 = vmatprep.mubr.msk.f32.mxu1 %vm404_vm0, %v371_v31 }
  0x72   : > { %2481 = vmatmul.mubr.msk.f32.gmra.mxu0 %vm404_vm0, %v308_v32  ;;  %2577 = vmatmul.mubr.msk.f32.gmra.mxu1 %vm404_vm0, %v372_v33 }
  0x73   : > { %2483 = vmatprep.mubr.msk.f32.mxu0 %vm404_vm0, %v309_v34  ;;  %2579 = vmatprep.mubr.msk.f32.mxu1 %vm404_vm0, %v373_v35 }
  0x76   : > { %2484 = vmatmul.mubr.msk.f32.gmra.mxu0 %vm404_vm0, %v310_v36  ;;  %2580 = vmatmul.mubr.msk.f32.gmra.mxu1 %vm404_vm0, %v374_v37 }
  0x77   : > { %2486 = vmatprep.mubr.msk.f32.mxu0 %vm404_vm0, %v311_v38  ;;  %2582 = vmatprep.mubr.msk.f32.mxu1 %vm404_vm0, %v375_v39 }
  0x7a   : > { %2487 = vmatmul.mubr.msk.f32.gmra.mxu0 %vm404_vm0, %v312_v40  ;;  %2583 = vmatmul.mubr.msk.f32.gmra.mxu1 %vm404_vm0, %v376_v41 }
  0x7b   : > { %2489 = vmatprep.mubr.msk.f32.mxu0 %vm404_vm0, %v313_v42  ;;  %2585 = vmatprep.mubr.msk.f32.mxu1 %vm404_vm0, %v377_v43 }
  0x7e   : > { %2490 = vmatmul.mubr.msk.f32.gmra.mxu0 %vm404_vm0, %v314_v44  ;;  %2586 = vmatmul.mubr.msk.f32.gmra.mxu1 %vm404_vm0, %v378_v45 }
  0x7f   : > { %2492 = vmatprep.mubr.msk.f32.mxu0 %vm404_vm0, %v315_v46  ;;  %2588 = vmatprep.mubr.msk.f32.mxu1 %vm404_vm0, %v379_v47 }
  0x82   : > { %2493 = vmatmul.mubr.msk.f32.gmra.mxu0 %vm404_vm0, %v316_v48  ;;  %2589 = vmatmul.mubr.msk.f32.gmra.mxu1 %vm404_vm0, %v380_v49 }
  0x83   : > { %2495 = vmatprep.mubr.msk.f32.mxu0 %vm404_vm0, %v317_v50  ;;  %2591 = vmatprep.mubr.msk.f32.mxu1 %vm404_vm0, %v381_v51 }
  0x86   : > { %2496 = vmatmul.mubr.msk.f32.gmra.mxu0 %vm404_vm0, %v318_v52  ;;  %2592 = vmatmul.mubr.msk.f32.gmra.mxu1 %vm404_vm0, %v382_v53 }
  0x87   : > { %2498 = vmatprep.mubr.msk.f32.mxu0 %vm404_vm0, %v319_v54  ;;  %2594 = vmatprep.mubr.msk.f32.mxu1 %vm404_vm0, %v383_v55 }
  0x8a   : > { %2499 = vmatmul.mubr.msk.f32.gmra.mxu0 %vm404_vm0, %v320_v56  ;;  %2595 = vmatmul.mubr.msk.f32.gmra.mxu1 %vm404_vm0, %v384_v57 }
  0x8b   : > { %2501 = vmatprep.mubr.msk.f32.mxu0 %vm404_vm0, %v321_v58  ;;  %2597 = vmatprep.mubr.msk.f32.mxu1 %vm404_vm0, %v385_v59 }
  0x8e   : > { %2502 = vmatmul.mubr.msk.f32.gmra.mxu0 %vm404_vm0, %v322_v60  ;;  %2598 = vmatmul.mubr.msk.f32.gmra.mxu1 %vm404_vm0, %v386_v61 }
  0x8f   : > { %2504 = vmatprep.mubr.msk.f32.mxu0 %vm404_vm0, %v323_v62  ;;  %2600 = vmatprep.mubr.msk.f32.mxu1 %vm404_vm0, %v387_v63 }
  0x92   : > { %2505 = vmatmul.mubr.msk.f32.gmra.mxu0 %vm404_vm0, %v324_v0  ;;  %2601 = vmatmul.mubr.msk.f32.gmra.mxu1 %vm404_vm0, %v388_v1 }
  0x93   : > { %2507 = vmatprep.mubr.msk.f32.mxu0 %vm404_vm0, %v325_v2  ;;  %2603 = vmatprep.mubr.msk.f32.mxu1 %vm404_vm0, %v389_v3 }
  0x96   : > { %2508 = vmatmul.mubr.msk.f32.gmra.mxu0 %vm404_vm0, %v326_v4  ;;  %2604 = vmatmul.mubr.msk.f32.gmra.mxu1 %vm404_vm0, %v390_v5 }
  0xda   : > { %v2416_v7 = vpop.f32.mrf.mxu0  ;;  %v2512_v8 = vpop.f32.mrf.mxu1 }
  0xdb   : > { %v861_v9 = vadd.f32 %v2416_v7, %v2997_v6  ;;  %v1181_v10 = vadd.f32 %v2512_v8, %v2997_v6 }
  0xdc   : > { %v855_v11 = vpop.f32.mrf.mxu0  ;;  %v1175_v12 = vpop.f32.mrf.mxu1 }
  0xdd   : > { %vm1495_vm1 = vcmp.ge.f32.partialorder %v861_v9, 0.0  ;;  %v1623_v13 = vmul.f32 0.2, %v861_v9  ;;  %vm1559_vm2 = vcmp.ge.f32.partialorder %v1181_v10, 0.0  ;;  %v1687_v14 = vmul.f32 0.2, %v1181_v10 }
  0xde   : > { %v856_v15 = vadd.f32 %v2997_v6, %v855_v11  ;;  %v1176_v16 = vadd.f32 %v2997_v6, %v1175_v12  ;;  %v2419_v17 = vpop.f32.mrf.mxu0  ;;  %v2515_v18 = vpop.f32.mrf.mxu1 }
  0xdf   : > { %v1751_v19 = vsel %vm1495_vm1, %v861_v9, %v1623_v13  ;;  %v1815_v20 = vsel %vm1559_vm2, %v1181_v10, %v1687_v14  ;;  %v871_v21 = vadd.f32 %v2419_v17, %v2997_v6  ;;  %v1191_v22 = vadd.f32 %v2515_v18, %v2997_v6 }
  0xe0   : > { %1879 = vst [vmem:[%s3006_s12 + $0x8] sm:$0xff] %v1751_v19  ;;  %1943 = vst [vmem:[%s3006_s12 + $0x208] sm:$0xff] %v1815_v20  ;;  %vm1494_vm3 = vcmp.ge.f32.partialorder %v856_v15, 0.0  ;;  %v1622_v23 = vmul.f32 0.2, %v856_v15  ;;  %vm1558_vm4 = vcmp.ge.f32.partialorder %v1176_v16, 0.0  ;;  %v865_v25 = vpop.f32.mrf.mxu0  ;;  %v1185_v26 = vpop.f32.mrf.mxu1 }
  0xe1   : > { %v1686_v24 = vmul.f32 0.2, %v1176_v16  ;;  %vm1497_vm5 = vcmp.ge.f32.partialorder %v871_v21, 0.0  ;;  %v1625_v27 = vmul.f32 0.2, %v871_v21  ;;  %vm1561_vm6 = vcmp.ge.f32.partialorder %v1191_v22, 0.0 }
  0xe2   : > { %v1689_v28 = vmul.f32 0.2, %v1191_v22  ;;  %v1750_v29 = vsel %vm1494_vm3, %v856_v15, %v1622_v23  ;;  %v866_v31 = vadd.f32 %v2997_v6, %v865_v25  ;;  %v1186_v32 = vadd.f32 %v2997_v6, %v1185_v26  ;;  %v2422_v33 = vpop.f32.mrf.mxu0  ;;  %v2518_v34 = vpop.f32.mrf.mxu1 }
  0xe3   : > { %v1814_v30 = vsel %vm1558_vm4, %v1176_v16, %v1686_v24  ;;  %1878 = vst [vmem:[%s3006_s12] sm:$0xff] %v1750_v29  ;;  %v1753_v35 = vsel %vm1497_vm5, %v871_v21, %v1625_v27  ;;  %v881_v37 = vadd.f32 %v2422_v33, %v2997_v6  ;;  %v1201_v38 = vadd.f32 %v2518_v34, %v2997_v6 }
  0xe4   : > { %1942 = vst [vmem:[%s3006_s12 + $0x200] sm:$0xff] %v1814_v30  ;;  %v1817_v36 = vsel %vm1561_vm6, %v1191_v22, %v1689_v28  ;;  %1881 = vst [vmem:[%s3006_s12 + $0x18] sm:$0xff] %v1753_v35  ;;  %vm1496_vm7 = vcmp.ge.f32.partialorder %v866_v31, 0.0  ;;  %v1624_v39 = vmul.f32 0.2, %v866_v31  ;;  %vm1560_vm8 = vcmp.ge.f32.partialorder %v1186_v32, 0.0  ;;  %v875_v41 = vpop.f32.mrf.mxu0  ;;  %v1195_v42 = vpop.f32.mrf.mxu1 }
  0xe5   : > { %1945 = vst [vmem:[%s3006_s12 + $0x218] sm:$0xff] %v1817_v36  ;;  %v1688_v40 = vmul.f32 0.2, %v1186_v32  ;;  %vm1499_vm9 = vcmp.ge.f32.partialorder %v881_v37, 0.0  ;;  %v1627_v43 = vmul.f32 0.2, %v881_v37  ;;  %v876_v47 = vadd.f32 %v2997_v6, %v875_v41 }
  0xe6   : > { %vm1563_vm10 = vcmp.ge.f32.partialorder %v1201_v38, 0.0  ;;  %v1691_v44 = vmul.f32 0.2, %v1201_v38  ;;  %v1752_v45 = vsel %vm1496_vm7, %v866_v31, %v1624_v39  ;;  %v1196_v48 = vadd.f32 %v2997_v6, %v1195_v42  ;;  %v2425_v49 = vpop.f32.mrf.mxu0  ;;  %v2521_v50 = vpop.f32.mrf.mxu1 }
  0xe7   : > { %v1816_v46 = vsel %vm1560_vm8, %v1186_v32, %v1688_v40  ;;  %1880 = vst [vmem:[%s3006_s12 + $0x10] sm:$0xff] %v1752_v45  ;;  %v1755_v51 = vsel %vm1499_vm9, %v881_v37, %v1627_v43  ;;  %v891_v53 = vadd.f32 %v2425_v49, %v2997_v6  ;;  %v1211_v54 = vadd.f32 %v2521_v50, %v2997_v6 }
  0xe8   : > { %1944 = vst [vmem:[%s3006_s12 + $0x210] sm:$0xff] %v1816_v46  ;;  %v1819_v52 = vsel %vm1563_vm10, %v1201_v38, %v1691_v44  ;;  %1883 = vst [vmem:[%s3006_s12 + $0x28] sm:$0xff] %v1755_v51  ;;  %vm1498_vm11 = vcmp.ge.f32.partialorder %v876_v47, 0.0  ;;  %v1626_v55 = vmul.f32 0.2, %v876_v47  ;;  %vm1562_vm12 = vcmp.ge.f32.partialorder %v1196_v48, 0.0  ;;  %v885_v57 = vpop.f32.mrf.mxu0  ;;  %v1205_v58 = vpop.f32.mrf.mxu1 }
  0xe9   : > { %1947 = vst [vmem:[%s3006_s12 + $0x228] sm:$0xff] %v1819_v52  ;;  %v1690_v56 = vmul.f32 0.2, %v1196_v48  ;;  %vm1501_vm13 = vcmp.ge.f32.partialorder %v891_v53, 0.0  ;;  %v1629_v59 = vmul.f32 0.2, %v891_v53  ;;  %v886_v63 = vadd.f32 %v2997_v6, %v885_v57 }
  0xea   : > { %vm1565_vm14 = vcmp.ge.f32.partialorder %v1211_v54, 0.0  ;;  %v1693_v60 = vmul.f32 0.2, %v1211_v54  ;;  %v1754_v61 = vsel %vm1498_vm11, %v876_v47, %v1626_v55  ;;  %v1206_v0 = vadd.f32 %v2997_v6, %v1205_v58  ;;  %v2428_v1 = vpop.f32.mrf.mxu0  ;;  %v2524_v2 = vpop.f32.mrf.mxu1 }
  0xeb   : > { %v1818_v62 = vsel %vm1562_vm12, %v1196_v48, %v1690_v56  ;;  %1882 = vst [vmem:[%s3006_s12 + $0x20] sm:$0xff] %v1754_v61  ;;  %v1757_v3 = vsel %vm1501_vm13, %v891_v53, %v1629_v59  ;;  %v901_v5 = vadd.f32 %v2428_v1, %v2997_v6  ;;  %v1221_v7 = vadd.f32 %v2524_v2, %v2997_v6 }
  0xec   : > { %1946 = vst [vmem:[%s3006_s12 + $0x220] sm:$0xff] %v1818_v62  ;;  %v1821_v4 = vsel %vm1565_vm14, %v1211_v54, %v1693_v60  ;;  %1885 = vst [vmem:[%s3006_s12 + $0x38] sm:$0xff] %v1757_v3  ;;  %vm1500_vm15 = vcmp.ge.f32.partialorder %v886_v63, 0.0  ;;  %v1628_v8 = vmul.f32 0.2, %v886_v63  ;;  %vm1564_vm0 = vcmp.ge.f32.partialorder %v1206_v0, 0.0  ;;  %v895_v10 = vpop.f32.mrf.mxu0  ;;  %v1215_v11 = vpop.f32.mrf.mxu1 }
  0xed   : > { %1949 = vst [vmem:[%s3006_s12 + $0x238] sm:$0xff] %v1821_v4  ;;  %v1692_v9 = vmul.f32 0.2, %v1206_v0  ;;  %vm1503_vm1 = vcmp.ge.f32.partialorder %v901_v5, 0.0  ;;  %v1631_v12 = vmul.f32 0.2, %v901_v5  ;;  %v896_v16 = vadd.f32 %v2997_v6, %v895_v10 }
  0xee   : > { %vm1567_vm2 = vcmp.ge.f32.partialorder %v1221_v7, 0.0  ;;  %v1695_v13 = vmul.f32 0.2, %v1221_v7  ;;  %v1756_v14 = vsel %vm1500_vm15, %v886_v63, %v1628_v8  ;;  %v1216_v17 = vadd.f32 %v2997_v6, %v1215_v11  ;;  %v2431_v18 = vpop.f32.mrf.mxu0  ;;  %v2527_v19 = vpop.f32.mrf.mxu1 }
  0xef   : > { %v1820_v15 = vsel %vm1564_vm0, %v1206_v0, %v1692_v9  ;;  %1884 = vst [vmem:[%s3006_s12 + $0x30] sm:$0xff] %v1756_v14  ;;  %v1759_v20 = vsel %vm1503_vm1, %v901_v5, %v1631_v12  ;;  %v911_v22 = vadd.f32 %v2431_v18, %v2997_v6  ;;  %v1231_v23 = vadd.f32 %v2527_v19, %v2997_v6 }
  0xf0   : > { %1948 = vst [vmem:[%s3006_s12 + $0x230] sm:$0xff] %v1820_v15  ;;  %v1823_v21 = vsel %vm1567_vm2, %v1221_v7, %v1695_v13  ;;  %1887 = vst [vmem:[%s3006_s12 + $0x48] sm:$0xff] %v1759_v20  ;;  %vm1502_vm3 = vcmp.ge.f32.partialorder %v896_v16, 0.0  ;;  %v1630_v24 = vmul.f32 0.2, %v896_v16  ;;  %vm1566_vm4 = vcmp.ge.f32.partialorder %v1216_v17, 0.0  ;;  %v905_v26 = vpop.f32.mrf.mxu0  ;;  %v1225_v27 = vpop.f32.mrf.mxu1 }
  0xf1   : > { %1951 = vst [vmem:[%s3006_s12 + $0x248] sm:$0xff] %v1823_v21  ;;  %v1694_v25 = vmul.f32 0.2, %v1216_v17  ;;  %vm1505_vm5 = vcmp.ge.f32.partialorder %v911_v22, 0.0  ;;  %v1633_v28 = vmul.f32 0.2, %v911_v22  ;;  %v906_v32 = vadd.f32 %v2997_v6, %v905_v26 }
  0xf2   : > { %vm1569_vm6 = vcmp.ge.f32.partialorder %v1231_v23, 0.0  ;;  %v1697_v29 = vmul.f32 0.2, %v1231_v23  ;;  %v1758_v30 = vsel %vm1502_vm3, %v896_v16, %v1630_v24  ;;  %v1226_v33 = vadd.f32 %v2997_v6, %v1225_v27  ;;  %v2434_v34 = vpop.f32.mrf.mxu0  ;;  %v2530_v35 = vpop.f32.mrf.mxu1 }
  0xf3   : > { %v1822_v31 = vsel %vm1566_vm4, %v1216_v17, %v1694_v25  ;;  %1886 = vst [vmem:[%s3006_s12 + $0x40] sm:$0xff] %v1758_v30  ;;  %v1761_v36 = vsel %vm1505_vm5, %v911_v22, %v1633_v28  ;;  %v921_v38 = vadd.f32 %v2434_v34, %v2997_v6  ;;  %v1241_v39 = vadd.f32 %v2530_v35, %v2997_v6 }
  0xf4   : > { %1950 = vst [vmem:[%s3006_s12 + $0x240] sm:$0xff] %v1822_v31  ;;  %v1825_v37 = vsel %vm1569_vm6, %v1231_v23, %v1697_v29  ;;  %1889 = vst [vmem:[%s3006_s12 + $0x58] sm:$0xff] %v1761_v36  ;;  %vm1504_vm7 = vcmp.ge.f32.partialorder %v906_v32, 0.0  ;;  %v1632_v40 = vmul.f32 0.2, %v906_v32  ;;  %vm1568_vm8 = vcmp.ge.f32.partialorder %v1226_v33, 0.0  ;;  %v915_v42 = vpop.f32.mrf.mxu0  ;;  %v1235_v43 = vpop.f32.mrf.mxu1 }
  0xf5   : > { %1953 = vst [vmem:[%s3006_s12 + $0x258] sm:$0xff] %v1825_v37  ;;  %v1696_v41 = vmul.f32 0.2, %v1226_v33  ;;  %vm1507_vm9 = vcmp.ge.f32.partialorder %v921_v38, 0.0  ;;  %v1635_v44 = vmul.f32 0.2, %v921_v38  ;;  %v916_v48 = vadd.f32 %v2997_v6, %v915_v42 }
  0xf6   : > { %vm1571_vm10 = vcmp.ge.f32.partialorder %v1241_v39, 0.0  ;;  %v1699_v45 = vmul.f32 0.2, %v1241_v39  ;;  %v1760_v46 = vsel %vm1504_vm7, %v906_v32, %v1632_v40  ;;  %v1236_v49 = vadd.f32 %v2997_v6, %v1235_v43  ;;  %v2437_v50 = vpop.f32.mrf.mxu0  ;;  %v2533_v51 = vpop.f32.mrf.mxu1 }
  0xf7   : > { %v1824_v47 = vsel %vm1568_vm8, %v1226_v33, %v1696_v41  ;;  %1888 = vst [vmem:[%s3006_s12 + $0x50] sm:$0xff] %v1760_v46  ;;  %v1763_v52 = vsel %vm1507_vm9, %v921_v38, %v1635_v44  ;;  %v931_v54 = vadd.f32 %v2437_v50, %v2997_v6  ;;  %v1251_v55 = vadd.f32 %v2533_v51, %v2997_v6 }
  0xf8   : > { %1952 = vst [vmem:[%s3006_s12 + $0x250] sm:$0xff] %v1824_v47  ;;  %v1827_v53 = vsel %vm1571_vm10, %v1241_v39, %v1699_v45  ;;  %1891 = vst [vmem:[%s3006_s12 + $0x68] sm:$0xff] %v1763_v52  ;;  %vm1506_vm11 = vcmp.ge.f32.partialorder %v916_v48, 0.0  ;;  %v1634_v56 = vmul.f32 0.2, %v916_v48  ;;  %vm1570_vm12 = vcmp.ge.f32.partialorder %v1236_v49, 0.0  ;;  %v925_v58 = vpop.f32.mrf.mxu0  ;;  %v1245_v59 = vpop.f32.mrf.mxu1 }
  0xf9   : > { %1955 = vst [vmem:[%s3006_s12 + $0x268] sm:$0xff] %v1827_v53  ;;  %v1698_v57 = vmul.f32 0.2, %v1236_v49  ;;  %vm1509_vm13 = vcmp.ge.f32.partialorder %v931_v54, 0.0  ;;  %v1637_v60 = vmul.f32 0.2, %v931_v54  ;;  %v926_v0 = vadd.f32 %v2997_v6, %v925_v58 }
  0xfa   : > { %vm1573_vm14 = vcmp.ge.f32.partialorder %v1251_v55, 0.0  ;;  %v1701_v61 = vmul.f32 0.2, %v1251_v55  ;;  %v1762_v62 = vsel %vm1506_vm11, %v916_v48, %v1634_v56  ;;  %v1246_v1 = vadd.f32 %v2997_v6, %v1245_v59  ;;  %v2440_v2 = vpop.f32.mrf.mxu0  ;;  %v2536_v3 = vpop.f32.mrf.mxu1 }
  0xfb   : > { %v1826_v63 = vsel %vm1570_vm12, %v1236_v49, %v1698_v57  ;;  %1890 = vst [vmem:[%s3006_s12 + $0x60] sm:$0xff] %v1762_v62  ;;  %v1765_v4 = vsel %vm1509_vm13, %v931_v54, %v1637_v60  ;;  %v941_v7 = vadd.f32 %v2440_v2, %v2997_v6  ;;  %v1261_v8 = vadd.f32 %v2536_v3, %v2997_v6 }
  0xfc   : > { %1954 = vst [vmem:[%s3006_s12 + $0x260] sm:$0xff] %v1826_v63  ;;  %v1829_v5 = vsel %vm1573_vm14, %v1251_v55, %v1701_v61  ;;  %1893 = vst [vmem:[%s3006_s12 + $0x78] sm:$0xff] %v1765_v4  ;;  %vm1508_vm15 = vcmp.ge.f32.partialorder %v926_v0, 0.0  ;;  %v1636_v9 = vmul.f32 0.2, %v926_v0  ;;  %vm1572_vm0 = vcmp.ge.f32.partialorder %v1246_v1, 0.0  ;;  %v935_v11 = vpop.f32.mrf.mxu0  ;;  %v1255_v12 = vpop.f32.mrf.mxu1 }
  0xfd   : > { %1957 = vst [vmem:[%s3006_s12 + $0x278] sm:$0xff] %v1829_v5  ;;  %v1700_v10 = vmul.f32 0.2, %v1246_v1  ;;  %vm1511_vm1 = vcmp.ge.f32.partialorder %v941_v7, 0.0  ;;  %v1639_v13 = vmul.f32 0.2, %v941_v7  ;;  %v936_v17 = vadd.f32 %v2997_v6, %v935_v11 }
  0xfe   : > { %vm1575_vm2 = vcmp.ge.f32.partialorder %v1261_v8, 0.0  ;;  %v1703_v14 = vmul.f32 0.2, %v1261_v8  ;;  %v1764_v15 = vsel %vm1508_vm15, %v926_v0, %v1636_v9  ;;  %v1256_v18 = vadd.f32 %v2997_v6, %v1255_v12  ;;  %v2443_v19 = vpop.f32.mrf.mxu0  ;;  %v2539_v20 = vpop.f32.mrf.mxu1 }
  0xff   : > { %v1828_v16 = vsel %vm1572_vm0, %v1246_v1, %v1700_v10  ;;  %1892 = vst [vmem:[%s3006_s12 + $0x70] sm:$0xff] %v1764_v15  ;;  %v1767_v21 = vsel %vm1511_vm1, %v941_v7, %v1639_v13  ;;  %v951_v23 = vadd.f32 %v2443_v19, %v2997_v6  ;;  %v1271_v24 = vadd.f32 %v2539_v20, %v2997_v6 }
 0x100   : > { %1956 = vst [vmem:[%s3006_s12 + $0x270] sm:$0xff] %v1828_v16  ;;  %v1831_v22 = vsel %vm1575_vm2, %v1261_v8, %v1703_v14  ;;  %1895 = vst [vmem:[%s3006_s12 + $0x88] sm:$0xff] %v1767_v21  ;;  %vm1510_vm3 = vcmp.ge.f32.partialorder %v936_v17, 0.0  ;;  %v1638_v25 = vmul.f32 0.2, %v936_v17  ;;  %vm1574_vm4 = vcmp.ge.f32.partialorder %v1256_v18, 0.0  ;;  %v945_v27 = vpop.f32.mrf.mxu0  ;;  %v1265_v28 = vpop.f32.mrf.mxu1 }
 0x101   : > { %1959 = vst [vmem:[%s3006_s12 + $0x288] sm:$0xff] %v1831_v22  ;;  %v1702_v26 = vmul.f32 0.2, %v1256_v18  ;;  %vm1513_vm5 = vcmp.ge.f32.partialorder %v951_v23, 0.0  ;;  %v1641_v29 = vmul.f32 0.2, %v951_v23  ;;  %v946_v33 = vadd.f32 %v2997_v6, %v945_v27 }
 0x102   : > { %vm1577_vm6 = vcmp.ge.f32.partialorder %v1271_v24, 0.0  ;;  %v1705_v30 = vmul.f32 0.2, %v1271_v24  ;;  %v1766_v31 = vsel %vm1510_vm3, %v936_v17, %v1638_v25  ;;  %v1266_v34 = vadd.f32 %v2997_v6, %v1265_v28  ;;  %v2446_v35 = vpop.f32.mrf.mxu0  ;;  %v2542_v36 = vpop.f32.mrf.mxu1 }
 0x103   : > { %v1830_v32 = vsel %vm1574_vm4, %v1256_v18, %v1702_v26  ;;  %1894 = vst [vmem:[%s3006_s12 + $0x80] sm:$0xff] %v1766_v31  ;;  %v1769_v37 = vsel %vm1513_vm5, %v951_v23, %v1641_v29  ;;  %v961_v39 = vadd.f32 %v2446_v35, %v2997_v6  ;;  %v1281_v40 = vadd.f32 %v2542_v36, %v2997_v6 }
 0x104   : > { %1958 = vst [vmem:[%s3006_s12 + $0x280] sm:$0xff] %v1830_v32  ;;  %v1833_v38 = vsel %vm1577_vm6, %v1271_v24, %v1705_v30  ;;  %1897 = vst [vmem:[%s3006_s12 + $0x98] sm:$0xff] %v1769_v37  ;;  %vm1512_vm7 = vcmp.ge.f32.partialorder %v946_v33, 0.0  ;;  %v1640_v41 = vmul.f32 0.2, %v946_v33  ;;  %vm1576_vm8 = vcmp.ge.f32.partialorder %v1266_v34, 0.0  ;;  %v955_v43 = vpop.f32.mrf.mxu0  ;;  %v1275_v44 = vpop.f32.mrf.mxu1 }
 0x105   : > { %1961 = vst [vmem:[%s3006_s12 + $0x298] sm:$0xff] %v1833_v38  ;;  %v1704_v42 = vmul.f32 0.2, %v1266_v34  ;;  %vm1515_vm9 = vcmp.ge.f32.partialorder %v961_v39, 0.0  ;;  %v1643_v45 = vmul.f32 0.2, %v961_v39  ;;  %v956_v49 = vadd.f32 %v2997_v6, %v955_v43 }
 0x106   : > { %vm1579_vm10 = vcmp.ge.f32.partialorder %v1281_v40, 0.0  ;;  %v1707_v46 = vmul.f32 0.2, %v1281_v40  ;;  %v1768_v47 = vsel %vm1512_vm7, %v946_v33, %v1640_v41  ;;  %v1276_v50 = vadd.f32 %v2997_v6, %v1275_v44  ;;  %v2449_v51 = vpop.f32.mrf.mxu0  ;;  %v2545_v52 = vpop.f32.mrf.mxu1 }
 0x107   : > { %v1832_v48 = vsel %vm1576_vm8, %v1266_v34, %v1704_v42  ;;  %1896 = vst [vmem:[%s3006_s12 + $0x90] sm:$0xff] %v1768_v47  ;;  %v1771_v53 = vsel %vm1515_vm9, %v961_v39, %v1643_v45  ;;  %v971_v55 = vadd.f32 %v2449_v51, %v2997_v6  ;;  %v1291_v56 = vadd.f32 %v2545_v52, %v2997_v6 }
 0x108   : > { %1960 = vst [vmem:[%s3006_s12 + $0x290] sm:$0xff] %v1832_v48  ;;  %v1835_v54 = vsel %vm1579_vm10, %v1281_v40, %v1707_v46  ;;  %1899 = vst [vmem:[%s3006_s12 + $0xa8] sm:$0xff] %v1771_v53  ;;  %vm1514_vm11 = vcmp.ge.f32.partialorder %v956_v49, 0.0  ;;  %v1642_v57 = vmul.f32 0.2, %v956_v49  ;;  %vm1578_vm12 = vcmp.ge.f32.partialorder %v1276_v50, 0.0  ;;  %v965_v59 = vpop.f32.mrf.mxu0  ;;  %v1285_v60 = vpop.f32.mrf.mxu1 }
 0x109   : > { %1963 = vst [vmem:[%s3006_s12 + $0x2a8] sm:$0xff] %v1835_v54  ;;  %v1706_v58 = vmul.f32 0.2, %v1276_v50  ;;  %vm1517_vm13 = vcmp.ge.f32.partialorder %v971_v55, 0.0  ;;  %v1645_v61 = vmul.f32 0.2, %v971_v55  ;;  %v966_v1 = vadd.f32 %v2997_v6, %v965_v59 }
 0x10a   : > { %vm1581_vm14 = vcmp.ge.f32.partialorder %v1291_v56, 0.0  ;;  %v1709_v62 = vmul.f32 0.2, %v1291_v56  ;;  %v1770_v63 = vsel %vm1514_vm11, %v956_v49, %v1642_v57  ;;  %v1286_v2 = vadd.f32 %v2997_v6, %v1285_v60  ;;  %v2452_v3 = vpop.f32.mrf.mxu0  ;;  %v2548_v4 = vpop.f32.mrf.mxu1 }
 0x10b   : > { %v1834_v0 = vsel %vm1578_vm12, %v1276_v50, %v1706_v58  ;;  %1898 = vst [vmem:[%s3006_s12 + $0xa0] sm:$0xff] %v1770_v63  ;;  %v1773_v5 = vsel %vm1517_vm13, %v971_v55, %v1645_v61  ;;  %v981_v8 = vadd.f32 %v2452_v3, %v2997_v6  ;;  %v1301_v9 = vadd.f32 %v2548_v4, %v2997_v6 }
 0x10c   : > { %1962 = vst [vmem:[%s3006_s12 + $0x2a0] sm:$0xff] %v1834_v0  ;;  %v1837_v7 = vsel %vm1581_vm14, %v1291_v56, %v1709_v62  ;;  %1901 = vst [vmem:[%s3006_s12 + $0xb8] sm:$0xff] %v1773_v5  ;;  %vm1516_vm15 = vcmp.ge.f32.partialorder %v966_v1, 0.0  ;;  %v1644_v10 = vmul.f32 0.2, %v966_v1  ;;  %vm1580_vm0 = vcmp.ge.f32.partialorder %v1286_v2, 0.0  ;;  %v975_v12 = vpop.f32.mrf.mxu0  ;;  %v1295_v13 = vpop.f32.mrf.mxu1 }
 0x10d   : > { %1965 = vst [vmem:[%s3006_s12 + $0x2b8] sm:$0xff] %v1837_v7  ;;  %v1708_v11 = vmul.f32 0.2, %v1286_v2  ;;  %vm1519_vm1 = vcmp.ge.f32.partialorder %v981_v8, 0.0  ;;  %v1647_v14 = vmul.f32 0.2, %v981_v8  ;;  %v976_v18 = vadd.f32 %v2997_v6, %v975_v12 }
 0x10e   : > { %vm1583_vm2 = vcmp.ge.f32.partialorder %v1301_v9, 0.0  ;;  %v1711_v15 = vmul.f32 0.2, %v1301_v9  ;;  %v1772_v16 = vsel %vm1516_vm15, %v966_v1, %v1644_v10  ;;  %v1296_v19 = vadd.f32 %v2997_v6, %v1295_v13  ;;  %v2455_v20 = vpop.f32.mrf.mxu0  ;;  %v2551_v21 = vpop.f32.mrf.mxu1 }
 0x10f   : > { %v1836_v17 = vsel %vm1580_vm0, %v1286_v2, %v1708_v11  ;;  %1900 = vst [vmem:[%s3006_s12 + $0xb0] sm:$0xff] %v1772_v16  ;;  %v1775_v22 = vsel %vm1519_vm1, %v981_v8, %v1647_v14  ;;  %v991_v24 = vadd.f32 %v2455_v20, %v2997_v6  ;;  %v1311_v25 = vadd.f32 %v2551_v21, %v2997_v6 }
 0x110   : > { %1964 = vst [vmem:[%s3006_s12 + $0x2b0] sm:$0xff] %v1836_v17  ;;  %v1839_v23 = vsel %vm1583_vm2, %v1301_v9, %v1711_v15  ;;  %1903 = vst [vmem:[%s3006_s12 + $0xc8] sm:$0xff] %v1775_v22  ;;  %vm1518_vm3 = vcmp.ge.f32.partialorder %v976_v18, 0.0  ;;  %v1646_v26 = vmul.f32 0.2, %v976_v18  ;;  %vm1582_vm4 = vcmp.ge.f32.partialorder %v1296_v19, 0.0  ;;  %v985_v28 = vpop.f32.mrf.mxu0  ;;  %v1305_v29 = vpop.f32.mrf.mxu1 }
 0x111   : > { %1967 = vst [vmem:[%s3006_s12 + $0x2c8] sm:$0xff] %v1839_v23  ;;  %v1710_v27 = vmul.f32 0.2, %v1296_v19  ;;  %vm1521_vm5 = vcmp.ge.f32.partialorder %v991_v24, 0.0  ;;  %v1649_v30 = vmul.f32 0.2, %v991_v24  ;;  %v986_v34 = vadd.f32 %v2997_v6, %v985_v28 }
 0x112   : > { %vm1585_vm6 = vcmp.ge.f32.partialorder %v1311_v25, 0.0  ;;  %v1713_v31 = vmul.f32 0.2, %v1311_v25  ;;  %v1774_v32 = vsel %vm1518_vm3, %v976_v18, %v1646_v26  ;;  %v1306_v35 = vadd.f32 %v2997_v6, %v1305_v29  ;;  %v2458_v36 = vpop.f32.mrf.mxu0  ;;  %v2554_v37 = vpop.f32.mrf.mxu1 }
 0x113   : > { %v1838_v33 = vsel %vm1582_vm4, %v1296_v19, %v1710_v27  ;;  %1902 = vst [vmem:[%s3006_s12 + $0xc0] sm:$0xff] %v1774_v32  ;;  %v1777_v38 = vsel %vm1521_vm5, %v991_v24, %v1649_v30  ;;  %v1001_v40 = vadd.f32 %v2458_v36, %v2997_v6  ;;  %v1321_v41 = vadd.f32 %v2554_v37, %v2997_v6 }
 0x114   : > { %1966 = vst [vmem:[%s3006_s12 + $0x2c0] sm:$0xff] %v1838_v33  ;;  %v1841_v39 = vsel %vm1585_vm6, %v1311_v25, %v1713_v31  ;;  %1905 = vst [vmem:[%s3006_s12 + $0xd8] sm:$0xff] %v1777_v38  ;;  %vm1520_vm7 = vcmp.ge.f32.partialorder %v986_v34, 0.0  ;;  %v1648_v42 = vmul.f32 0.2, %v986_v34  ;;  %vm1584_vm8 = vcmp.ge.f32.partialorder %v1306_v35, 0.0  ;;  %v995_v44 = vpop.f32.mrf.mxu0  ;;  %v1315_v45 = vpop.f32.mrf.mxu1 }
 0x115   : > { %1969 = vst [vmem:[%s3006_s12 + $0x2d8] sm:$0xff] %v1841_v39  ;;  %v1712_v43 = vmul.f32 0.2, %v1306_v35  ;;  %vm1523_vm9 = vcmp.ge.f32.partialorder %v1001_v40, 0.0  ;;  %v1651_v46 = vmul.f32 0.2, %v1001_v40  ;;  %v996_v50 = vadd.f32 %v2997_v6, %v995_v44 }
 0x116   : > { %vm1587_vm10 = vcmp.ge.f32.partialorder %v1321_v41, 0.0  ;;  %v1715_v47 = vmul.f32 0.2, %v1321_v41  ;;  %v1776_v48 = vsel %vm1520_vm7, %v986_v34, %v1648_v42  ;;  %v1316_v51 = vadd.f32 %v2997_v6, %v1315_v45  ;;  %v2461_v52 = vpop.f32.mrf.mxu0  ;;  %v2557_v53 = vpop.f32.mrf.mxu1 }
 0x117   : > { %v1840_v49 = vsel %vm1584_vm8, %v1306_v35, %v1712_v43  ;;  %1904 = vst [vmem:[%s3006_s12 + $0xd0] sm:$0xff] %v1776_v48  ;;  %v1779_v54 = vsel %vm1523_vm9, %v1001_v40, %v1651_v46  ;;  %v1011_v56 = vadd.f32 %v2461_v52, %v2997_v6  ;;  %v1331_v57 = vadd.f32 %v2557_v53, %v2997_v6 }
 0x118   : > { %1968 = vst [vmem:[%s3006_s12 + $0x2d0] sm:$0xff] %v1840_v49  ;;  %v1843_v55 = vsel %vm1587_vm10, %v1321_v41, %v1715_v47  ;;  %1907 = vst [vmem:[%s3006_s12 + $0xe8] sm:$0xff] %v1779_v54  ;;  %vm1522_vm11 = vcmp.ge.f32.partialorder %v996_v50, 0.0  ;;  %v1650_v58 = vmul.f32 0.2, %v996_v50  ;;  %vm1586_vm12 = vcmp.ge.f32.partialorder %v1316_v51, 0.0  ;;  %v1005_v60 = vpop.f32.mrf.mxu0  ;;  %v1325_v61 = vpop.f32.mrf.mxu1 }
 0x119   : > { %1971 = vst [vmem:[%s3006_s12 + $0x2e8] sm:$0xff] %v1843_v55  ;;  %v1714_v59 = vmul.f32 0.2, %v1316_v51  ;;  %vm1525_vm13 = vcmp.ge.f32.partialorder %v1011_v56, 0.0  ;;  %v1653_v62 = vmul.f32 0.2, %v1011_v56  ;;  %v1006_v2 = vadd.f32 %v2997_v6, %v1005_v60 }
 0x11a   : > { %vm1589_vm14 = vcmp.ge.f32.partialorder %v1331_v57, 0.0  ;;  %v1717_v63 = vmul.f32 0.2, %v1331_v57  ;;  %v1778_v0 = vsel %vm1522_vm11, %v996_v50, %v1650_v58  ;;  %v1326_v3 = vadd.f32 %v2997_v6, %v1325_v61  ;;  %v2464_v4 = vpop.f32.mrf.mxu0  ;;  %v2560_v5 = vpop.f32.mrf.mxu1 }
 0x11b   : > { %v1842_v1 = vsel %vm1586_vm12, %v1316_v51, %v1714_v59  ;;  %1906 = vst [vmem:[%s3006_s12 + $0xe0] sm:$0xff] %v1778_v0  ;;  %v1781_v7 = vsel %vm1525_vm13, %v1011_v56, %v1653_v62  ;;  %v1021_v9 = vadd.f32 %v2464_v4, %v2997_v6  ;;  %v1341_v10 = vadd.f32 %v2560_v5, %v2997_v6 }
 0x11c   : > { %1970 = vst [vmem:[%s3006_s12 + $0x2e0] sm:$0xff] %v1842_v1  ;;  %v1845_v8 = vsel %vm1589_vm14, %v1331_v57, %v1717_v63  ;;  %1909 = vst [vmem:[%s3006_s12 + $0xf8] sm:$0xff] %v1781_v7  ;;  %vm1524_vm15 = vcmp.ge.f32.partialorder %v1006_v2, 0.0  ;;  %v1652_v11 = vmul.f32 0.2, %v1006_v2  ;;  %vm1588_vm0 = vcmp.ge.f32.partialorder %v1326_v3, 0.0  ;;  %v1015_v13 = vpop.f32.mrf.mxu0  ;;  %v1335_v14 = vpop.f32.mrf.mxu1 }
 0x11d   : > { %1973 = vst [vmem:[%s3006_s12 + $0x2f8] sm:$0xff] %v1845_v8  ;;  %v1716_v12 = vmul.f32 0.2, %v1326_v3  ;;  %vm1527_vm1 = vcmp.ge.f32.partialorder %v1021_v9, 0.0  ;;  %v1655_v15 = vmul.f32 0.2, %v1021_v9  ;;  %v1016_v19 = vadd.f32 %v2997_v6, %v1015_v13 }
 0x11e   : > { %vm1591_vm2 = vcmp.ge.f32.partialorder %v1341_v10, 0.0  ;;  %v1719_v16 = vmul.f32 0.2, %v1341_v10  ;;  %v1780_v17 = vsel %vm1524_vm15, %v1006_v2, %v1652_v11  ;;  %v1336_v20 = vadd.f32 %v2997_v6, %v1335_v14  ;;  %v2467_v21 = vpop.f32.mrf.mxu0  ;;  %v2563_v22 = vpop.f32.mrf.mxu1 }
 0x11f   : > { %v1844_v18 = vsel %vm1588_vm0, %v1326_v3, %v1716_v12  ;;  %1908 = vst [vmem:[%s3006_s12 + $0xf0] sm:$0xff] %v1780_v17  ;;  %v1783_v23 = vsel %vm1527_vm1, %v1021_v9, %v1655_v15  ;;  %v1031_v25 = vadd.f32 %v2467_v21, %v2997_v6  ;;  %v1351_v26 = vadd.f32 %v2563_v22, %v2997_v6 }
 0x120   : > { %1972 = vst [vmem:[%s3006_s12 + $0x2f0] sm:$0xff] %v1844_v18  ;;  %v1847_v24 = vsel %vm1591_vm2, %v1341_v10, %v1719_v16  ;;  %1911 = vst [vmem:[%s3006_s12 + $0x108] sm:$0xff] %v1783_v23  ;;  %vm1526_vm3 = vcmp.ge.f32.partialorder %v1016_v19, 0.0  ;;  %v1654_v27 = vmul.f32 0.2, %v1016_v19  ;;  %vm1590_vm4 = vcmp.ge.f32.partialorder %v1336_v20, 0.0  ;;  %v1025_v29 = vpop.f32.mrf.mxu0  ;;  %v1345_v30 = vpop.f32.mrf.mxu1 }
 0x121   : > { %1975 = vst [vmem:[%s3006_s12 + $0x308] sm:$0xff] %v1847_v24  ;;  %v1718_v28 = vmul.f32 0.2, %v1336_v20  ;;  %vm1529_vm5 = vcmp.ge.f32.partialorder %v1031_v25, 0.0  ;;  %v1657_v31 = vmul.f32 0.2, %v1031_v25  ;;  %v1026_v35 = vadd.f32 %v2997_v6, %v1025_v29 }
 0x122   : > { %vm1593_vm6 = vcmp.ge.f32.partialorder %v1351_v26, 0.0  ;;  %v1721_v32 = vmul.f32 0.2, %v1351_v26  ;;  %v1782_v33 = vsel %vm1526_vm3, %v1016_v19, %v1654_v27  ;;  %v1346_v36 = vadd.f32 %v2997_v6, %v1345_v30  ;;  %v2470_v37 = vpop.f32.mrf.mxu0  ;;  %v2566_v38 = vpop.f32.mrf.mxu1 }
 0x123   : > { %v1846_v34 = vsel %vm1590_vm4, %v1336_v20, %v1718_v28  ;;  %1910 = vst [vmem:[%s3006_s12 + $0x100] sm:$0xff] %v1782_v33  ;;  %v1785_v39 = vsel %vm1529_vm5, %v1031_v25, %v1657_v31  ;;  %v1041_v41 = vadd.f32 %v2470_v37, %v2997_v6  ;;  %v1361_v42 = vadd.f32 %v2566_v38, %v2997_v6 }
 0x124   : > { %1974 = vst [vmem:[%s3006_s12 + $0x300] sm:$0xff] %v1846_v34  ;;  %v1849_v40 = vsel %vm1593_vm6, %v1351_v26, %v1721_v32  ;;  %1913 = vst [vmem:[%s3006_s12 + $0x118] sm:$0xff] %v1785_v39  ;;  %vm1528_vm7 = vcmp.ge.f32.partialorder %v1026_v35, 0.0  ;;  %v1656_v43 = vmul.f32 0.2, %v1026_v35  ;;  %vm1592_vm8 = vcmp.ge.f32.partialorder %v1346_v36, 0.0  ;;  %v1035_v45 = vpop.f32.mrf.mxu0  ;;  %v1355_v46 = vpop.f32.mrf.mxu1 }
 0x125   : > { %1977 = vst [vmem:[%s3006_s12 + $0x318] sm:$0xff] %v1849_v40  ;;  %v1720_v44 = vmul.f32 0.2, %v1346_v36  ;;  %vm1531_vm9 = vcmp.ge.f32.partialorder %v1041_v41, 0.0  ;;  %v1659_v47 = vmul.f32 0.2, %v1041_v41  ;;  %v1036_v51 = vadd.f32 %v2997_v6, %v1035_v45 }
 0x126   : > { %vm1595_vm10 = vcmp.ge.f32.partialorder %v1361_v42, 0.0  ;;  %v1723_v48 = vmul.f32 0.2, %v1361_v42  ;;  %v1784_v49 = vsel %vm1528_vm7, %v1026_v35, %v1656_v43  ;;  %v1356_v52 = vadd.f32 %v2997_v6, %v1355_v46  ;;  %v2473_v53 = vpop.f32.mrf.mxu0  ;;  %v2569_v54 = vpop.f32.mrf.mxu1 }
 0x127   : > { %v1848_v50 = vsel %vm1592_vm8, %v1346_v36, %v1720_v44  ;;  %1912 = vst [vmem:[%s3006_s12 + $0x110] sm:$0xff] %v1784_v49  ;;  %v1787_v55 = vsel %vm1531_vm9, %v1041_v41, %v1659_v47  ;;  %v1051_v57 = vadd.f32 %v2473_v53, %v2997_v6  ;;  %v1371_v58 = vadd.f32 %v2569_v54, %v2997_v6 }
 0x128   : > { %1976 = vst [vmem:[%s3006_s12 + $0x310] sm:$0xff] %v1848_v50  ;;  %v1851_v56 = vsel %vm1595_vm10, %v1361_v42, %v1723_v48  ;;  %1915 = vst [vmem:[%s3006_s12 + $0x128] sm:$0xff] %v1787_v55  ;;  %vm1530_vm11 = vcmp.ge.f32.partialorder %v1036_v51, 0.0  ;;  %v1658_v59 = vmul.f32 0.2, %v1036_v51  ;;  %vm1594_vm12 = vcmp.ge.f32.partialorder %v1356_v52, 0.0  ;;  %v1045_v61 = vpop.f32.mrf.mxu0  ;;  %v1365_v62 = vpop.f32.mrf.mxu1 }
 0x129   : > { %1979 = vst [vmem:[%s3006_s12 + $0x328] sm:$0xff] %v1851_v56  ;;  %v1722_v60 = vmul.f32 0.2, %v1356_v52  ;;  %vm1533_vm13 = vcmp.ge.f32.partialorder %v1051_v57, 0.0  ;;  %v1661_v63 = vmul.f32 0.2, %v1051_v57  ;;  %v1046_v3 = vadd.f32 %v2997_v6, %v1045_v61 }
 0x12a   : > { %vm1597_vm14 = vcmp.ge.f32.partialorder %v1371_v58, 0.0  ;;  %v1725_v0 = vmul.f32 0.2, %v1371_v58  ;;  %v1786_v1 = vsel %vm1530_vm11, %v1036_v51, %v1658_v59  ;;  %v1366_v4 = vadd.f32 %v2997_v6, %v1365_v62  ;;  %v2476_v5 = vpop.f32.mrf.mxu0  ;;  %v2572_v7 = vpop.f32.mrf.mxu1 }
 0x12b   : > { %v1850_v2 = vsel %vm1594_vm12, %v1356_v52, %v1722_v60  ;;  %1914 = vst [vmem:[%s3006_s12 + $0x120] sm:$0xff] %v1786_v1  ;;  %v1789_v8 = vsel %vm1533_vm13, %v1051_v57, %v1661_v63  ;;  %v1061_v10 = vadd.f32 %v2476_v5, %v2997_v6  ;;  %v1381_v11 = vadd.f32 %v2572_v7, %v2997_v6 }
 0x12c   : > { %1978 = vst [vmem:[%s3006_s12 + $0x320] sm:$0xff] %v1850_v2  ;;  %v1853_v9 = vsel %vm1597_vm14, %v1371_v58, %v1725_v0  ;;  %1917 = vst [vmem:[%s3006_s12 + $0x138] sm:$0xff] %v1789_v8  ;;  %vm1532_vm15 = vcmp.ge.f32.partialorder %v1046_v3, 0.0  ;;  %v1660_v12 = vmul.f32 0.2, %v1046_v3  ;;  %vm1596_vm0 = vcmp.ge.f32.partialorder %v1366_v4, 0.0  ;;  %v1055_v14 = vpop.f32.mrf.mxu0  ;;  %v1375_v15 = vpop.f32.mrf.mxu1 }
 0x12d   : > { %1981 = vst [vmem:[%s3006_s12 + $0x338] sm:$0xff] %v1853_v9  ;;  %v1724_v13 = vmul.f32 0.2, %v1366_v4  ;;  %vm1535_vm1 = vcmp.ge.f32.partialorder %v1061_v10, 0.0  ;;  %v1663_v16 = vmul.f32 0.2, %v1061_v10  ;;  %v1056_v20 = vadd.f32 %v2997_v6, %v1055_v14 }
 0x12e   : > { %vm1599_vm2 = vcmp.ge.f32.partialorder %v1381_v11, 0.0  ;;  %v1727_v17 = vmul.f32 0.2, %v1381_v11  ;;  %v1788_v18 = vsel %vm1532_vm15, %v1046_v3, %v1660_v12  ;;  %v1376_v21 = vadd.f32 %v2997_v6, %v1375_v15  ;;  %v2479_v22 = vpop.f32.mrf.mxu0  ;;  %v2575_v23 = vpop.f32.mrf.mxu1 }
 0x12f   : > { %v1852_v19 = vsel %vm1596_vm0, %v1366_v4, %v1724_v13  ;;  %1916 = vst [vmem:[%s3006_s12 + $0x130] sm:$0xff] %v1788_v18  ;;  %v1791_v24 = vsel %vm1535_vm1, %v1061_v10, %v1663_v16  ;;  %v1071_v26 = vadd.f32 %v2479_v22, %v2997_v6  ;;  %v1391_v27 = vadd.f32 %v2575_v23, %v2997_v6  ;;  %v3177_v6 = vld [vmem:[%s3279_s3] ss:$0 sm:$0xff] }
 0x130   : > { %1980 = vst [vmem:[%s3006_s12 + $0x330] sm:$0xff] %v1852_v19  ;;  %v1855_v25 = vsel %vm1599_vm2, %v1381_v11, %v1727_v17  ;;  %1919 = vst [vmem:[%s3006_s12 + $0x148] sm:$0xff] %v1791_v24  ;;  %vm1534_vm3 = vcmp.ge.f32.partialorder %v1056_v20, 0.0  ;;  %v1662_v28 = vmul.f32 0.2, %v1056_v20  ;;  %vm1598_vm4 = vcmp.ge.f32.partialorder %v1376_v21, 0.0  ;;  %v1065_v30 = vpop.f32.mrf.mxu0  ;;  %v1385_v31 = vpop.f32.mrf.mxu1 }
 0x131   : > { %1983 = vst [vmem:[%s3006_s12 + $0x348] sm:$0xff] %v1855_v25  ;;  %v1726_v29 = vmul.f32 0.2, %v1376_v21  ;;  %vm1537_vm5 = vcmp.ge.f32.partialorder %v1071_v26, 0.0  ;;  %v1665_v32 = vmul.f32 0.2, %v1071_v26  ;;  %v1066_v36 = vadd.f32 %v3177_v6, %v1065_v30 }
 0x132   : > { %vm1601_vm6 = vcmp.ge.f32.partialorder %v1391_v27, 0.0  ;;  %v1729_v33 = vmul.f32 0.2, %v1391_v27  ;;  %v1790_v34 = vsel %vm1534_vm3, %v1056_v20, %v1662_v28  ;;  %v1386_v37 = vadd.f32 %v3177_v6, %v1385_v31  ;;  %v2482_v38 = vpop.f32.mrf.mxu0  ;;  %v2578_v39 = vpop.f32.mrf.mxu1 }
 0x133   : > { %v1854_v35 = vsel %vm1598_vm4, %v1376_v21, %v1726_v29  ;;  %1918 = vst [vmem:[%s3006_s12 + $0x140] sm:$0xff] %v1790_v34  ;;  %v1793_v40 = vsel %vm1537_vm5, %v1071_v26, %v1665_v32  ;;  %v1081_v42 = vadd.f32 %v3177_v6, %v2482_v38  ;;  %v1401_v43 = vadd.f32 %v3177_v6, %v2578_v39 }
 0x134   : > { %1982 = vst [vmem:[%s3006_s12 + $0x340] sm:$0xff] %v1854_v35  ;;  %v1857_v41 = vsel %vm1601_vm6, %v1391_v27, %v1729_v33  ;;  %1921 = vst [vmem:[%s3006_s12 + $0x158] sm:$0xff] %v1793_v40  ;;  %vm1536_vm7 = vcmp.ge.f32.partialorder %v1066_v36, 0.0  ;;  %v1664_v44 = vmul.f32 0.2, %v1066_v36  ;;  %vm1600_vm8 = vcmp.ge.f32.partialorder %v1386_v37, 0.0  ;;  %v1075_v46 = vpop.f32.mrf.mxu0  ;;  %v1395_v47 = vpop.f32.mrf.mxu1 }
 0x135   : > { %1985 = vst [vmem:[%s3006_s12 + $0x358] sm:$0xff] %v1857_v41  ;;  %v1728_v45 = vmul.f32 0.2, %v1386_v37  ;;  %vm1539_vm9 = vcmp.ge.f32.partialorder %v1081_v42, 0.0  ;;  %v1667_v48 = vmul.f32 0.2, %v1081_v42  ;;  %v1076_v52 = vadd.f32 %v3177_v6, %v1075_v46 }
 0x136   : > { %vm1603_vm10 = vcmp.ge.f32.partialorder %v1401_v43, 0.0  ;;  %v1731_v49 = vmul.f32 0.2, %v1401_v43  ;;  %v1792_v50 = vsel %vm1536_vm7, %v1066_v36, %v1664_v44  ;;  %v1396_v53 = vadd.f32 %v3177_v6, %v1395_v47  ;;  %v2485_v54 = vpop.f32.mrf.mxu0  ;;  %v2581_v55 = vpop.f32.mrf.mxu1 }
 0x137   : > { %v1856_v51 = vsel %vm1600_vm8, %v1386_v37, %v1728_v45  ;;  %1920 = vst [vmem:[%s3006_s12 + $0x150] sm:$0xff] %v1792_v50  ;;  %v1795_v56 = vsel %vm1539_vm9, %v1081_v42, %v1667_v48  ;;  %v1091_v58 = vadd.f32 %v3177_v6, %v2485_v54  ;;  %v1411_v59 = vadd.f32 %v3177_v6, %v2581_v55 }
 0x138   : > { %1984 = vst [vmem:[%s3006_s12 + $0x350] sm:$0xff] %v1856_v51  ;;  %v1859_v57 = vsel %vm1603_vm10, %v1401_v43, %v1731_v49  ;;  %1923 = vst [vmem:[%s3006_s12 + $0x168] sm:$0xff] %v1795_v56  ;;  %vm1538_vm11 = vcmp.ge.f32.partialorder %v1076_v52, 0.0  ;;  %v1666_v60 = vmul.f32 0.2, %v1076_v52  ;;  %vm1602_vm12 = vcmp.ge.f32.partialorder %v1396_v53, 0.0  ;;  %v1085_v62 = vpop.f32.mrf.mxu0  ;;  %v1405_v63 = vpop.f32.mrf.mxu1 }
 0x139   : > { %1987 = vst [vmem:[%s3006_s12 + $0x368] sm:$0xff] %v1859_v57  ;;  %v1730_v61 = vmul.f32 0.2, %v1396_v53  ;;  %vm1541_vm13 = vcmp.ge.f32.partialorder %v1091_v58, 0.0  ;;  %v1669_v0 = vmul.f32 0.2, %v1091_v58  ;;  %v1086_v4 = vadd.f32 %v3177_v6, %v1085_v62 }
 0x13a   : > { %vm1605_vm14 = vcmp.ge.f32.partialorder %v1411_v59, 0.0  ;;  %v1733_v1 = vmul.f32 0.2, %v1411_v59  ;;  %v1794_v2 = vsel %vm1538_vm11, %v1076_v52, %v1666_v60  ;;  %v1406_v5 = vadd.f32 %v3177_v6, %v1405_v63  ;;  %v2488_v7 = vpop.f32.mrf.mxu0  ;;  %v2584_v8 = vpop.f32.mrf.mxu1 }
 0x13b   : > { %v1858_v3 = vsel %vm1602_vm12, %v1396_v53, %v1730_v61  ;;  %1922 = vst [vmem:[%s3006_s12 + $0x160] sm:$0xff] %v1794_v2  ;;  %v1797_v9 = vsel %vm1541_vm13, %v1091_v58, %v1669_v0  ;;  %v1101_v11 = vadd.f32 %v3177_v6, %v2488_v7  ;;  %v1421_v12 = vadd.f32 %v3177_v6, %v2584_v8 }
 0x13c   : > { %1986 = vst [vmem:[%s3006_s12 + $0x360] sm:$0xff] %v1858_v3  ;;  %v1861_v10 = vsel %vm1605_vm14, %v1411_v59, %v1733_v1  ;;  %1925 = vst [vmem:[%s3006_s12 + $0x178] sm:$0xff] %v1797_v9  ;;  %vm1540_vm15 = vcmp.ge.f32.partialorder %v1086_v4, 0.0  ;;  %v1668_v13 = vmul.f32 0.2, %v1086_v4  ;;  %vm1604_vm0 = vcmp.ge.f32.partialorder %v1406_v5, 0.0  ;;  %v1095_v15 = vpop.f32.mrf.mxu0  ;;  %v1415_v16 = vpop.f32.mrf.mxu1 }
 0x13d   : > { %1989 = vst [vmem:[%s3006_s12 + $0x378] sm:$0xff] %v1861_v10  ;;  %v1732_v14 = vmul.f32 0.2, %v1406_v5  ;;  %vm1543_vm1 = vcmp.ge.f32.partialorder %v1101_v11, 0.0  ;;  %v1671_v17 = vmul.f32 0.2, %v1101_v11  ;;  %v1096_v21 = vadd.f32 %v3177_v6, %v1095_v15 }
 0x13e   : > { %vm1607_vm2 = vcmp.ge.f32.partialorder %v1421_v12, 0.0  ;;  %v1735_v18 = vmul.f32 0.2, %v1421_v12  ;;  %v1796_v19 = vsel %vm1540_vm15, %v1086_v4, %v1668_v13  ;;  %v1416_v22 = vadd.f32 %v3177_v6, %v1415_v16  ;;  %v2491_v23 = vpop.f32.mrf.mxu0  ;;  %v2587_v24 = vpop.f32.mrf.mxu1 }
 0x13f   : > { %v1860_v20 = vsel %vm1604_vm0, %v1406_v5, %v1732_v14  ;;  %1924 = vst [vmem:[%s3006_s12 + $0x170] sm:$0xff] %v1796_v19  ;;  %v1799_v25 = vsel %vm1543_vm1, %v1101_v11, %v1671_v17  ;;  %v1111_v27 = vadd.f32 %v3177_v6, %v2491_v23  ;;  %v1431_v28 = vadd.f32 %v3177_v6, %v2587_v24 }
 0x140   : > { %1988 = vst [vmem:[%s3006_s12 + $0x370] sm:$0xff] %v1860_v20  ;;  %v1863_v26 = vsel %vm1607_vm2, %v1421_v12, %v1735_v18  ;;  %1927 = vst [vmem:[%s3006_s12 + $0x188] sm:$0xff] %v1799_v25  ;;  %vm1542_vm3 = vcmp.ge.f32.partialorder %v1096_v21, 0.0  ;;  %v1670_v29 = vmul.f32 0.2, %v1096_v21  ;;  %vm1606_vm4 = vcmp.ge.f32.partialorder %v1416_v22, 0.0  ;;  %v1105_v31 = vpop.f32.mrf.mxu0  ;;  %v1425_v32 = vpop.f32.mrf.mxu1 }
 0x141   : > { %1991 = vst [vmem:[%s3006_s12 + $0x388] sm:$0xff] %v1863_v26  ;;  %v1734_v30 = vmul.f32 0.2, %v1416_v22  ;;  %vm1545_vm5 = vcmp.ge.f32.partialorder %v1111_v27, 0.0  ;;  %v1673_v33 = vmul.f32 0.2, %v1111_v27  ;;  %v1106_v37 = vadd.f32 %v3177_v6, %v1105_v31 }
 0x142   : > { %vm1609_vm6 = vcmp.ge.f32.partialorder %v1431_v28, 0.0  ;;  %v1737_v34 = vmul.f32 0.2, %v1431_v28  ;;  %v1798_v35 = vsel %vm1542_vm3, %v1096_v21, %v1670_v29  ;;  %v1426_v38 = vadd.f32 %v3177_v6, %v1425_v32  ;;  %v2494_v39 = vpop.f32.mrf.mxu0  ;;  %v2590_v40 = vpop.f32.mrf.mxu1 }
 0x143   : > { %v1862_v36 = vsel %vm1606_vm4, %v1416_v22, %v1734_v30  ;;  %1926 = vst [vmem:[%s3006_s12 + $0x180] sm:$0xff] %v1798_v35  ;;  %v1801_v41 = vsel %vm1545_vm5, %v1111_v27, %v1673_v33  ;;  %v1121_v43 = vadd.f32 %v3177_v6, %v2494_v39  ;;  %v1441_v44 = vadd.f32 %v3177_v6, %v2590_v40 }
 0x144   : > { %1990 = vst [vmem:[%s3006_s12 + $0x380] sm:$0xff] %v1862_v36  ;;  %v1865_v42 = vsel %vm1609_vm6, %v1431_v28, %v1737_v34  ;;  %1929 = vst [vmem:[%s3006_s12 + $0x198] sm:$0xff] %v1801_v41  ;;  %vm1544_vm7 = vcmp.ge.f32.partialorder %v1106_v37, 0.0  ;;  %v1672_v45 = vmul.f32 0.2, %v1106_v37  ;;  %vm1608_vm8 = vcmp.ge.f32.partialorder %v1426_v38, 0.0  ;;  %v1115_v47 = vpop.f32.mrf.mxu0  ;;  %v1435_v48 = vpop.f32.mrf.mxu1 }
 0x145   : > { %1993 = vst [vmem:[%s3006_s12 + $0x398] sm:$0xff] %v1865_v42  ;;  %v1736_v46 = vmul.f32 0.2, %v1426_v38  ;;  %vm1547_vm9 = vcmp.ge.f32.partialorder %v1121_v43, 0.0  ;;  %v1675_v49 = vmul.f32 0.2, %v1121_v43  ;;  %v1116_v53 = vadd.f32 %v3177_v6, %v1115_v47 }
 0x146   : > { %vm1611_vm10 = vcmp.ge.f32.partialorder %v1441_v44, 0.0  ;;  %v1739_v50 = vmul.f32 0.2, %v1441_v44  ;;  %v1800_v51 = vsel %vm1544_vm7, %v1106_v37, %v1672_v45  ;;  %v1436_v54 = vadd.f32 %v3177_v6, %v1435_v48  ;;  %v2497_v55 = vpop.f32.mrf.mxu0  ;;  %v2593_v56 = vpop.f32.mrf.mxu1 }
 0x147   : > { %v1864_v52 = vsel %vm1608_vm8, %v1426_v38, %v1736_v46  ;;  %1928 = vst [vmem:[%s3006_s12 + $0x190] sm:$0xff] %v1800_v51  ;;  %v1803_v57 = vsel %vm1547_vm9, %v1121_v43, %v1675_v49  ;;  %v1131_v59 = vadd.f32 %v3177_v6, %v2497_v55  ;;  %v1451_v60 = vadd.f32 %v3177_v6, %v2593_v56 }
 0x148   : > { %1992 = vst [vmem:[%s3006_s12 + $0x390] sm:$0xff] %v1864_v52  ;;  %v1867_v58 = vsel %vm1611_vm10, %v1441_v44, %v1739_v50  ;;  %1931 = vst [vmem:[%s3006_s12 + $0x1a8] sm:$0xff] %v1803_v57  ;;  %vm1546_vm11 = vcmp.ge.f32.partialorder %v1116_v53, 0.0  ;;  %v1674_v61 = vmul.f32 0.2, %v1116_v53  ;;  %vm1610_vm12 = vcmp.ge.f32.partialorder %v1436_v54, 0.0  ;;  %v1125_v63 = vpop.f32.mrf.mxu0  ;;  %v1445_v0 = vpop.f32.mrf.mxu1 }
 0x149   : > { %1995 = vst [vmem:[%s3006_s12 + $0x3a8] sm:$0xff] %v1867_v58  ;;  %v1738_v62 = vmul.f32 0.2, %v1436_v54  ;;  %vm1549_vm13 = vcmp.ge.f32.partialorder %v1131_v59, 0.0  ;;  %v1677_v1 = vmul.f32 0.2, %v1131_v59  ;;  %v1126_v5 = vadd.f32 %v3177_v6, %v1125_v63 }
 0x14a   : > { %vm1613_vm14 = vcmp.ge.f32.partialorder %v1451_v60, 0.0  ;;  %v1741_v2 = vmul.f32 0.2, %v1451_v60  ;;  %v1802_v3 = vsel %vm1546_vm11, %v1116_v53, %v1674_v61  ;;  %v1446_v7 = vadd.f32 %v3177_v6, %v1445_v0  ;;  %v2500_v8 = vpop.f32.mrf.mxu0  ;;  %v2596_v9 = vpop.f32.mrf.mxu1 }
 0x14b   : > { %v1866_v4 = vsel %vm1610_vm12, %v1436_v54, %v1738_v62  ;;  %1930 = vst [vmem:[%s3006_s12 + $0x1a0] sm:$0xff] %v1802_v3  ;;  %v1805_v10 = vsel %vm1549_vm13, %v1131_v59, %v1677_v1  ;;  %v1141_v12 = vadd.f32 %v3177_v6, %v2500_v8  ;;  %v1461_v13 = vadd.f32 %v3177_v6, %v2596_v9 }
 0x14c   : > { %1994 = vst [vmem:[%s3006_s12 + $0x3a0] sm:$0xff] %v1866_v4  ;;  %v1869_v11 = vsel %vm1613_vm14, %v1451_v60, %v1741_v2  ;;  %1933 = vst [vmem:[%s3006_s12 + $0x1b8] sm:$0xff] %v1805_v10  ;;  %vm1548_vm15 = vcmp.ge.f32.partialorder %v1126_v5, 0.0  ;;  %v1676_v14 = vmul.f32 0.2, %v1126_v5  ;;  %vm1612_vm0 = vcmp.ge.f32.partialorder %v1446_v7, 0.0  ;;  %v1135_v16 = vpop.f32.mrf.mxu0  ;;  %v1455_v17 = vpop.f32.mrf.mxu1 }
 0x14d   : > { %1997 = vst [vmem:[%s3006_s12 + $0x3b8] sm:$0xff] %v1869_v11  ;;  %v1740_v15 = vmul.f32 0.2, %v1446_v7  ;;  %vm1551_vm1 = vcmp.ge.f32.partialorder %v1141_v12, 0.0  ;;  %v1679_v18 = vmul.f32 0.2, %v1141_v12  ;;  %v1136_v22 = vadd.f32 %v3177_v6, %v1135_v16 }
 0x14e   : > { %vm1615_vm2 = vcmp.ge.f32.partialorder %v1461_v13, 0.0  ;;  %v1743_v19 = vmul.f32 0.2, %v1461_v13  ;;  %v1804_v20 = vsel %vm1548_vm15, %v1126_v5, %v1676_v14  ;;  %v1456_v23 = vadd.f32 %v3177_v6, %v1455_v17  ;;  %v2503_v24 = vpop.f32.mrf.mxu0  ;;  %v2599_v25 = vpop.f32.mrf.mxu1 }
 0x14f   : > { %v1868_v21 = vsel %vm1612_vm0, %v1446_v7, %v1740_v15  ;;  %1932 = vst [vmem:[%s3006_s12 + $0x1b0] sm:$0xff] %v1804_v20  ;;  %v1807_v26 = vsel %vm1551_vm1, %v1141_v12, %v1679_v18  ;;  %v1151_v28 = vadd.f32 %v3177_v6, %v2503_v24  ;;  %v1471_v29 = vadd.f32 %v3177_v6, %v2599_v25 }
 0x150   : > { %1996 = vst [vmem:[%s3006_s12 + $0x3b0] sm:$0xff] %v1868_v21  ;;  %v1871_v27 = vsel %vm1615_vm2, %v1461_v13, %v1743_v19  ;;  %1935 = vst [vmem:[%s3006_s12 + $0x1c8] sm:$0xff] %v1807_v26  ;;  %vm1550_vm3 = vcmp.ge.f32.partialorder %v1136_v22, 0.0  ;;  %v1678_v30 = vmul.f32 0.2, %v1136_v22  ;;  %vm1614_vm4 = vcmp.ge.f32.partialorder %v1456_v23, 0.0  ;;  %v1145_v32 = vpop.f32.mrf.mxu0  ;;  %v1465_v33 = vpop.f32.mrf.mxu1 }
 0x151   : > { %1999 = vst [vmem:[%s3006_s12 + $0x3c8] sm:$0xff] %v1871_v27  ;;  %v1742_v31 = vmul.f32 0.2, %v1456_v23  ;;  %vm1553_vm5 = vcmp.ge.f32.partialorder %v1151_v28, 0.0  ;;  %v1681_v34 = vmul.f32 0.2, %v1151_v28  ;;  %v1146_v38 = vadd.f32 %v3177_v6, %v1145_v32 }
 0x152   : > { %vm1617_vm6 = vcmp.ge.f32.partialorder %v1471_v29, 0.0  ;;  %v1745_v35 = vmul.f32 0.2, %v1471_v29  ;;  %v1806_v36 = vsel %vm1550_vm3, %v1136_v22, %v1678_v30  ;;  %v1466_v39 = vadd.f32 %v3177_v6, %v1465_v33  ;;  %v2506_v40 = vpop.f32.mrf.mxu0  ;;  %v2602_v41 = vpop.f32.mrf.mxu1 }
 0x153   : > { %v1870_v37 = vsel %vm1614_vm4, %v1456_v23, %v1742_v31  ;;  %1934 = vst [vmem:[%s3006_s12 + $0x1c0] sm:$0xff] %v1806_v36  ;;  %v1809_v42 = vsel %vm1553_vm5, %v1151_v28, %v1681_v34  ;;  %v1161_v44 = vadd.f32 %v3177_v6, %v2506_v40  ;;  %v1481_v45 = vadd.f32 %v3177_v6, %v2602_v41 }
 0x154   : > { %1998 = vst [vmem:[%s3006_s12 + $0x3c0] sm:$0xff] %v1870_v37  ;;  %v1873_v43 = vsel %vm1617_vm6, %v1471_v29, %v1745_v35  ;;  %1937 = vst [vmem:[%s3006_s12 + $0x1d8] sm:$0xff] %v1809_v42  ;;  %vm1552_vm7 = vcmp.ge.f32.partialorder %v1146_v38, 0.0  ;;  %v1680_v46 = vmul.f32 0.2, %v1146_v38  ;;  %vm1616_vm8 = vcmp.ge.f32.partialorder %v1466_v39, 0.0  ;;  %v1155_v48 = vpop.f32.mrf.mxu0  ;;  %v1475_v49 = vpop.f32.mrf.mxu1 }
 0x155   : > { %2001 = vst [vmem:[%s3006_s12 + $0x3d8] sm:$0xff] %v1873_v43  ;;  %v1744_v47 = vmul.f32 0.2, %v1466_v39  ;;  %vm1555_vm9 = vcmp.ge.f32.partialorder %v1161_v44, 0.0  ;;  %v1683_v50 = vmul.f32 0.2, %v1161_v44  ;;  %v1156_v54 = vadd.f32 %v3177_v6, %v1155_v48 }
 0x156   : > { %vm1619_vm10 = vcmp.ge.f32.partialorder %v1481_v45, 0.0  ;;  %v1747_v51 = vmul.f32 0.2, %v1481_v45  ;;  %v1808_v52 = vsel %vm1552_vm7, %v1146_v38, %v1680_v46  ;;  %v1476_v55 = vadd.f32 %v3177_v6, %v1475_v49  ;;  %v2509_v56 = vpop.f32.mrf.mxu0  ;;  %v2605_v57 = vpop.f32.mrf.mxu1 }
 0x157   : > { %v1872_v53 = vsel %vm1616_vm8, %v1466_v39, %v1744_v47  ;;  %1936 = vst [vmem:[%s3006_s12 + $0x1d0] sm:$0xff] %v1808_v52  ;;  %v1811_v58 = vsel %vm1555_vm9, %v1161_v44, %v1683_v50  ;;  %v1171_v60 = vadd.f32 %v3177_v6, %v2509_v56  ;;  %v1491_v61 = vadd.f32 %v3177_v6, %v2605_v57 }
 0x158   : > { %2000 = vst [vmem:[%s3006_s12 + $0x3d0] sm:$0xff] %v1872_v53  ;;  %v1875_v59 = vsel %vm1619_vm10, %v1481_v45, %v1747_v51  ;;  %1939 = vst [vmem:[%s3006_s12 + $0x1e8] sm:$0xff] %v1811_v58  ;;  %vm1554_vm11 = vcmp.ge.f32.partialorder %v1156_v54, 0.0  ;;  %v1682_v62 = vmul.f32 0.2, %v1156_v54  ;;  %vm1618_vm12 = vcmp.ge.f32.partialorder %v1476_v55, 0.0  ;;  %v1165_v0 = vpop.f32.mrf.mxu0  ;;  %v1485_v1 = vpop.f32.mrf.mxu1 }
 0x159   : > { %2003 = vst [vmem:[%s3006_s12 + $0x3e8] sm:$0xff] %v1875_v59  ;;  %v1746_v63 = vmul.f32 0.2, %v1476_v55  ;;  %vm1557_vm13 = vcmp.ge.f32.partialorder %v1171_v60, 0.0  ;;  %v1685_v2 = vmul.f32 0.2, %v1171_v60  ;;  %v1166_v7 = vadd.f32 %v3177_v6, %v1165_v0 }
 0x15a   : > { %vm1621_vm14 = vcmp.ge.f32.partialorder %v1491_v61, 0.0  ;;  %v1749_v3 = vmul.f32 0.2, %v1491_v61  ;;  %v1810_v4 = vsel %vm1554_vm11, %v1156_v54, %v1682_v62  ;;  %v1486_v8 = vadd.f32 %v3177_v6, %v1485_v1 }
 0x15b   : > { %v1874_v5 = vsel %vm1618_vm12, %v1476_v55, %v1746_v63  ;;  %1938 = vst [vmem:[%s3006_s12 + $0x1e0] sm:$0xff] %v1810_v4  ;;  %v1813_v9 = vsel %vm1557_vm13, %v1171_v60, %v1685_v2  ;;  %vm1556_vm15 = vcmp.ge.f32.partialorder %v1166_v7, 0.0  ;;  %v1684_v11 = vmul.f32 0.2, %v1166_v7 }
 0x15c   : > { %2002 = vst [vmem:[%s3006_s12 + $0x3e0] sm:$0xff] %v1874_v5  ;;  %v1877_v10 = vsel %vm1621_vm14, %v1491_v61, %v1749_v3  ;;  %1941 = vst [vmem:[%s3006_s12 + $0x1f8] sm:$0xff] %v1813_v9  ;;  %vm1620_vm0 = vcmp.ge.f32.partialorder %v1486_v8, 0.0  ;;  %v1748_v12 = vmul.f32 0.2, %v1486_v8 }
 0x15d   : > { %2005 = vst [vmem:[%s3006_s12 + $0x3f8] sm:$0xff] %v1877_v10  ;;  %v1812_v13 = vsel %vm1556_vm15, %v1166_v7, %v1684_v11 }
 0x15e   : > { %v1876_v14 = vsel %vm1620_vm0, %v1486_v8, %v1748_v12  ;;  %1940 = vst [vmem:[%s3006_s12 + $0x1f0] sm:$0xff] %v1812_v13 }
 0x15f   : > { %2004 = vst [vmem:[%s3006_s12 + $0x3f0] sm:$0xff] %v1876_v14 }
 0x160 PF: > { %s14_s17 = sadd.s32 1, %s2665_s17   ;;  %s3281_s15 = smov %s2661_s16 }
 0x161   : > { %p11_p5 = scmp.ge.s32.totalorder %s14_s17, 4   ;;  %s3282_s16 = smov %s3284_s2 }
 0x163   :  { %13 = sbr.rel (!%p11_p5) target bundleno = 2 (0x2), region = 75 }

// kernel: discriminator_forward.6
= control target key start
LH: loop header
LB: loop body
LE: loop exit
PB: predicated region body
PF: predicated region fallthrough
CT: control target
= control target key end

     0   :  { %s1287_s15 = smov 0   ;;  %s1289_s16 = smov 0   ;;  %s1975_s0 = inlined_call_operand.vmem [shape: f32[2,256,128], index: 0, kind: input, shape index: {}]   ;;  %s1976_s1 = inlined_call_operand.vmem [shape: f32[128,128], index: 1, kind: input, shape index: {}]   ;;  %s1977_s2 = inlined_call_operand.vmem [shape: f32[1,128], index: 2, kind: input, shape index: {}]   ;;  %s1978_s3 = inlined_call_operand.vmem [shape: f32[1,128], index: 3, kind: input, shape index: {}]   ;;  %s1979_s4 = inlined_call_operand.vmem [shape: f32[2,256,128], index: 4, kind: output, shape index: {}]  }
   0x1   :  { %s1291_s17 = smov 0  }
   0x2 LB: > { %s26_s18 = sadd.s32 1, %s1256_s16  ;;  %p1041_p0 = scmp.ge.s32.totalorder %s1260_s17, 1  ;;  %s1260_s17 = sphi %s1291_s17, %s14_s17   ;;  %s1256_s16 = sphi %s1289_s16, %s1995_s16   ;;  %s1252_s15 = sphi %s1287_s15, %s1994_s15  }
   0x3   : > { %p28_p1 = scmp.ge.s32.totalorder %s26_s18, 2  ;;  %p201_p2 = scmp.lt.s32.totalorder %s1260_s17, 3 }
   0x5   : > { %s1997_s18 = smov (%p28_p1, %s26_s18), 0  ;;  %p202_p3 = pnand %p1041_p0, %p201_p2 }
   0x6   : > { %p240_p4 = scmp.lt.s32.totalorder (!%p202_p3), %s1252_s15, 1 }
   0x7   : > { %205 = sbr.rel (%p202_p3) target bundleno = 460 (0x1cc), region = 36 }
   0xc   : > { %v310_v0 = vld [vmem:[%s1976_s1 + $0x78] sm:$0xff]  ;;  %v309_v1 = vld [vmem:[%s1976_s1 + $0x70] sm:$0xff]  ;;  %v308_v2 = vld [vmem:[%s1976_s1 + $0x68] sm:$0xff]  ;;  %s1999_s15 = smov (!%p240_p4, %s1252_s15), 1 }
   0xd   : > { %1100 = vmatprep.subr.mxu0 %v310_v0  ;;  %1180 = vmatprep.subr.mxu1 %v310_v0  ;;  %v307_v3 = vld [vmem:[%s1976_s1 + $0x60] sm:$0xff]  ;;  %s1050_s27 = sshll.u32 %s1999_s15, 8  ;;  %v306_v4 = vld [vmem:[%s1976_s1 + $0x58] sm:$0xff]  ;;  %v305_v6 = vld [vmem:[%s1976_s1 + $0x50] sm:$0xff] }
   0xe   : > { %1101 = vmatpush3.msra.mxu0 %v310_v0  ;;  %1196 = vmatpush3.msra.mxu1 %v310_v0  ;;  %s1325_s30 = scalar_lea.vmem %s1975_s0, %s1050_s27  ;;  %v304_v7 = vld [vmem:[%s1976_s1 + $0x48] sm:$0xff]  ;;  %v303_v8 = vld [vmem:[%s1976_s1 + $0x40] sm:$0xff]  ;;  %v302_v9 = vld [vmem:[%s1976_s1 + $0x38] sm:$0xff]  ;;  %s1778_s14 = scalar_lea.vmem %s1979_s4, %s1050_s27 }
   0xf   : > { %1102 = vmatprep.subr.mxu0 %v309_v1  ;;  %1181 = vmatprep.subr.mxu1 %v309_v1  ;;  %v263_v5 = vld [vmem:[%s1325_s30] sm:$0xff]  ;;  %v301_v10 = vld [vmem:[%s1976_s1 + $0x30] sm:$0xff]  ;;  %v300_v11 = vld [vmem:[%s1976_s1 + $0x28] sm:$0xff] }
  0x10   : > { %1103 = vmatpush3.msra.mxu0 %v309_v1  ;;  %1197 = vmatpush3.msra.mxu1 %v309_v1  ;;  %v299_v12 = vld [vmem:[%s1976_s1 + $0x20] sm:$0xff]  ;;  %v298_v13 = vld [vmem:[%s1976_s1 + $0x18] sm:$0xff]  ;;  %v297_v14 = vld [vmem:[%s1976_s1 + $0x10] sm:$0xff] }
  0x11   : > { %1104 = vmatprep.subr.mxu0 %v308_v2  ;;  %1182 = vmatprep.subr.mxu1 %v308_v2  ;;  %v296_v15 = vld [vmem:[%s1976_s1 + $0x8] sm:$0xff]  ;;  %v295_v16 = vld [vmem:[%s1976_s1] sm:$0xff]  ;;  %v265_v18 = vld [vmem:[%s1325_s30 + $0x10] sm:$0xff] }
  0x12   : > { %1105 = vmatpush3.msra.mxu0 %v308_v2  ;;  %1198 = vmatpush3.msra.mxu1 %v308_v2  ;;  %v264_v17 = vld [vmem:[%s1325_s30 + $0x8] sm:$0xff]  ;;  %v279_v19 = vld [vmem:[%s1325_s30 + $0x80] sm:$0xff]  ;;  %v281_v21 = vld [vmem:[%s1325_s30 + $0x90] sm:$0xff] }
  0x13   : > { %1106 = vmatprep.subr.mxu0 %v307_v3  ;;  %1132 = vmatprep.mubr.f32.mxu0 %v263_v5  ;;  %v280_v20 = vld [vmem:[%s1325_s30 + $0x88] sm:$0xff]  ;;  %v266_v22 = vld [vmem:[%s1325_s30 + $0x18] sm:$0xff]  ;;  %v267_v23 = vld [vmem:[%s1325_s30 + $0x20] sm:$0xff] }
  0x14   : > { %1107 = vmatpush3.msra.mxu0 %v307_v3  ;;  %1183 = vmatprep.subr.mxu1 %v307_v3  ;;  %v282_v24 = vld [vmem:[%s1325_s30 + $0x98] sm:$0xff]  ;;  %v283_v25 = vld [vmem:[%s1325_s30 + $0xa0] sm:$0xff]  ;;  %v268_v26 = vld [vmem:[%s1325_s30 + $0x28] sm:$0xff] }
  0x15   : > { %1108 = vmatprep.subr.mxu0 %v306_v4  ;;  %1199 = vmatpush3.msra.mxu1 %v307_v3  ;;  %v269_v27 = vld [vmem:[%s1325_s30 + $0x30] sm:$0xff]  ;;  %v284_v28 = vld [vmem:[%s1325_s30 + $0xa8] sm:$0xff]  ;;  %v270_v30 = vld [vmem:[%s1325_s30 + $0x38] sm:$0xff] }
  0x16   : > { %1109 = vmatpush3.msra.mxu0 %v306_v4  ;;  %1184 = vmatprep.subr.mxu1 %v306_v4  ;;  %v285_v29 = vld [vmem:[%s1325_s30 + $0xb0] sm:$0xff]  ;;  %v271_v31 = vld [vmem:[%s1325_s30 + $0x40] sm:$0xff]  ;;  %v286_v32 = vld [vmem:[%s1325_s30 + $0xb8] sm:$0xff] }
  0x17   : > { %1110 = vmatprep.subr.mxu0 %v305_v6  ;;  %1200 = vmatpush3.msra.mxu1 %v306_v4  ;;  %v287_v33 = vld [vmem:[%s1325_s30 + $0xc0] sm:$0xff]  ;;  %v272_v34 = vld [vmem:[%s1325_s30 + $0x48] sm:$0xff]  ;;  %v273_v35 = vld [vmem:[%s1325_s30 + $0x50] sm:$0xff] }
  0x18   : > { %1111 = vmatpush3.msra.mxu0 %v305_v6  ;;  %1185 = vmatprep.subr.mxu1 %v305_v6  ;;  %v288_v36 = vld [vmem:[%s1325_s30 + $0xc8] sm:$0xff]  ;;  %v289_v37 = vld [vmem:[%s1325_s30 + $0xd0] sm:$0xff]  ;;  %v274_v38 = vld [vmem:[%s1325_s30 + $0x58] sm:$0xff] }
  0x19   : > { %1112 = vmatprep.subr.mxu0 %v304_v7  ;;  %1201 = vmatpush3.msra.mxu1 %v305_v6  ;;  %v275_v39 = vld [vmem:[%s1325_s30 + $0x60] sm:$0xff]  ;;  %v290_v40 = vld [vmem:[%s1325_s30 + $0xd8] sm:$0xff]  ;;  %v276_v42 = vld [vmem:[%s1325_s30 + $0x68] sm:$0xff] }
  0x1a   : > { %1113 = vmatpush3.msra.mxu0 %v304_v7  ;;  %1186 = vmatprep.subr.mxu1 %v304_v7  ;;  %v291_v41 = vld [vmem:[%s1325_s30 + $0xe0] sm:$0xff]  ;;  %v277_v43 = vld [vmem:[%s1325_s30 + $0x70] sm:$0xff]  ;;  %v292_v44 = vld [vmem:[%s1325_s30 + $0xe8] sm:$0xff] }
  0x1b   : > { %1114 = vmatprep.subr.mxu0 %v303_v8  ;;  %1202 = vmatpush3.msra.mxu1 %v304_v7  ;;  %v293_v45 = vld [vmem:[%s1325_s30 + $0xf0] sm:$0xff]  ;;  %v278_v46 = vld [vmem:[%s1325_s30 + $0x78] sm:$0xff] }
  0x1c   : > { %1115 = vmatpush3.msra.mxu0 %v303_v8  ;;  %1187 = vmatprep.subr.mxu1 %v303_v8  ;;  %v294_v47 = vld [vmem:[%s1325_s30 + $0xf8] sm:$0xff] }
  0x1d   : > { %1116 = vmatprep.subr.mxu0 %v302_v9  ;;  %1203 = vmatpush3.msra.mxu1 %v303_v8 }
  0x1e   : > { %1117 = vmatpush3.msra.mxu0 %v302_v9  ;;  %1188 = vmatprep.subr.mxu1 %v302_v9 }
  0x1f   : > { %1118 = vmatprep.subr.mxu0 %v301_v10  ;;  %1204 = vmatpush3.msra.mxu1 %v302_v9 }
  0x20   : > { %1119 = vmatpush3.msra.mxu0 %v301_v10  ;;  %1189 = vmatprep.subr.mxu1 %v301_v10 }
  0x21   : > { %1120 = vmatprep.subr.mxu0 %v300_v11  ;;  %1205 = vmatpush3.msra.mxu1 %v301_v10 }
  0x22   : > { %1121 = vmatpush3.msra.mxu0 %v300_v11  ;;  %1190 = vmatprep.subr.mxu1 %v300_v11 }
  0x23   : > { %1122 = vmatprep.subr.mxu0 %v299_v12  ;;  %1206 = vmatpush3.msra.mxu1 %v300_v11 }
  0x24   : > { %1123 = vmatpush3.msra.mxu0 %v299_v12  ;;  %1191 = vmatprep.subr.mxu1 %v299_v12 }
  0x25   : > { %1124 = vmatprep.subr.mxu0 %v298_v13  ;;  %1207 = vmatpush3.msra.mxu1 %v299_v12 }
  0x26   : > { %1125 = vmatpush3.msra.mxu0 %v298_v13  ;;  %1192 = vmatprep.subr.mxu1 %v298_v13 }
  0x27   : > { %1126 = vmatprep.subr.mxu0 %v297_v14  ;;  %1208 = vmatpush3.msra.mxu1 %v298_v13 }
  0x28   : > { %1127 = vmatpush3.msra.mxu0 %v297_v14  ;;  %1193 = vmatprep.subr.mxu1 %v297_v14 }
  0x29   : > { %1128 = vmatprep.subr.mxu0 %v296_v15  ;;  %1209 = vmatpush3.msra.mxu1 %v297_v14 }
  0x2a   : > { %1129 = vmatpush3.msra.mxu0 %v296_v15  ;;  %1194 = vmatprep.subr.mxu1 %v296_v15 }
  0x2b   : > { %1130 = vmatprep.subr.mxu0 %v295_v16  ;;  %1210 = vmatpush3.msra.mxu1 %v296_v15 }
  0x2c   : > { %1131 = vmatpush3.msra.mxu0 %v295_v16  ;;  %1195 = vmatprep.subr.mxu1 %v295_v16 }
  0x2d   : > { %1133 = vmatmul.mubr.f32.vlgmr.msra.gmra.mxu0 %v264_v17  ;;  %1211 = vmatpush3.msra.mxu1 %v295_v16 }
  0x2e   : > { %1135 = vmatprep.mubr.f32.mxu0 %v265_v18  ;;  %1156 = vmatprep.mubr.f32.mxu1 %v279_v19 }
  0x2f   : > { %1157 = vmatmul.mubr.f32.vlgmr.msra.gmra.mxu1 %v280_v20 }
  0x30   : > { %1159 = vmatprep.mubr.f32.mxu1 %v281_v21 }
  0x31   : > { %1136 = vmatmul.mubr.f32.gmra.mxu0 %v266_v22 }
  0x32   : > { %1138 = vmatprep.mubr.f32.mxu0 %v267_v23 }
  0x33   : > { %1160 = vmatmul.mubr.f32.gmra.mxu1 %v282_v24 }
  0x34   : > { %1162 = vmatprep.mubr.f32.mxu1 %v283_v25 }
  0x35   : > { %1139 = vmatmul.mubr.f32.gmra.mxu0 %v268_v26 }
  0x36   : > { %1141 = vmatprep.mubr.f32.mxu0 %v269_v27 }
  0x37   : > { %1163 = vmatmul.mubr.f32.gmra.mxu1 %v284_v28 }
  0x38   : > { %1165 = vmatprep.mubr.f32.mxu1 %v285_v29 }
  0x39   : > { %1142 = vmatmul.mubr.f32.gmra.mxu0 %v270_v30 }
  0x3a   : > { %1144 = vmatprep.mubr.f32.mxu0 %v271_v31 }
  0x3b   : > { %1166 = vmatmul.mubr.f32.gmra.mxu1 %v286_v32 }
  0x3c   : > { %1168 = vmatprep.mubr.f32.mxu1 %v287_v33 }
  0x3d   : > { %1145 = vmatmul.mubr.f32.gmra.mxu0 %v272_v34 }
  0x3e   : > { %1147 = vmatprep.mubr.f32.mxu0 %v273_v35 }
  0x3f   : > { %1169 = vmatmul.mubr.f32.gmra.mxu1 %v288_v36 }
  0x40   : > { %1171 = vmatprep.mubr.f32.mxu1 %v289_v37 }
  0x41   : > { %1148 = vmatmul.mubr.f32.gmra.mxu0 %v274_v38 }
  0x42   : > { %1150 = vmatprep.mubr.f32.mxu0 %v275_v39 }
  0x43   : > { %1172 = vmatmul.mubr.f32.gmra.mxu1 %v290_v40 }
  0x44   : > { %1174 = vmatprep.mubr.f32.mxu1 %v291_v41 }
  0x45   : > { %1151 = vmatmul.mubr.f32.gmra.mxu0 %v276_v42 }
  0x46   : > { %1153 = vmatprep.mubr.f32.mxu0 %v277_v43 }
  0x47   : > { %1175 = vmatmul.mubr.f32.gmra.mxu1 %v292_v44 }
  0x48   : > { %1177 = vmatprep.mubr.f32.mxu1 %v293_v45 }
  0x49   : > { %1154 = vmatmul.mubr.f32.gmra.mxu0 %v278_v46 }
  0x4b   : > { %1178 = vmatmul.mubr.f32.gmra.mxu1 %v294_v47 }
  0xed   : > { %v1395_v48 = vpop.f32.mrf.mxu0 }
  0xef   : > { %v1397_v49 = vpop.f32.mrf.mxu0  ;;  %v1399_v50 = vpop.f32.mrf.mxu1 }
  0xf0   : > { %v536_v52 = vadd.f32 %v1395_v48, %v1397_v49 }
  0xf1   : > { %v1401_v51 = vpop.f32.mrf.mxu0  ;;  %v1407_v54 = vpop.f32.mrf.mxu1 }
  0xf3   : > { %v1405_v53 = vpop.f32.mrf.mxu0  ;;  %v1415_v59 = vpop.f32.mrf.mxu1 }
  0xf4   : > { %v537_v55 = vadd.f32 %v536_v52, %v1405_v53 }
  0xf5   : > { %v1410_v56 = vpop.f32.mrf.mxu0  ;;  %v1423_v0 = vpop.f32.mrf.mxu1 }
  0xf6   : > { %v538_v57 = vadd.f32 %v1401_v51, %v537_v55 }
  0xf7   : > { %v1413_v58 = vpop.f32.mrf.mxu0  ;;  %v1431_v5 = vpop.f32.mrf.mxu1 }
  0xf8   : > { %v539_v60 = vadd.f32 %v538_v57, %v1413_v58 }
  0xf9   : > { %v1418_v61 = vpop.f32.mrf.mxu0  ;;  %v1439_v10 = vpop.f32.mrf.mxu1 }
  0xfa   : > { %v540_v62 = vadd.f32 %v1410_v56, %v539_v60 }
  0xfb   : > { %v1421_v63 = vpop.f32.mrf.mxu0  ;;  %v1447_v15 = vpop.f32.mrf.mxu1 }
  0xfc   : > { %v541_v1 = vadd.f32 %v540_v62, %v1421_v63 }
  0xfd   : > { %v1426_v2 = vpop.f32.mrf.mxu0  ;;  %v1455_v20 = vpop.f32.mrf.mxu1 }
  0xfe   : > { %v542_v3 = vadd.f32 %v1418_v61, %v541_v1 }
  0xff   : > { %v1429_v4 = vpop.f32.mrf.mxu0  ;;  %v1459_v23 = vpop.f32.mrf.mxu1 }
 0x100   : > { %v543_v6 = vadd.f32 %v542_v3, %v1429_v4 }
 0x101   : > { %v1434_v7 = vpop.f32.mrf.mxu0  ;;  %v1463_v26 = vpop.f32.mrf.mxu1 }
 0x102   : > { %v544_v8 = vadd.f32 %v1426_v2, %v543_v6 }
 0x103   : > { %v1437_v9 = vpop.f32.mrf.mxu0  ;;  %v1467_v29 = vpop.f32.mrf.mxu1 }
 0x104   : > { %v545_v11 = vadd.f32 %v544_v8, %v1437_v9 }
 0x105   : > { %v1442_v12 = vpop.f32.mrf.mxu0  ;;  %v1471_v32 = vpop.f32.mrf.mxu1 }
 0x106   : > { %v546_v13 = vadd.f32 %v1434_v7, %v545_v11 }
 0x107   : > { %v1445_v14 = vpop.f32.mrf.mxu0  ;;  %v1475_v35 = vpop.f32.mrf.mxu1 }
 0x108   : > { %v547_v16 = vadd.f32 %v546_v13, %v1445_v14 }
 0x109   : > { %v1450_v17 = vpop.f32.mrf.mxu0  ;;  %v1479_v38 = vpop.f32.mrf.mxu1 }
 0x10a   : > { %v548_v18 = vadd.f32 %v1442_v12, %v547_v16 }
 0x10b   : > { %v1453_v19 = vpop.f32.mrf.mxu0  ;;  %v1483_v41 = vpop.f32.mrf.mxu1 }
 0x10c   : > { %v549_v21 = vadd.f32 %v548_v18, %v1453_v19 }
 0x10d   : > { %v1487_v44 = vpop.f32.mrf.mxu1 }
 0x10e   : > { %v550_v22 = vadd.f32 %v1450_v17, %v549_v21 }
 0x110   : > { %v551_v24 = vadd.f32 %v550_v22, %v1407_v54 }
 0x112   : > { %v552_v25 = vadd.f32 %v1399_v50, %v551_v24 }
 0x114   : > { %v553_v27 = vadd.f32 %v552_v25, %v1423_v0 }
 0x116   : > { %v554_v28 = vadd.f32 %v1415_v59, %v553_v27 }
 0x118   : > { %v555_v30 = vadd.f32 %v554_v28, %v1439_v10 }
 0x11a   : > { %v556_v31 = vadd.f32 %v1431_v5, %v555_v30 }
 0x11c   : > { %v557_v33 = vadd.f32 %v556_v31, %v1455_v20 }
 0x11e   : > { %v558_v34 = vadd.f32 %v1447_v15, %v557_v33 }
 0x120   : > { %v559_v36 = vadd.f32 %v558_v34, %v1463_v26 }
 0x122   : > { %v560_v37 = vadd.f32 %v1459_v23, %v559_v36 }
 0x124   : > { %v561_v39 = vadd.f32 %v560_v37, %v1471_v32 }
 0x126   : > { %v562_v40 = vadd.f32 %v1467_v29, %v561_v39 }
 0x128   : > { %v563_v42 = vadd.f32 %v562_v40, %v1479_v38 }
 0x12a   : > { %v564_v43 = vadd.f32 %v1475_v35, %v563_v42 }
 0x12c   : > { %v565_v45 = vadd.f32 %v564_v43, %v1487_v44 }
 0x12e   : > { %v566_v46 = vadd.f32 %v1483_v41, %v565_v45 }
 0x130   : > { %v567_v47 = vrot.slane %v566_v46, 4 }
 0x132   : > { %v568_v52 = vadd.f32 %v567_v47, %v566_v46 }
 0x134   : > { %v569_v55 = vrot.slane %v568_v52, 2 }
 0x136   : > { %v570_v57 = vadd.f32 %v569_v55, %v568_v52 }
 0x138   : > { %v571_v60 = vrot.slane %v570_v57, 1 }
 0x13a   : > { %v572_v62 = vadd.f32 %v571_v60, %v570_v57 }
 0x13c   : > { %v1491_v1 = vmul.f32 0.00390625, %v572_v62 }
 0x13e   : > { %v1495_v3 = vsub.f32 %v1397_v49, %v1491_v1  ;;  %v1499_v6 = vsub.f32 %v1395_v48, %v1491_v1  ;;  %v1503_v8 = vsub.f32 %v1405_v53, %v1491_v1  ;;  %v1511_v16 = vsub.f32 %v1401_v51, %v1491_v1 }
 0x13f   : > { %v1515_v49 = vsub.f32 %v1413_v58, %v1491_v1  ;;  %v1521_v53 = vsub.f32 %v1410_v56, %v1491_v1  ;;  %v1527_v51 = vsub.f32 %v1421_v63, %v1491_v1  ;;  %v1533_v25 = vsub.f32 %v1418_v61, %v1491_v1 }
 0x140   : > { %v607_v11 = vmul.f32 %v1495_v3, %v1495_v3  ;;  %v608_v13 = vmul.f32 %v1499_v6, %v1499_v6  ;;  %v609_v48 = vmul.f32 %v1503_v8, %v1503_v8  ;;  %v610_v21 = vmul.f32 %v1511_v16, %v1511_v16 }
 0x141   : > { %v611_v58 = vmul.f32 %v1515_v49, %v1515_v49  ;;  %v612_v56 = vmul.f32 %v1521_v53, %v1521_v53  ;;  %v1539_v28 = vsub.f32 %v1429_v4, %v1491_v1  ;;  %v613_v63 = vmul.f32 %v1527_v51, %v1527_v51 }
 0x142   : > { %v639_v18 = vadd.f32 %v608_v13, %v607_v11  ;;  %v1545_v31 = vsub.f32 %v1426_v2, %v1491_v1  ;;  %v614_v61 = vmul.f32 %v1533_v25, %v1533_v25  ;;  %v1551_v34 = vsub.f32 %v1437_v9, %v1491_v1 }
 0x143   : > { %v615_v4 = vmul.f32 %v1539_v28, %v1539_v28  ;;  %v1557_v37 = vsub.f32 %v1434_v7, %v1491_v1  ;;  %v1563_v40 = vsub.f32 %v1445_v14, %v1491_v1  ;;  %v1569_v43 = vsub.f32 %v1442_v12, %v1491_v1 }
 0x144   : > { %v640_v22 = vadd.f32 %v639_v18, %v609_v48  ;;  %v616_v2 = vmul.f32 %v1545_v31, %v1545_v31  ;;  %v617_v9 = vmul.f32 %v1551_v34, %v1551_v34  ;;  %v1575_v46 = vsub.f32 %v1453_v19, %v1491_v1 }
 0x145   : > { %v618_v7 = vmul.f32 %v1557_v37, %v1557_v37  ;;  %v619_v14 = vmul.f32 %v1563_v40, %v1563_v40  ;;  %v1581_v52 = vsub.f32 %v1450_v17, %v1491_v1  ;;  %v620_v12 = vmul.f32 %v1569_v43, %v1569_v43 }
 0x146   : > { %v641_v24 = vadd.f32 %v640_v22, %v610_v21  ;;  %v1587_v57 = vsub.f32 %v1407_v54, %v1491_v1  ;;  %v621_v19 = vmul.f32 %v1575_v46, %v1575_v46  ;;  %v1593_v62 = vsub.f32 %v1399_v50, %v1491_v1 }
 0x147   : > { %v622_v17 = vmul.f32 %v1581_v52, %v1581_v52  ;;  %v1599_v13 = vsub.f32 %v1423_v0, %v1491_v1  ;;  %v1605_v18 = vsub.f32 %v1415_v59, %v1491_v1  ;;  %v1611_v22 = vsub.f32 %v1439_v10, %v1491_v1 }
 0x148   : > { %v642_v27 = vadd.f32 %v641_v24, %v611_v58  ;;  %v623_v54 = vmul.f32 %v1587_v57, %v1587_v57  ;;  %v624_v50 = vmul.f32 %v1593_v62, %v1593_v62  ;;  %v1617_v24 = vsub.f32 %v1431_v5, %v1491_v1 }
 0x149   : > { %v625_v0 = vmul.f32 %v1599_v13, %v1599_v13  ;;  %v626_v59 = vmul.f32 %v1605_v18, %v1605_v18  ;;  %v627_v10 = vmul.f32 %v1611_v22, %v1611_v22 }
 0x14a   : > { %v643_v30 = vadd.f32 %v642_v27, %v612_v56  ;;  %v1623_v27 = vsub.f32 %v1455_v20, %v1491_v1  ;;  %v628_v5 = vmul.f32 %v1617_v24, %v1617_v24 }
 0x14c   : > { %v644_v33 = vadd.f32 %v643_v30, %v613_v63  ;;  %v1629_v30 = vsub.f32 %v1447_v15, %v1491_v1  ;;  %v629_v20 = vmul.f32 %v1623_v27, %v1623_v27 }
 0x14e   : > { %v645_v36 = vadd.f32 %v644_v33, %v614_v61  ;;  %v1635_v33 = vsub.f32 %v1463_v26, %v1491_v1  ;;  %v630_v15 = vmul.f32 %v1629_v30, %v1629_v30 }
 0x150   : > { %v646_v39 = vadd.f32 %v645_v36, %v615_v4  ;;  %v1641_v36 = vsub.f32 %v1459_v23, %v1491_v1  ;;  %v603_v23 = vsub.f32 %v1479_v38, %v1491_v1 }
 0x152   : > { %v647_v42 = vadd.f32 %v646_v39, %v616_v2  ;;  %v601_v39 = vsub.f32 %v1471_v32, %v1491_v1 }
 0x154   : > { %v648_v45 = vadd.f32 %v647_v42, %v617_v9  ;;  %v631_v9 = vmul.f32 %v1635_v33, %v1635_v33  ;;  %v602_v42 = vsub.f32 %v1467_v29, %v1491_v1 }
 0x156   : > { %v649_v47 = vadd.f32 %v648_v45, %v618_v7  ;;  %v632_v7 = vmul.f32 %v1641_v36, %v1641_v36  ;;  %v634_v32 = vmul.f32 %v602_v42, %v602_v42 }
 0x158   : > { %v650_v55 = vadd.f32 %v649_v47, %v619_v14  ;;  %v633_v14 = vmul.f32 %v601_v39, %v601_v39 }
 0x15a   : > { %v651_v60 = vadd.f32 %v650_v55, %v620_v12  ;;  %v604_v12 = vsub.f32 %v1475_v35, %v1491_v1 }
 0x15c   : > { %v652_v11 = vadd.f32 %v651_v60, %v621_v19  ;;  %v1659_v19 = vsub.f32 %v1487_v44, %v1491_v1  ;;  %v635_v60 = vmul.f32 %v603_v23, %v603_v23 }
 0x15e   : > { %v653_v48 = vadd.f32 %v652_v11, %v622_v17  ;;  %v1663_v17 = vsub.f32 %v1483_v41, %v1491_v1  ;;  %v636_v11 = vmul.f32 %v604_v12, %v604_v12  ;;  %v637_v38 = vmul.f32 %v1659_v19, %v1659_v19  ;;  %v1046_v1 = vld [vmem:[%s1977_s2] ss:$0 sm:$0xff] }
 0x160   : > { %v654_v21 = vadd.f32 %v653_v48, %v623_v54  ;;  %v638_v35 = vmul.f32 %v1663_v17, %v1663_v17 }
 0x162   : > { %v655_v58 = vadd.f32 %v654_v21, %v624_v50 }
 0x164   : > { %v656_v56 = vadd.f32 %v655_v58, %v625_v0 }
 0x166   : > { %v657_v63 = vadd.f32 %v656_v56, %v626_v59 }
 0x168   : > { %v658_v61 = vadd.f32 %v657_v63, %v627_v10 }
 0x16a   : > { %v659_v4 = vadd.f32 %v658_v61, %v628_v5  ;;  %v684_v5 = vmul.f32 %v1046_v1, %v1495_v3  ;;  %v685_v61 = vmul.f32 %v1046_v1, %v1499_v6  ;;  %v694_v3 = vmul.f32 %v1046_v1, %v1551_v34 }
 0x16b   : > { %v695_v6 = vmul.f32 %v1046_v1, %v1557_v37  ;;  %v704_v34 = vmul.f32 %v1046_v1, %v1611_v22  ;;  %v705_v37 = vmul.f32 %v1046_v1, %v1617_v24 }
 0x16c   : > { %v660_v2 = vadd.f32 %v659_v4, %v629_v20  ;;  %v686_v20 = vmul.f32 %v1046_v1, %v1503_v8  ;;  %v687_v4 = vmul.f32 %v1046_v1, %v1511_v16  ;;  %v696_v8 = vmul.f32 %v1046_v1, %v1563_v40 }
 0x16d   : > { %v697_v16 = vmul.f32 %v1046_v1, %v1569_v43  ;;  %v710_v40 = vmul.f32 %v1046_v1, %v601_v39  ;;  %v712_v43 = vmul.f32 %v1046_v1, %v603_v23 }
 0x16e   : > { %v661_v26 = vadd.f32 %v660_v2, %v630_v15  ;;  %v688_v15 = vmul.f32 %v1046_v1, %v1515_v49  ;;  %v689_v2 = vmul.f32 %v1046_v1, %v1521_v53  ;;  %v698_v49 = vmul.f32 %v1046_v1, %v1575_v46 }
 0x16f   : > { %v699_v53 = vmul.f32 %v1046_v1, %v1581_v52 }
 0x170   : > { %v662_v45 = vadd.f32 %v661_v26, %v631_v9  ;;  %v690_v9 = vmul.f32 %v1046_v1, %v1527_v51  ;;  %v691_v26 = vmul.f32 %v1046_v1, %v1533_v25  ;;  %v700_v51 = vmul.f32 %v1046_v1, %v1587_v57 }
 0x171   : > { %v701_v25 = vmul.f32 %v1046_v1, %v1593_v62 }
 0x172   : > { %v663_v47 = vadd.f32 %v662_v45, %v632_v7  ;;  %v692_v7 = vmul.f32 %v1046_v1, %v1539_v28  ;;  %v693_v45 = vmul.f32 %v1046_v1, %v1545_v31  ;;  %v702_v28 = vmul.f32 %v1046_v1, %v1599_v13 }
 0x173   : > { %v703_v31 = vmul.f32 %v1046_v1, %v1605_v18 }
 0x174   : > { %v664_v55 = vadd.f32 %v663_v47, %v633_v14  ;;  %v711_v47 = vmul.f32 %v1046_v1, %v602_v42 }
 0x176   : > { %v665_v29 = vadd.f32 %v664_v55, %v634_v32  ;;  %v713_v32 = vmul.f32 %v1046_v1, %v604_v12 }
 0x178   : > { %v666_v54 = vadd.f32 %v665_v29, %v635_v60 }
 0x17a   : > { %v667_v48 = vadd.f32 %v666_v54, %v636_v11 }
 0x17c   : > { %v668_v50 = vadd.f32 %v667_v48, %v637_v38 }
 0x17e   : > { %v669_v21 = vadd.f32 %v668_v50, %v638_v35  ;;  %v714_v50 = vmul.f32 %v1046_v1, %v1659_v19  ;;  %v1047_v19 = vld [vmem:[%s1978_s3] ss:$0 sm:$0xff] }
 0x180   : > { %v670_v0 = vrot.slane %v669_v21, 4 }
 0x182   : > { %v671_v44 = vadd.f32 %v670_v0, %v669_v21  ;;  %v715_v21 = vmul.f32 %v1046_v1, %v1663_v17 }
 0x184   : > { %v672_v58 = vrot.slane %v671_v44, 2 }
 0x186   : > { %v673_v59 = vadd.f32 %v672_v58, %v671_v44 }
 0x188   : > { %v674_v56 = vrot.slane %v673_v59, 1 }
 0x18a   : > { %v675_v10 = vadd.f32 %v674_v56, %v673_v59 }
 0x18c   : > { %v676_v63 = vmul.f32 0.00390625, %v675_v10 }
 0x18e   : > { %v716_v41 = vadd.f32 1e-05, %v676_v63 }
 0x190   : > { %1236 = vrsqrt.f32 %v716_v41 }
 0x19d   : > { %v1237_v14 = vpop.eup %1236 }
 0x19e   : > { %v718_v46 = vmul.f32 %v1237_v14, %v684_v5  ;;  %v719_v55 = vmul.f32 %v1237_v14, %v685_v61  ;;  %v720_v52 = vmul.f32 %v1237_v14, %v686_v20  ;;  %v721_v60 = vmul.f32 %v1237_v14, %v687_v4 }
 0x19f   : > { %v722_v57 = vmul.f32 %v1237_v14, %v688_v15  ;;  %v723_v29 = vmul.f32 %v1237_v14, %v689_v2  ;;  %v724_v62 = vmul.f32 %v1237_v14, %v690_v9  ;;  %v725_v11 = vmul.f32 %v1237_v14, %v691_v26 }
 0x1a0   : > { %v726_v13 = vmul.f32 %v1237_v14, %v692_v7  ;;  %v727_v54 = vmul.f32 %v1237_v14, %v693_v45  ;;  %v728_v18 = vmul.f32 %v1237_v14, %v694_v3  ;;  %v729_v38 = vmul.f32 %v1237_v14, %v695_v6 }
 0x1a1   : > { %v730_v22 = vmul.f32 %v1237_v14, %v696_v8  ;;  %v731_v48 = vmul.f32 %v1237_v14, %v697_v16  ;;  %v732_v24 = vmul.f32 %v1237_v14, %v698_v49  ;;  %v733_v35 = vmul.f32 %v1237_v14, %v699_v53 }
 0x1a2   : > { %v734_v39 = vmul.f32 %v1237_v14, %v700_v51  ;;  %v735_v42 = vmul.f32 %v1237_v14, %v701_v25  ;;  %v736_v23 = vmul.f32 %v1237_v14, %v702_v28  ;;  %v737_v12 = vmul.f32 %v1237_v14, %v703_v31 }
 0x1a3   : > { %v738_v0 = vmul.f32 %v1237_v14, %v704_v34  ;;  %v739_v44 = vmul.f32 %v1237_v14, %v705_v37  ;;  %v744_v58 = vmul.f32 %v1237_v14, %v710_v40  ;;  %v745_v59 = vmul.f32 %v1237_v14, %v711_v47 }
 0x1a4   : > { %v746_v56 = vmul.f32 %v1237_v14, %v712_v43  ;;  %v747_v10 = vmul.f32 %v1237_v14, %v713_v32  ;;  %v748_v63 = vmul.f32 %v1237_v14, %v714_v50  ;;  %v749_v41 = vmul.f32 %v1237_v14, %v715_v21 }
 0x1a5   : > { %v706_v5 = vmul.f32 %v1046_v1, %v1623_v27  ;;  %v707_v61 = vmul.f32 %v1046_v1, %v1629_v30  ;;  %v708_v20 = vmul.f32 %v1046_v1, %v1635_v33  ;;  %v709_v4 = vmul.f32 %v1046_v1, %v1641_v36 }
 0x1a6   : > { %v1703_v26 = vadd.f32 %v1047_v19, %v718_v46  ;;  %v1705_v7 = vadd.f32 %v1047_v19, %v719_v55  ;;  %v1707_v45 = vadd.f32 %v1047_v19, %v720_v52  ;;  %v1709_v27 = vadd.f32 %v1047_v19, %v721_v60 }
 0x1a7   : > { %v740_v17 = vmul.f32 %v1237_v14, %v706_v5  ;;  %v741_v15 = vmul.f32 %v1237_v14, %v707_v61  ;;  %v742_v2 = vmul.f32 %v1237_v14, %v708_v20  ;;  %v743_v9 = vmul.f32 %v1237_v14, %v709_v4 }
 0x1a8   : > { %v1711_v30 = vadd.f32 %v1047_v19, %v722_v57  ;;  %v1713_v33 = vadd.f32 %v1047_v19, %v723_v29  ;;  %v1715_v36 = vadd.f32 %v1047_v19, %v724_v62  ;;  %v1717_v1 = vadd.f32 %v1047_v19, %v725_v11 }
 0x1a9   : > { %v1719_v3 = vadd.f32 %v1047_v19, %v726_v13  ;;  %v1721_v6 = vadd.f32 %v1047_v19, %v727_v54  ;;  %v1723_v8 = vadd.f32 %v1047_v19, %v728_v18  ;;  %v1725_v16 = vadd.f32 %v1047_v19, %v729_v38 }
 0x1aa   : > { %v1727_v49 = vadd.f32 %v1047_v19, %v730_v22  ;;  %v1729_v53 = vadd.f32 %v1047_v19, %v731_v48  ;;  %v1731_v51 = vadd.f32 %v1047_v19, %v732_v24  ;;  %v1733_v25 = vadd.f32 %v1047_v19, %v733_v35 }
 0x1ab   : > { %v1735_v28 = vadd.f32 %v1047_v19, %v734_v39  ;;  %v1737_v31 = vadd.f32 %v1047_v19, %v735_v42  ;;  %v1739_v34 = vadd.f32 %v1047_v19, %v736_v23  ;;  %v1741_v37 = vadd.f32 %v1047_v19, %v737_v12 }
 0x1ac   : > { %v1743_v14 = vadd.f32 %v1047_v19, %v738_v0  ;;  %v1745_v40 = vadd.f32 %v1047_v19, %v739_v44  ;;  %v1747_v47 = vadd.f32 %v1047_v19, %v740_v17  ;;  %v1749_v43 = vadd.f32 %v1047_v19, %v741_v15 }
 0x1ad   : > { %v1751_v32 = vadd.f32 %v1047_v19, %v742_v2  ;;  %v1753_v46 = vadd.f32 %v1047_v19, %v743_v9  ;;  %v1755_v55 = vadd.f32 %v1047_v19, %v744_v58  ;;  %v1757_v52 = vadd.f32 %v1047_v19, %v745_v59 }
 0x1ae   : > { %v1759_v60 = vadd.f32 %v1047_v19, %v746_v56  ;;  %v1761_v57 = vadd.f32 %v1047_v19, %v747_v10  ;;  %vm789_vm0 = vcmp.ge.f32.partialorder %v1703_v26, 0.0  ;;  %vm790_vm1 = vcmp.ge.f32.partialorder %v1705_v7, 0.0 }
 0x1af   : > { %vm791_vm2 = vcmp.ge.f32.partialorder %v1707_v45, 0.0  ;;  %vm792_vm3 = vcmp.ge.f32.partialorder %v1709_v27, 0.0  ;;  %vm793_vm4 = vcmp.ge.f32.partialorder %v1711_v30, 0.0  ;;  %vm794_vm5 = vcmp.ge.f32.partialorder %v1713_v33, 0.0 }
 0x1b0   : > { %vm795_vm6 = vcmp.ge.f32.partialorder %v1715_v36, 0.0  ;;  %vm796_vm7 = vcmp.ge.f32.partialorder %v1717_v1, 0.0  ;;  %vm797_vm8 = vcmp.ge.f32.partialorder %v1719_v3, 0.0  ;;  %v1780_v29 = vadd.f32 %v1047_v19, %v748_v63 }
 0x1b1   : > { %v821_v62 = vmul.f32 0.2, %v1703_v26  ;;  %v822_v11 = vmul.f32 0.2, %v1705_v7  ;;  %v823_v13 = vmul.f32 0.2, %v1707_v45  ;;  %v1789_v54 = vadd.f32 %v1047_v19, %v749_v41 }
 0x1b2   : > { %vm804_vm15 = vcmp.ge.f32.partialorder %v1733_v25, 0.0  ;;  %vm805_vm10 = vcmp.ge.f32.partialorder %v1735_v28, 0.0  ;;  %v824_v18 = vmul.f32 0.2, %v1709_v27  ;;  %v825_v38 = vmul.f32 0.2, %v1711_v30 }
 0x1b3   : > { %v826_v22 = vmul.f32 0.2, %v1713_v33  ;;  %vm810_vm14 = vcmp.ge.f32.partialorder %v1745_v40, 0.0  ;;  %v827_v48 = vmul.f32 0.2, %v1715_v36  ;;  %v853_v39 = vsel %vm789_vm0, %v1703_v26, %v821_v62 }
 0x1b4   : > { %v828_v24 = vmul.f32 0.2, %v1717_v1  ;;  %v829_v35 = vmul.f32 0.2, %v1719_v3  ;;  %vm811_vm11 = vcmp.ge.f32.partialorder %v1747_v47, 0.0  ;;  %v854_v50 = vsel %vm790_vm1, %v1705_v7, %v822_v11  ;;  %885 = vst [vmem:[%s1778_s14] sm:$0xff] %v853_v39 }
 0x1b5   : > { %v830_v42 = vmul.f32 0.2, %v1721_v6  ;;  %v831_v23 = vmul.f32 0.2, %v1723_v8  ;;  %v832_v12 = vmul.f32 0.2, %v1725_v16  ;;  %v855_v58 = vsel %vm791_vm2, %v1707_v45, %v823_v13 }
 0x1b6   : > { %vm815_vm0 = vcmp.ge.f32.partialorder %v1755_v55, 0.0  ;;  %vm817_vm12 = vcmp.ge.f32.partialorder %v1759_v60, 0.0  ;;  %vm818_vm9 = vcmp.ge.f32.partialorder %v1761_v57, 0.0  ;;  %v833_v21 = vmul.f32 0.2, %v1727_v49  ;;  %886 = vst [vmem:[%s1778_s14 + $0x8] sm:$0xff] %v854_v50 }
 0x1b7   : > { %v834_v0 = vmul.f32 0.2, %v1729_v53  ;;  %v835_v44 = vmul.f32 0.2, %v1731_v51  ;;  %vm819_vm1 = vcmp.ge.f32.partialorder %v1780_v29, 0.0  ;;  %vm820_vm13 = vcmp.ge.f32.partialorder %v1789_v54, 0.0 }
 0x1b8   : > { %v836_v59 = vmul.f32 0.2, %v1733_v25  ;;  %v837_v56 = vmul.f32 0.2, %v1735_v28  ;;  %v838_v10 = vmul.f32 0.2, %v1737_v31  ;;  %v856_v63 = vsel %vm792_vm3, %v1709_v27, %v824_v18 }
 0x1b9   : > { %887 = vst [vmem:[%s1778_s14 + $0x10] sm:$0xff] %v855_v58  ;;  %v839_v41 = vmul.f32 0.2, %v1739_v34  ;;  %v840_v5 = vmul.f32 0.2, %v1741_v37  ;;  %v857_v20 = vsel %vm793_vm4, %v1711_v30, %v825_v38  ;;  %888 = vst [vmem:[%s1778_s14 + $0x18] sm:$0xff] %v856_v63  ;;  %v858_v15 = vsel %vm794_vm5, %v1713_v33, %v826_v22 }
 0x1ba   : > { %v841_v61 = vmul.f32 0.2, %v1743_v14  ;;  %v842_v4 = vmul.f32 0.2, %v1745_v40  ;;  %v843_v19 = vmul.f32 0.2, %v1747_v47  ;;  %v859_v7 = vsel %vm795_vm6, %v1715_v36, %v827_v48 }
 0x1bb   : > { %v844_v17 = vmul.f32 0.2, %v1749_v43  ;;  %889 = vst [vmem:[%s1778_s14 + $0x20] sm:$0xff] %v857_v20  ;;  %v845_v2 = vmul.f32 0.2, %v1751_v32  ;;  %890 = vst [vmem:[%s1778_s14 + $0x28] sm:$0xff] %v858_v15  ;;  %v860_v33 = vsel %vm796_vm7, %v1717_v1, %v828_v24  ;;  %v861_v11 = vsel %vm797_vm8, %v1719_v3, %v829_v35 }
 0x1bc   : > { %v846_v9 = vmul.f32 0.2, %v1753_v46  ;;  %v847_v26 = vmul.f32 0.2, %v1755_v55  ;;  %v848_v45 = vmul.f32 0.2, %v1757_v52 }
 0x1bd   : > { %v849_v27 = vmul.f32 0.2, %v1759_v60  ;;  %v850_v30 = vmul.f32 0.2, %v1761_v57  ;;  %891 = vst [vmem:[%s1778_s14 + $0x30] sm:$0xff] %v859_v7  ;;  %vm1980_vm2 = vcmp.ge.f32.partialorder %v1721_v6, 0.0 }
 0x1be   : > { %v851_v62 = vmul.f32 0.2, %v1780_v29  ;;  %v852_v36 = vmul.f32 0.2, %v1789_v54  ;;  %v862_v13 = vsel %vm1980_vm2, %v1721_v6, %v830_v42  ;;  %892 = vst [vmem:[%s1778_s14 + $0x38] sm:$0xff] %v860_v33  ;;  %vm1981_vm3 = vcmp.ge.f32.partialorder %v1723_v8, 0.0 }
 0x1bf   : > { %v863_v1 = vsel %vm1981_vm3, %v1723_v8, %v831_v23  ;;  %vm1982_vm4 = vcmp.ge.f32.partialorder %v1725_v16, 0.0  ;;  %vm1983_vm5 = vcmp.ge.f32.partialorder %v1727_v49, 0.0  ;;  %vm1984_vm6 = vcmp.ge.f32.partialorder %v1729_v53, 0.0  ;;  %893 = vst [vmem:[%s1778_s14 + $0x40] sm:$0xff] %v861_v11  ;;  %894 = vst [vmem:[%s1778_s14 + $0x48] sm:$0xff] %v862_v13 }
 0x1c0   : > { %v864_v18 = vsel %vm1982_vm4, %v1725_v16, %v832_v12  ;;  %v865_v38 = vsel %vm1983_vm5, %v1727_v49, %v833_v21  ;;  %v866_v3 = vsel %vm1984_vm6, %v1729_v53, %v834_v0  ;;  %vm1985_vm7 = vcmp.ge.f32.partialorder %v1731_v51, 0.0  ;;  %895 = vst [vmem:[%s1778_s14 + $0x50] sm:$0xff] %v863_v1 }
 0x1c1   : > { %v867_v6 = vsel %vm1985_vm7, %v1731_v51, %v835_v44  ;;  %v868_v8 = vsel %vm804_vm15, %v1733_v25, %v836_v59  ;;  %v869_v16 = vsel %vm805_vm10, %v1735_v28, %v837_v56  ;;  %vm1986_vm8 = vcmp.ge.f32.partialorder %v1737_v31, 0.0  ;;  %896 = vst [vmem:[%s1778_s14 + $0x58] sm:$0xff] %v864_v18  ;;  %897 = vst [vmem:[%s1778_s14 + $0x60] sm:$0xff] %v865_v38 }
 0x1c2   : > { %v870_v49 = vsel %vm1986_vm8, %v1737_v31, %v838_v10  ;;  %898 = vst [vmem:[%s1778_s14 + $0x68] sm:$0xff] %v866_v3  ;;  %vm1987_vm2 = vcmp.ge.f32.partialorder %v1739_v34, 0.0  ;;  %vm1988_vm15 = vcmp.ge.f32.partialorder %v1741_v37, 0.0  ;;  %vm1989_vm10 = vcmp.ge.f32.partialorder %v1743_v14, 0.0  ;;  %899 = vst [vmem:[%s1778_s14 + $0x70] sm:$0xff] %v867_v6 }
 0x1c3   : > { %v871_v53 = vsel %vm1987_vm2, %v1739_v34, %v839_v41  ;;  %v872_v51 = vsel %vm1988_vm15, %v1741_v37, %v840_v5  ;;  %v873_v25 = vsel %vm1989_vm10, %v1743_v14, %v841_v61  ;;  %v874_v28 = vsel %vm810_vm14, %v1745_v40, %v842_v4  ;;  %900 = vst [vmem:[%s1778_s14 + $0x78] sm:$0xff] %v868_v8 }
 0x1c4   : > { %901 = vst [vmem:[%s1778_s14 + $0x80] sm:$0xff] %v869_v16  ;;  %902 = vst [vmem:[%s1778_s14 + $0x88] sm:$0xff] %v870_v49  ;;  %v875_v31 = vsel %vm811_vm11, %v1747_v47, %v843_v19  ;;  %vm1990_vm3 = vcmp.ge.f32.partialorder %v1749_v43, 0.0  ;;  %vm1991_vm4 = vcmp.ge.f32.partialorder %v1751_v32, 0.0  ;;  %vm1992_vm14 = vcmp.ge.f32.partialorder %v1753_v46, 0.0 }
 0x1c5   : > { %v876_v34 = vsel %vm1990_vm3, %v1749_v43, %v844_v17  ;;  %v877_v37 = vsel %vm1991_vm4, %v1751_v32, %v845_v2  ;;  %v878_v14 = vsel %vm1992_vm14, %v1753_v46, %v846_v9  ;;  %903 = vst [vmem:[%s1778_s14 + $0x90] sm:$0xff] %v871_v53  ;;  %904 = vst [vmem:[%s1778_s14 + $0x98] sm:$0xff] %v872_v51  ;;  %vm1993_vm11 = vcmp.ge.f32.partialorder %v1757_v52, 0.0 }
 0x1c6   : > { %905 = vst [vmem:[%s1778_s14 + $0xa0] sm:$0xff] %v873_v25  ;;  %906 = vst [vmem:[%s1778_s14 + $0xa8] sm:$0xff] %v874_v28  ;;  %v879_v40 = vsel %vm815_vm0, %v1755_v55, %v847_v26  ;;  %v880_v47 = vsel %vm1993_vm11, %v1757_v52, %v848_v45  ;;  %v881_v43 = vsel %vm817_vm12, %v1759_v60, %v849_v27 }
 0x1c7   : > { %v882_v32 = vsel %vm818_vm9, %v1761_v57, %v850_v30  ;;  %907 = vst [vmem:[%s1778_s14 + $0xb0] sm:$0xff] %v875_v31  ;;  %908 = vst [vmem:[%s1778_s14 + $0xb8] sm:$0xff] %v876_v34  ;;  %v883_v46 = vsel %vm819_vm1, %v1780_v29, %v851_v62  ;;  %v884_v55 = vsel %vm820_vm13, %v1789_v54, %v852_v36 }
 0x1c8   : > { %909 = vst [vmem:[%s1778_s14 + $0xc0] sm:$0xff] %v877_v37  ;;  %910 = vst [vmem:[%s1778_s14 + $0xc8] sm:$0xff] %v878_v14 }
 0x1c9   : > { %911 = vst [vmem:[%s1778_s14 + $0xd0] sm:$0xff] %v879_v40  ;;  %912 = vst [vmem:[%s1778_s14 + $0xd8] sm:$0xff] %v880_v47 }
 0x1ca   : > { %913 = vst [vmem:[%s1778_s14 + $0xe0] sm:$0xff] %v881_v43  ;;  %914 = vst [vmem:[%s1778_s14 + $0xe8] sm:$0xff] %v882_v32 }
 0x1cb   : > { %915 = vst [vmem:[%s1778_s14 + $0xf0] sm:$0xff] %v883_v46  ;;  %916 = vst [vmem:[%s1778_s14 + $0xf8] sm:$0xff] %v884_v55 }
 0x1cc PF: > { %s14_s17 = sadd.s32 1, %s1260_s17   ;;  %s1994_s15 = smov %s1256_s16 }
 0x1cd   : > { %p11_p5 = scmp.ge.s32.totalorder %s14_s17, 4   ;;  %s1995_s16 = smov %s1997_s18 }
 0x1cf   :  { %13 = sbr.rel (!%p11_p5) target bundleno = 2 (0x2), region = 75 }

// kernel: discriminator_forward.7
= control target key start
LH: loop header
LB: loop body
LE: loop exit
PB: predicated region body
PF: predicated region fallthrough
CT: control target
= control target key end

     0   :  { %s831_s15 = smov 0   ;;  %s833_s16 = smov 0   ;;  %s1000_s0 = inlined_call_operand.vmem [shape: f32[2,64,256], index: 0, kind: input, shape index: {}]   ;;  %s1001_s1 = inlined_call_operand.vmem [shape: f32[256,128], index: 1, kind: input, shape index: {}]   ;;  %s1002_s2 = inlined_call_operand.vmem [shape: f32[1,128], index: 2, kind: input, shape index: {}]   ;;  %s1003_s3 = inlined_call_operand.vmem [shape: f32[1,128], index: 3, kind: input, shape index: {}]   ;;  %s1004_s4 = inlined_call_operand.vmem [shape: f32[2,64,128], index: 4, kind: output, shape index: {}]  }
   0x1   :  { %s835_s17 = smov 0  }
   0x2 LB: > { %s26_s18 = sadd.s32 1, %s800_s16  ;;  %p657_p0 = scmp.ge.s32.totalorder %s804_s17, 1  ;;  %s804_s17 = sphi %s835_s17, %s14_s17   ;;  %s800_s16 = sphi %s833_s16, %s1006_s16   ;;  %s796_s15 = sphi %s831_s15, %s1005_s15  }
   0x3   : > { %p28_p1 = scmp.ge.s32.totalorder %s26_s18, 2  ;;  %p201_p2 = scmp.lt.s32.totalorder %s804_s17, 3 }
   0x5   : > { %s1008_s18 = smov (%p28_p1, %s26_s18), 0  ;;  %p202_p3 = pnand %p657_p0, %p201_p2 }
   0x6   : > { %p240_p4 = scmp.lt.s32.totalorder (!%p202_p3), %s796_s15, 1 }
   0x7   : > { %205 = sbr.rel (%p202_p3) target bundleno = 340 (0x154), region = 36 }
   0xc   : > { %v310_v0 = vld [vmem:[%s1001_s1 + $0xf8] sm:$0xff]  ;;  %v309_v2 = vld [vmem:[%s1001_s1 + $0xf0] sm:$0xff]  ;;  %v308_v4 = vld [vmem:[%s1001_s1 + $0xe8] sm:$0xff]  ;;  %s1010_s15 = smov (!%p240_p4, %s796_s15), 1 }
   0xd   : > { %v294_v1 = vld [vmem:[%s1001_s1 + $0x78] sm:$0xff]  ;;  %668 = vmatprep.subr.mxu0 %v310_v0  ;;  %v293_v3 = vld [vmem:[%s1001_s1 + $0x70] sm:$0xff]  ;;  %724 = vmatprep.subr.mxu1 %v310_v0  ;;  %v292_v5 = vld [vmem:[%s1001_s1 + $0x68] sm:$0xff]  ;;  %s666_s13 = sshll.u32 %s1010_s15, 7  ;;  %s667_s25 = sshll.u32 %s1010_s15, 6 }
   0xe   : > { %669 = vmatpush3.msra.mxu0 %v294_v1  ;;  %740 = vmatpush3.msra.mxu1 %v294_v1  ;;  %v307_v6 = vld [vmem:[%s1001_s1 + $0xe0] sm:$0xff]  ;;  %v306_v8 = vld [vmem:[%s1001_s1 + $0xd8] sm:$0xff]  ;;  %v305_v10 = vld [vmem:[%s1001_s1 + $0xd0] sm:$0xff]  ;;  %s931_s26 = scalar_lea.vmem %s1000_s0, %s666_s13  ;;  %s262_s28 = scalar_lea.vmem %s1004_s4, %s667_s25 }
   0xf   : > { %670 = vmatprep.subr.mxu0 %v309_v2  ;;  %725 = vmatprep.subr.mxu1 %v309_v2  ;;  %v291_v7 = vld [vmem:[%s1001_s1 + $0x60] sm:$0xff]  ;;  %v290_v9 = vld [vmem:[%s1001_s1 + $0x58] sm:$0xff]  ;;  %v289_v11 = vld [vmem:[%s1001_s1 + $0x50] sm:$0xff] }
  0x10   : > { %671 = vmatpush3.msra.mxu0 %v293_v3  ;;  %741 = vmatpush3.msra.mxu1 %v293_v3  ;;  %v304_v12 = vld [vmem:[%s1001_s1 + $0xc8] sm:$0xff]  ;;  %v303_v14 = vld [vmem:[%s1001_s1 + $0xc0] sm:$0xff]  ;;  %v302_v16 = vld [vmem:[%s1001_s1 + $0xb8] sm:$0xff] }
  0x11   : > { %672 = vmatprep.subr.mxu0 %v308_v4  ;;  %726 = vmatprep.subr.mxu1 %v308_v4  ;;  %v288_v13 = vld [vmem:[%s1001_s1 + $0x48] sm:$0xff]  ;;  %v287_v15 = vld [vmem:[%s1001_s1 + $0x40] sm:$0xff]  ;;  %v286_v17 = vld [vmem:[%s1001_s1 + $0x38] sm:$0xff] }
  0x12   : > { %673 = vmatpush3.msra.mxu0 %v292_v5  ;;  %742 = vmatpush3.msra.mxu1 %v292_v5  ;;  %v301_v18 = vld [vmem:[%s1001_s1 + $0xb0] sm:$0xff]  ;;  %v300_v20 = vld [vmem:[%s1001_s1 + $0xa8] sm:$0xff]  ;;  %v299_v22 = vld [vmem:[%s1001_s1 + $0xa0] sm:$0xff] }
  0x13   : > { %674 = vmatprep.subr.mxu0 %v307_v6  ;;  %727 = vmatprep.subr.mxu1 %v307_v6  ;;  %v285_v19 = vld [vmem:[%s1001_s1 + $0x30] sm:$0xff]  ;;  %v284_v21 = vld [vmem:[%s1001_s1 + $0x28] sm:$0xff]  ;;  %v283_v23 = vld [vmem:[%s1001_s1 + $0x20] sm:$0xff] }
  0x14   : > { %675 = vmatpush3.msra.mxu0 %v291_v7  ;;  %743 = vmatpush3.msra.mxu1 %v291_v7  ;;  %v298_v24 = vld [vmem:[%s1001_s1 + $0x98] sm:$0xff]  ;;  %v297_v26 = vld [vmem:[%s1001_s1 + $0x90] sm:$0xff]  ;;  %v264_v27 = vld [vmem:[%s931_s26 + $0x8] sm:$0xff] }
  0x15   : > { %676 = vmatprep.subr.mxu0 %v306_v8  ;;  %728 = vmatprep.subr.mxu1 %v306_v8  ;;  %v282_v25 = vld [vmem:[%s1001_s1 + $0x18] sm:$0xff]  ;;  %v281_v28 = vld [vmem:[%s1001_s1 + $0x10] sm:$0xff]  ;;  %v296_v29 = vld [vmem:[%s1001_s1 + $0x88] sm:$0xff] }
  0x16   : > { %677 = vmatpush3.msra.mxu0 %v290_v9  ;;  %744 = vmatpush3.msra.mxu1 %v290_v9  ;;  %v280_v30 = vld [vmem:[%s1001_s1 + $0x8] sm:$0xff]  ;;  %v295_v31 = vld [vmem:[%s1001_s1 + $0x80] sm:$0xff]  ;;  %v266_v34 = vld [vmem:[%s931_s26 + $0x18] sm:$0xff] }
  0x17   : > { %678 = vmatprep.subr.mxu0 %v305_v10  ;;  %729 = vmatprep.subr.mxu1 %v305_v10  ;;  %v279_v32 = vld [vmem:[%s1001_s1] sm:$0xff]  ;;  %v272_v35 = vld [vmem:[%s931_s26 + $0x48] sm:$0xff]  ;;  %v274_v37 = vld [vmem:[%s931_s26 + $0x58] sm:$0xff] }
  0x18   : > { %679 = vmatpush3.msra.mxu0 %v289_v11  ;;  %745 = vmatpush3.msra.mxu1 %v289_v11  ;;  %v263_v33 = vld [vmem:[%s931_s26] sm:$0xff]  ;;  %v265_v38 = vld [vmem:[%s931_s26 + $0x10] sm:$0xff]  ;;  %v268_v39 = vld [vmem:[%s931_s26 + $0x28] sm:$0xff] }
  0x19   : > { %680 = vmatprep.subr.mxu0 %v304_v12  ;;  %730 = vmatprep.subr.mxu1 %v304_v12  ;;  %v271_v36 = vld [vmem:[%s931_s26 + $0x40] sm:$0xff]  ;;  %v273_v40 = vld [vmem:[%s931_s26 + $0x50] sm:$0xff]  ;;  %v276_v41 = vld [vmem:[%s931_s26 + $0x68] sm:$0xff] }
  0x1a   : > { %681 = vmatpush3.msra.mxu0 %v288_v13  ;;  %746 = vmatpush3.msra.mxu1 %v288_v13  ;;  %v267_v42 = vld [vmem:[%s931_s26 + $0x20] sm:$0xff]  ;;  %v270_v43 = vld [vmem:[%s931_s26 + $0x38] sm:$0xff]  ;;  %v269_v46 = vld [vmem:[%s931_s26 + $0x30] sm:$0xff] }
  0x1b   : > { %682 = vmatprep.subr.mxu0 %v303_v14  ;;  %731 = vmatprep.subr.mxu1 %v303_v14  ;;  %v275_v44 = vld [vmem:[%s931_s26 + $0x60] sm:$0xff]  ;;  %v278_v45 = vld [vmem:[%s931_s26 + $0x78] sm:$0xff]  ;;  %v277_v47 = vld [vmem:[%s931_s26 + $0x70] sm:$0xff] }
  0x1c   : > { %683 = vmatpush3.msra.mxu0 %v287_v15  ;;  %747 = vmatpush3.msra.mxu1 %v287_v15 }
  0x1d   : > { %684 = vmatprep.subr.mxu0 %v302_v16  ;;  %732 = vmatprep.subr.mxu1 %v302_v16 }
  0x1e   : > { %685 = vmatpush3.msra.mxu0 %v286_v17  ;;  %748 = vmatpush3.msra.mxu1 %v286_v17 }
  0x1f   : > { %686 = vmatprep.subr.mxu0 %v301_v18  ;;  %733 = vmatprep.subr.mxu1 %v301_v18 }
  0x20   : > { %687 = vmatpush3.msra.mxu0 %v285_v19  ;;  %749 = vmatpush3.msra.mxu1 %v285_v19 }
  0x21   : > { %688 = vmatprep.subr.mxu0 %v300_v20  ;;  %734 = vmatprep.subr.mxu1 %v300_v20 }
  0x22   : > { %689 = vmatpush3.msra.mxu0 %v284_v21  ;;  %750 = vmatpush3.msra.mxu1 %v284_v21 }
  0x23   : > { %690 = vmatprep.subr.mxu0 %v299_v22  ;;  %735 = vmatprep.subr.mxu1 %v299_v22 }
  0x24   : > { %691 = vmatpush3.msra.mxu0 %v283_v23  ;;  %751 = vmatpush3.msra.mxu1 %v283_v23 }
  0x25   : > { %692 = vmatprep.subr.mxu0 %v298_v24  ;;  %736 = vmatprep.subr.mxu1 %v298_v24 }
  0x26   : > { %693 = vmatpush3.msra.mxu0 %v282_v25  ;;  %752 = vmatpush3.msra.mxu1 %v282_v25 }
  0x27   : > { %694 = vmatprep.subr.mxu0 %v297_v26  ;;  %375 = vmatprep.mubr.f32.mxu0 %v264_v27 }
  0x28   : > { %695 = vmatpush3.msra.mxu0 %v281_v28  ;;  %737 = vmatprep.subr.mxu1 %v297_v26 }
  0x29   : > { %696 = vmatprep.subr.mxu0 %v296_v29  ;;  %753 = vmatpush3.msra.mxu1 %v281_v28 }
  0x2a   : > { %697 = vmatpush3.msra.mxu0 %v280_v30  ;;  %738 = vmatprep.subr.mxu1 %v296_v29 }
  0x2b   : > { %698 = vmatprep.subr.mxu0 %v295_v31  ;;  %754 = vmatpush3.msra.mxu1 %v280_v30 }
  0x2c   : > { %699 = vmatpush3.msra.mxu0 %v279_v32  ;;  %739 = vmatprep.subr.mxu1 %v295_v31 }
  0x2d   : > { %376 = vmatmul.mubr.f32.vlgmr.msra.gmra.mxu0 %v263_v33  ;;  %755 = vmatpush3.msra.mxu1 %v279_v32 }
  0x2e   : > { %380 = vmatprep.mubr.f32.mxu0 %v266_v34  ;;  %395 = vmatprep.mubr.f32.mxu1 %v272_v35 }
  0x2f   : > { %396 = vmatmul.mubr.f32.vlgmr.msra.gmra.mxu1 %v271_v36 }
  0x30   : > { %400 = vmatprep.mubr.f32.mxu1 %v274_v37 }
  0x31   : > { %381 = vmatmul.mubr.f32.gmra.mxu0 %v265_v38 }
  0x32   : > { %385 = vmatprep.mubr.f32.mxu0 %v268_v39 }
  0x33   : > { %401 = vmatmul.mubr.f32.gmra.mxu1 %v273_v40 }
  0x34   : > { %405 = vmatprep.mubr.f32.mxu1 %v276_v41 }
  0x35   : > { %386 = vmatmul.mubr.f32.gmra.mxu0 %v267_v42 }
  0x36   : > { %390 = vmatprep.mubr.f32.mxu0 %v270_v43 }
  0x37   : > { %406 = vmatmul.mubr.f32.gmra.mxu1 %v275_v44 }
  0x38   : > { %410 = vmatprep.mubr.f32.mxu1 %v278_v45 }
  0x39   : > { %391 = vmatmul.mubr.f32.gmra.mxu0 %v269_v46 }
  0x3b   : > { %411 = vmatmul.mubr.f32.gmra.mxu1 %v277_v47 }
  0xed   : > { %v700_v48 = vpop.f32.mrf.mxu0 }
  0xef   : > { %v701_v49 = vpop.f32.mrf.mxu0  ;;  %v712_v50 = vpop.f32.mrf.mxu1 }
  0xf0   : > { %v702_v60 = vadd.f32 %v701_v49, %v700_v48 }
  0xf1   : > { %v703_v51 = vpop.f32.mrf.mxu0  ;;  %v713_v52 = vpop.f32.mrf.mxu1 }
  0xf2   : > { %v714_v5 = vadd.f32 %v713_v52, %v712_v50 }
  0xf3   : > { %v704_v53 = vpop.f32.mrf.mxu0  ;;  %v715_v54 = vpop.f32.mrf.mxu1 }
  0xf4   : > { %v705_v57 = vadd.f32 %v704_v53, %v703_v51  ;;  %v662_v53 = vld [vmem:[%s1002_s2] ss:$0 sm:$0xff] }
  0xf5   : > { %v706_v55 = vpop.f32.mrf.mxu0  ;;  %v716_v56 = vpop.f32.mrf.mxu1 }
  0xf6   : > { %v416_v0 = vadd.f32 %v705_v57, %v702_v60  ;;  %v717_v7 = vadd.f32 %v716_v56, %v715_v54 }
  0xf7   : > { %v707_v58 = vpop.f32.mrf.mxu0  ;;  %v718_v59 = vpop.f32.mrf.mxu1 }
  0xf8   : > { %v708_v61 = vadd.f32 %v707_v58, %v706_v55 }
  0xf9   : > { %v709_v62 = vpop.f32.mrf.mxu0  ;;  %v719_v63 = vpop.f32.mrf.mxu1 }
  0xfa   : > { %v417_v2 = vadd.f32 %v708_v61, %v416_v0  ;;  %v720_v10 = vadd.f32 %v719_v63, %v718_v59  ;;  %v663_v63 = vld [vmem:[%s1003_s3] ss:$0 sm:$0xff] }
  0xfb   : > { %v710_v1 = vpop.f32.mrf.mxu0  ;;  %v721_v4 = vpop.f32.mrf.mxu1 }
  0xfc   : > { %v711_v3 = vadd.f32 %v710_v1, %v709_v62 }
  0xfd   : > { %v722_v9 = vpop.f32.mrf.mxu1 }
  0xfe   : > { %v418_v6 = vadd.f32 %v711_v3, %v417_v2  ;;  %v723_v13 = vadd.f32 %v722_v9, %v721_v4 }
 0x100   : > { %v419_v8 = vadd.f32 %v714_v5, %v418_v6 }
 0x102   : > { %v420_v11 = vadd.f32 %v717_v7, %v419_v8 }
 0x104   : > { %v421_v12 = vadd.f32 %v720_v10, %v420_v11 }
 0x106   : > { %v422_v14 = vadd.f32 %v723_v13, %v421_v12 }
 0x108   : > { %v423_v15 = vrot.slane %v422_v14, 4 }
 0x10a   : > { %v424_v16 = vadd.f32 %v423_v15, %v422_v14 }
 0x10c   : > { %v425_v17 = vrot.slane %v424_v16, 2 }
 0x10e   : > { %v426_v18 = vadd.f32 %v425_v17, %v424_v16 }
 0x110   : > { %v427_v19 = vrot.slane %v426_v18, 1 }
 0x112   : > { %v428_v20 = vadd.f32 %v427_v19, %v426_v18 }
 0x114   : > { %v430_v21 = vmul.f32 0.015625, %v428_v20 }
 0x116   : > { %v431_v22 = vsub.f32 %v702_v60, %v430_v21  ;;  %v432_v23 = vsub.f32 %v705_v57, %v430_v21  ;;  %v433_v24 = vsub.f32 %v708_v61, %v430_v21  ;;  %v434_v25 = vsub.f32 %v711_v3, %v430_v21 }
 0x117   : > { %v435_v28 = vsub.f32 %v714_v5, %v430_v21  ;;  %v436_v31 = vsub.f32 %v717_v7, %v430_v21  ;;  %v437_v34 = vsub.f32 %v720_v10, %v430_v21  ;;  %v438_v37 = vsub.f32 %v723_v13, %v430_v21 }
 0x118   : > { %v439_v26 = vmul.f32 %v431_v22, %v431_v22  ;;  %v440_v27 = vmul.f32 %v432_v23, %v432_v23  ;;  %v441_v29 = vmul.f32 %v433_v24, %v433_v24  ;;  %v442_v32 = vmul.f32 %v434_v25, %v434_v25 }
 0x119   : > { %v443_v35 = vmul.f32 %v435_v28, %v435_v28  ;;  %v444_v38 = vmul.f32 %v436_v31, %v436_v31  ;;  %v445_v40 = vmul.f32 %v437_v34, %v437_v34  ;;  %v446_v42 = vmul.f32 %v438_v37, %v438_v37 }
 0x11a   : > { %v447_v30 = vadd.f32 %v440_v27, %v439_v26  ;;  %v468_v54 = vmul.f32 %v662_v53, %v431_v22  ;;  %v469_v55 = vmul.f32 %v662_v53, %v432_v23  ;;  %v470_v56 = vmul.f32 %v662_v53, %v433_v24 }
 0x11b   : > { %v471_v57 = vmul.f32 %v662_v53, %v434_v25  ;;  %v472_v59 = vmul.f32 %v662_v53, %v435_v28  ;;  %v473_v60 = vmul.f32 %v662_v53, %v436_v31  ;;  %v474_v61 = vmul.f32 %v662_v53, %v437_v34 }
 0x11c   : > { %v448_v33 = vadd.f32 %v447_v30, %v441_v29  ;;  %v475_v62 = vmul.f32 %v662_v53, %v438_v37 }
 0x11e   : > { %v449_v36 = vadd.f32 %v448_v33, %v442_v32 }
 0x120   : > { %v450_v39 = vadd.f32 %v449_v36, %v443_v35 }
 0x122   : > { %v451_v41 = vadd.f32 %v450_v39, %v444_v38 }
 0x124   : > { %v452_v43 = vadd.f32 %v451_v41, %v445_v40 }
 0x126   : > { %v453_v44 = vadd.f32 %v452_v43, %v446_v42 }
 0x128   : > { %v454_v45 = vrot.slane %v453_v44, 4 }
 0x12a   : > { %v455_v46 = vadd.f32 %v454_v45, %v453_v44 }
 0x12c   : > { %v456_v47 = vrot.slane %v455_v46, 2 }
 0x12e   : > { %v457_v48 = vadd.f32 %v456_v47, %v455_v46 }
 0x130   : > { %v458_v49 = vrot.slane %v457_v48, 1 }
 0x132   : > { %v459_v50 = vadd.f32 %v458_v49, %v457_v48 }
 0x134   : > { %v460_v51 = vmul.f32 0.015625, %v459_v50 }
 0x136   : > { %v476_v52 = vadd.f32 1e-05, %v460_v51 }
 0x138   : > { %780 = vrsqrt.f32 %v476_v52 }
 0x145   : > { %v781_v58 = vpop.eup %780 }
 0x146   : > { %v478_v0 = vmul.f32 %v781_v58, %v468_v54  ;;  %v479_v1 = vmul.f32 %v781_v58, %v469_v55  ;;  %v480_v2 = vmul.f32 %v781_v58, %v470_v56  ;;  %v481_v3 = vmul.f32 %v781_v58, %v471_v57 }
 0x147   : > { %v482_v4 = vmul.f32 %v781_v58, %v472_v59  ;;  %v483_v5 = vmul.f32 %v781_v58, %v473_v60  ;;  %v484_v6 = vmul.f32 %v781_v58, %v474_v61  ;;  %v485_v7 = vmul.f32 %v781_v58, %v475_v62 }
 0x148   : > { %v493_v8 = vadd.f32 %v663_v63, %v478_v0  ;;  %v494_v9 = vadd.f32 %v663_v63, %v479_v1  ;;  %v495_v10 = vadd.f32 %v663_v63, %v480_v2  ;;  %v496_v11 = vadd.f32 %v663_v63, %v481_v3 }
 0x149   : > { %v497_v12 = vadd.f32 %v663_v63, %v482_v4  ;;  %v498_v13 = vadd.f32 %v663_v63, %v483_v5  ;;  %v499_v14 = vadd.f32 %v663_v63, %v484_v6  ;;  %v500_v15 = vadd.f32 %v663_v63, %v485_v7 }
 0x14a   : > { %vm501_vm0 = vcmp.ge.f32.partialorder %v493_v8, 0.0  ;;  %vm502_vm1 = vcmp.ge.f32.partialorder %v494_v9, 0.0  ;;  %vm503_vm2 = vcmp.ge.f32.partialorder %v495_v10, 0.0  ;;  %vm504_vm3 = vcmp.ge.f32.partialorder %v496_v11, 0.0 }
 0x14b   : > { %vm505_vm4 = vcmp.ge.f32.partialorder %v497_v12, 0.0  ;;  %vm506_vm5 = vcmp.ge.f32.partialorder %v498_v13, 0.0  ;;  %vm507_vm6 = vcmp.ge.f32.partialorder %v499_v14, 0.0  ;;  %vm508_vm7 = vcmp.ge.f32.partialorder %v500_v15, 0.0 }
 0x14c   : > { %v509_v16 = vmul.f32 0.2, %v493_v8  ;;  %v510_v17 = vmul.f32 0.2, %v494_v9  ;;  %v511_v18 = vmul.f32 0.2, %v495_v10 }
 0x14d   : > { %v512_v19 = vmul.f32 0.2, %v496_v11  ;;  %v513_v20 = vmul.f32 0.2, %v497_v12  ;;  %v514_v21 = vmul.f32 0.2, %v498_v13 }
 0x14e   : > { %v515_v22 = vmul.f32 0.2, %v499_v14  ;;  %v516_v23 = vmul.f32 0.2, %v500_v15  ;;  %v517_v24 = vsel %vm501_vm0, %v493_v8, %v509_v16  ;;  %v518_v25 = vsel %vm502_vm1, %v494_v9, %v510_v17 }
 0x14f   : > { %v519_v26 = vsel %vm503_vm2, %v495_v10, %v511_v18  ;;  %v520_v27 = vsel %vm504_vm3, %v496_v11, %v512_v19  ;;  %v521_v28 = vsel %vm505_vm4, %v497_v12, %v513_v20  ;;  %v522_v29 = vsel %vm506_vm5, %v498_v13, %v514_v21  ;;  %525 = vst [vmem:[%s262_s28] sm:$0xff] %v517_v24 }
 0x150   : > { %526 = vst [vmem:[%s262_s28 + $0x8] sm:$0xff] %v518_v25  ;;  %v523_v30 = vsel %vm507_vm6, %v499_v14, %v515_v22  ;;  %v524_v31 = vsel %vm508_vm7, %v500_v15, %v516_v23  ;;  %527 = vst [vmem:[%s262_s28 + $0x10] sm:$0xff] %v519_v26 }
 0x151   : > { %528 = vst [vmem:[%s262_s28 + $0x18] sm:$0xff] %v520_v27  ;;  %529 = vst [vmem:[%s262_s28 + $0x20] sm:$0xff] %v521_v28 }
 0x152   : > { %530 = vst [vmem:[%s262_s28 + $0x28] sm:$0xff] %v522_v29  ;;  %531 = vst [vmem:[%s262_s28 + $0x30] sm:$0xff] %v523_v30 }
 0x153   : > { %532 = vst [vmem:[%s262_s28 + $0x38] sm:$0xff] %v524_v31 }
 0x154 PF: > { %s14_s17 = sadd.s32 1, %s804_s17   ;;  %s1005_s15 = smov %s800_s16 }
 0x155   : > { %p11_p5 = scmp.ge.s32.totalorder %s14_s17, 4   ;;  %s1006_s16 = smov %s1008_s18 }
 0x157   :  { %13 = sbr.rel (!%p11_p5) target bundleno = 2 (0x2), region = 75 }

// kernel: discriminator_forward.8
= control target key start
LH: loop header
LB: loop body
LE: loop exit
PB: predicated region body
PF: predicated region fallthrough
CT: control target
= control target key end

     0   :  { %s822_s15 = smov 0   ;;  %s824_s16 = smov 0   ;;  %s1073_s0 = inlined_call_operand.vmem [shape: f32[2,16,512], index: 0, kind: input, shape index: {}]   ;;  %s1074_s1 = inlined_call_operand.vmem [shape: f32[512,128], index: 1, kind: input, shape index: {}]   ;;  %s1075_s2 = inlined_call_operand.vmem [shape: f32[1,128], index: 2, kind: input, shape index: {}]   ;;  %s1076_s3 = inlined_call_operand.vmem [shape: f32[1,128], index: 3, kind: input, shape index: {}]   ;;  %s1077_s4 = inlined_call_operand.vmem [shape: f32[2,16,128], index: 4, kind: output, shape index: {}]  }
   0x1   :  { %s826_s17 = smov 0  }
   0x2 LB: > { %s26_s18 = sadd.s32 1, %s791_s16  ;;  %p660_p0 = scmp.ge.s32.totalorder %s795_s17, 1  ;;  %s795_s17 = sphi %s826_s17, %s14_s17   ;;  %s791_s16 = sphi %s824_s16, %s1079_s16   ;;  %s787_s15 = sphi %s822_s15, %s1078_s15  }
   0x3   : > { %p28_p1 = scmp.ge.s32.totalorder %s26_s18, 2  ;;  %p201_p2 = scmp.lt.s32.totalorder %s795_s17, 3 }
   0x5   : > { %s1081_s18 = smov (%p28_p1, %s26_s18), 0  ;;  %p202_p3 = pnand %p660_p0, %p201_p2 }
   0x6   : > { %p240_p4 = scmp.lt.s32.totalorder (!%p202_p3), %s787_s15, 1 }
   0x7   : > { %205 = sbr.rel (%p202_p3) target bundleno = 311 (0x137), region = 36 }
   0xc   : > { %v302_v0 = vld [vmem:[%s1074_s1 + $0xf8] sm:$0xff]  ;;  %v301_v4 = vld [vmem:[%s1074_s1 + $0xf0] sm:$0xff]  ;;  %v300_v8 = vld [vmem:[%s1074_s1 + $0xe8] sm:$0xff]  ;;  %s1083_s15 = smov (!%p240_p4, %s787_s15), 1 }
   0xd   : > { %v334_v1 = vld [vmem:[%s1074_s1 + $0x1f8] sm:$0xff]  ;;  %671 = vmatprep.subr.mxu0 %v302_v0  ;;  %v333_v5 = vld [vmem:[%s1074_s1 + $0x1f0] sm:$0xff]  ;;  %v332_v9 = vld [vmem:[%s1074_s1 + $0x1e8] sm:$0xff]  ;;  %s669_s9 = sshll.u32 %s1083_s15, 6  ;;  %s670_s23 = sshll.u32 %s1083_s15, 4 }
   0xe   : > { %v286_v2 = vld [vmem:[%s1074_s1 + $0x78] sm:$0xff]  ;;  %709 = vmatprep.subr.mxu1 %v334_v1  ;;  %v285_v6 = vld [vmem:[%s1074_s1 + $0x70] sm:$0xff]  ;;  %v284_v10 = vld [vmem:[%s1074_s1 + $0x68] sm:$0xff]  ;;  %s1026_s28 = scalar_lea.vmem %s1073_s0, %s669_s9  ;;  %s262_s26 = scalar_lea.vmem %s1077_s4, %s670_s23 }
   0xf   : > { %v318_v3 = vld [vmem:[%s1074_s1 + $0x178] sm:$0xff]  ;;  %672 = vmatpush3.msra.mxu0 %v286_v2  ;;  %v317_v7 = vld [vmem:[%s1074_s1 + $0x170] sm:$0xff]  ;;  %v316_v11 = vld [vmem:[%s1074_s1 + $0x168] sm:$0xff] }
  0x10   : > { %710 = vmatpush3.msra.mxu1 %v318_v3  ;;  %673 = vmatprep.subr.mxu0 %v301_v4  ;;  %v299_v12 = vld [vmem:[%s1074_s1 + $0xe0] sm:$0xff]  ;;  %v298_v16 = vld [vmem:[%s1074_s1 + $0xd8] sm:$0xff]  ;;  %v297_v20 = vld [vmem:[%s1074_s1 + $0xd0] sm:$0xff] }
  0x11   : > { %711 = vmatprep.subr.mxu1 %v333_v5  ;;  %674 = vmatpush3.msra.mxu0 %v285_v6  ;;  %v331_v13 = vld [vmem:[%s1074_s1 + $0x1e0] sm:$0xff]  ;;  %v330_v17 = vld [vmem:[%s1074_s1 + $0x1d8] sm:$0xff]  ;;  %v329_v21 = vld [vmem:[%s1074_s1 + $0x1d0] sm:$0xff] }
  0x12   : > { %712 = vmatpush3.msra.mxu1 %v317_v7  ;;  %675 = vmatprep.subr.mxu0 %v300_v8  ;;  %v283_v14 = vld [vmem:[%s1074_s1 + $0x60] sm:$0xff]  ;;  %v282_v18 = vld [vmem:[%s1074_s1 + $0x58] sm:$0xff]  ;;  %v281_v22 = vld [vmem:[%s1074_s1 + $0x50] sm:$0xff] }
  0x13   : > { %713 = vmatprep.subr.mxu1 %v332_v9  ;;  %v315_v15 = vld [vmem:[%s1074_s1 + $0x160] sm:$0xff]  ;;  %676 = vmatpush3.msra.mxu0 %v284_v10  ;;  %v314_v19 = vld [vmem:[%s1074_s1 + $0x158] sm:$0xff]  ;;  %v313_v23 = vld [vmem:[%s1074_s1 + $0x150] sm:$0xff] }
  0x14   : > { %714 = vmatpush3.msra.mxu1 %v316_v11  ;;  %677 = vmatprep.subr.mxu0 %v299_v12  ;;  %v296_v24 = vld [vmem:[%s1074_s1 + $0xc8] sm:$0xff]  ;;  %v295_v28 = vld [vmem:[%s1074_s1 + $0xc0] sm:$0xff]  ;;  %v294_v32 = vld [vmem:[%s1074_s1 + $0xb8] sm:$0xff] }
  0x15   : > { %715 = vmatprep.subr.mxu1 %v331_v13  ;;  %678 = vmatpush3.msra.mxu0 %v283_v14  ;;  %v328_v25 = vld [vmem:[%s1074_s1 + $0x1c8] sm:$0xff]  ;;  %v327_v29 = vld [vmem:[%s1074_s1 + $0x1c0] sm:$0xff]  ;;  %v326_v33 = vld [vmem:[%s1074_s1 + $0x1b8] sm:$0xff] }
  0x16   : > { %716 = vmatpush3.msra.mxu1 %v315_v15  ;;  %679 = vmatprep.subr.mxu0 %v298_v16  ;;  %v280_v26 = vld [vmem:[%s1074_s1 + $0x48] sm:$0xff]  ;;  %v279_v30 = vld [vmem:[%s1074_s1 + $0x40] sm:$0xff]  ;;  %v278_v34 = vld [vmem:[%s1074_s1 + $0x38] sm:$0xff] }
  0x17   : > { %717 = vmatprep.subr.mxu1 %v330_v17  ;;  %680 = vmatpush3.msra.mxu0 %v282_v18  ;;  %v312_v27 = vld [vmem:[%s1074_s1 + $0x148] sm:$0xff]  ;;  %v311_v31 = vld [vmem:[%s1074_s1 + $0x140] sm:$0xff]  ;;  %v310_v35 = vld [vmem:[%s1074_s1 + $0x138] sm:$0xff] }
  0x18   : > { %718 = vmatpush3.msra.mxu1 %v314_v19  ;;  %681 = vmatprep.subr.mxu0 %v297_v20  ;;  %v293_v36 = vld [vmem:[%s1074_s1 + $0xb0] sm:$0xff]  ;;  %v292_v40 = vld [vmem:[%s1074_s1 + $0xa8] sm:$0xff]  ;;  %v291_v44 = vld [vmem:[%s1074_s1 + $0xa0] sm:$0xff] }
  0x19   : > { %719 = vmatprep.subr.mxu1 %v329_v21  ;;  %682 = vmatpush3.msra.mxu0 %v281_v22  ;;  %v325_v37 = vld [vmem:[%s1074_s1 + $0x1b0] sm:$0xff]  ;;  %v324_v41 = vld [vmem:[%s1074_s1 + $0x1a8] sm:$0xff]  ;;  %v323_v45 = vld [vmem:[%s1074_s1 + $0x1a0] sm:$0xff] }
  0x1a   : > { %720 = vmatpush3.msra.mxu1 %v313_v23  ;;  %683 = vmatprep.subr.mxu0 %v296_v24  ;;  %v277_v38 = vld [vmem:[%s1074_s1 + $0x30] sm:$0xff]  ;;  %v276_v42 = vld [vmem:[%s1074_s1 + $0x28] sm:$0xff]  ;;  %v275_v46 = vld [vmem:[%s1074_s1 + $0x20] sm:$0xff] }
  0x1b   : > { %721 = vmatprep.subr.mxu1 %v328_v25  ;;  %684 = vmatpush3.msra.mxu0 %v280_v26  ;;  %v309_v39 = vld [vmem:[%s1074_s1 + $0x130] sm:$0xff]  ;;  %v308_v43 = vld [vmem:[%s1074_s1 + $0x128] sm:$0xff]  ;;  %v307_v47 = vld [vmem:[%s1074_s1 + $0x120] sm:$0xff] }
  0x1c   : > { %722 = vmatpush3.msra.mxu1 %v312_v27  ;;  %685 = vmatprep.subr.mxu0 %v295_v28  ;;  %v290_v48 = vld [vmem:[%s1074_s1 + $0x98] sm:$0xff]  ;;  %v289_v52 = vld [vmem:[%s1074_s1 + $0x90] sm:$0xff]  ;;  %v288_v56 = vld [vmem:[%s1074_s1 + $0x88] sm:$0xff] }
  0x1d   : > { %723 = vmatprep.subr.mxu1 %v327_v29  ;;  %686 = vmatpush3.msra.mxu0 %v279_v30  ;;  %v322_v49 = vld [vmem:[%s1074_s1 + $0x198] sm:$0xff]  ;;  %v321_v53 = vld [vmem:[%s1074_s1 + $0x190] sm:$0xff]  ;;  %v320_v57 = vld [vmem:[%s1074_s1 + $0x188] sm:$0xff] }
  0x1e   : > { %724 = vmatpush3.msra.mxu1 %v311_v31  ;;  %687 = vmatprep.subr.mxu0 %v294_v32  ;;  %v274_v50 = vld [vmem:[%s1074_s1 + $0x18] sm:$0xff]  ;;  %v273_v54 = vld [vmem:[%s1074_s1 + $0x10] sm:$0xff]  ;;  %v272_v58 = vld [vmem:[%s1074_s1 + $0x8] sm:$0xff] }
  0x1f   : > { %725 = vmatprep.subr.mxu1 %v326_v33  ;;  %688 = vmatpush3.msra.mxu0 %v278_v34  ;;  %v306_v51 = vld [vmem:[%s1074_s1 + $0x118] sm:$0xff]  ;;  %v305_v55 = vld [vmem:[%s1074_s1 + $0x110] sm:$0xff]  ;;  %v304_v59 = vld [vmem:[%s1074_s1 + $0x108] sm:$0xff] }
  0x20   : > { %726 = vmatpush3.msra.mxu1 %v310_v35  ;;  %689 = vmatprep.subr.mxu0 %v293_v36  ;;  %v287_v60 = vld [vmem:[%s1074_s1 + $0x80] sm:$0xff]  ;;  %v264_v63 = vld [vmem:[%s1026_s28 + $0x8] sm:$0xff]  ;;  %v266_v1 = vld [vmem:[%s1026_s28 + $0x18] sm:$0xff] }
  0x21   : > { %727 = vmatprep.subr.mxu1 %v325_v37  ;;  %690 = vmatpush3.msra.mxu0 %v277_v38  ;;  %v319_v61 = vld [vmem:[%s1074_s1 + $0x180] sm:$0xff]  ;;  %v265_v3 = vld [vmem:[%s1026_s28 + $0x10] sm:$0xff]  ;;  %v268_v4 = vld [vmem:[%s1026_s28 + $0x28] sm:$0xff] }
  0x22   : > { %728 = vmatpush3.msra.mxu1 %v309_v39  ;;  %691 = vmatprep.subr.mxu0 %v292_v40  ;;  %v271_v62 = vld [vmem:[%s1074_s1] sm:$0xff]  ;;  %v270_v5 = vld [vmem:[%s1026_s28 + $0x38] sm:$0xff]  ;;  %v269_v7 = vld [vmem:[%s1026_s28 + $0x30] sm:$0xff] }
  0x23   : > { %729 = vmatprep.subr.mxu1 %v324_v41  ;;  %692 = vmatpush3.msra.mxu0 %v276_v42  ;;  %v303_v0 = vld [vmem:[%s1074_s1 + $0x100] sm:$0xff] }
  0x24   : > { %730 = vmatpush3.msra.mxu1 %v308_v43  ;;  %693 = vmatprep.subr.mxu0 %v291_v44  ;;  %v263_v2 = vld [vmem:[%s1026_s28] sm:$0xff] }
  0x25   : > { %731 = vmatprep.subr.mxu1 %v323_v45  ;;  %694 = vmatpush3.msra.mxu0 %v275_v46  ;;  %v267_v6 = vld [vmem:[%s1026_s28 + $0x20] sm:$0xff] }
  0x26   : > { %732 = vmatpush3.msra.mxu1 %v307_v47  ;;  %695 = vmatprep.subr.mxu0 %v290_v48  ;;  %v665_v43 = vld [vmem:[%s1075_s2] ss:$0 sm:$0xff] }
  0x27   : > { %733 = vmatprep.subr.mxu1 %v322_v49  ;;  %696 = vmatpush3.msra.mxu0 %v274_v50  ;;  %v666_v47 = vld [vmem:[%s1076_s3] ss:$0 sm:$0xff] }
  0x28   : > { %734 = vmatpush3.msra.mxu1 %v306_v51  ;;  %697 = vmatprep.subr.mxu0 %v289_v52 }
  0x29   : > { %735 = vmatprep.subr.mxu1 %v321_v53  ;;  %698 = vmatpush3.msra.mxu0 %v273_v54 }
  0x2a   : > { %736 = vmatpush3.msra.mxu1 %v305_v55  ;;  %699 = vmatprep.subr.mxu0 %v288_v56 }
  0x2b   : > { %737 = vmatprep.subr.mxu1 %v320_v57  ;;  %700 = vmatpush3.msra.mxu0 %v272_v58 }
  0x2c   : > { %738 = vmatpush3.msra.mxu1 %v304_v59  ;;  %701 = vmatprep.subr.mxu0 %v287_v60 }
  0x2d   : > { %739 = vmatprep.subr.mxu1 %v319_v61  ;;  %702 = vmatpush3.msra.mxu0 %v271_v62 }
  0x2e   : > { %399 = vmatprep.mubr.f32.mxu0 %v264_v63  ;;  %740 = vmatpush3.msra.mxu1 %v303_v0 }
  0x2f   : > { %474 = vmatprep.mubr.f32.mxu1 %v266_v1  ;;  %400 = vmatmul.mubr.f32.vlgmr.msra.gmra.mxu0 %v263_v2 }
  0x30   : > { %475 = vmatmul.mubr.f32.vlgmr.msra.gmra.mxu1 %v265_v3  ;;  %404 = vmatprep.mubr.f32.mxu0 %v268_v4 }
  0x31   : > { %479 = vmatprep.mubr.f32.mxu1 %v270_v5 }
  0x33   : > { %405 = vmatmul.mubr.f32.gmra.mxu0 %v267_v6 }
  0x34   : > { %480 = vmatmul.mubr.f32.gmra.mxu1 %v269_v7 }
  0xef   : > { %v703_v8 = vpop.f32.mrf.mxu0 }
  0xf0   : > { %v741_v9 = vpop.f32.mrf.mxu1 }
  0xf1   : > { %v704_v10 = vpop.f32.mrf.mxu0 }
  0xf2   : > { %v742_v11 = vpop.f32.mrf.mxu1  ;;  %v705_v14 = vadd.f32 %v704_v10, %v703_v8 }
  0xf3   : > { %v706_v12 = vpop.f32.mrf.mxu0  ;;  %v743_v15 = vadd.f32 %v742_v11, %v741_v9 }
  0xf4   : > { %v744_v13 = vpop.f32.mrf.mxu1 }
  0xf5   : > { %v707_v16 = vpop.f32.mrf.mxu0  ;;  %v477_v20 = vadd.f32 %v743_v15, %v705_v14 }
  0xf6   : > { %v745_v17 = vpop.f32.mrf.mxu1  ;;  %v708_v18 = vadd.f32 %v707_v16, %v706_v12 }
  0xf7   : > { %v746_v19 = vadd.f32 %v745_v17, %v744_v13 }
  0xf9   : > { %v482_v21 = vadd.f32 %v746_v19, %v708_v18 }
  0xfb   : > { %v485_v22 = vadd.f32 %v482_v21, %v477_v20 }
  0xfd   : > { %v486_v23 = vrot.slane %v485_v22, 4 }
  0xff   : > { %v487_v24 = vadd.f32 %v486_v23, %v485_v22 }
 0x101   : > { %v488_v25 = vrot.slane %v487_v24, 2 }
 0x103   : > { %v489_v26 = vadd.f32 %v488_v25, %v487_v24 }
 0x105   : > { %v490_v27 = vrot.slane %v489_v26, 1 }
 0x107   : > { %v491_v28 = vadd.f32 %v490_v27, %v489_v26 }
 0x109   : > { %v493_v29 = vmul.f32 0.0625, %v491_v28 }
 0x10b   : > { %v494_v30 = vsub.f32 %v477_v20, %v493_v29  ;;  %v495_v31 = vsub.f32 %v482_v21, %v493_v29 }
 0x10d   : > { %v496_v32 = vmul.f32 %v494_v30, %v494_v30  ;;  %v497_v33 = vmul.f32 %v495_v31, %v495_v31  ;;  %v513_v44 = vmul.f32 %v665_v43, %v494_v30  ;;  %v514_v45 = vmul.f32 %v665_v43, %v495_v31 }
 0x10f   : > { %v498_v34 = vadd.f32 %v497_v33, %v496_v32 }
 0x111   : > { %v499_v35 = vrot.slane %v498_v34, 4 }
 0x113   : > { %v500_v36 = vadd.f32 %v499_v35, %v498_v34 }
 0x115   : > { %v501_v37 = vrot.slane %v500_v36, 2 }
 0x117   : > { %v502_v38 = vadd.f32 %v501_v37, %v500_v36 }
 0x119   : > { %v503_v39 = vrot.slane %v502_v38, 1 }
 0x11b   : > { %v504_v40 = vadd.f32 %v503_v39, %v502_v38 }
 0x11d   : > { %v505_v41 = vmul.f32 0.0625, %v504_v40 }
 0x11f   : > { %v515_v42 = vadd.f32 1e-05, %v505_v41 }
 0x121   : > { %771 = vrsqrt.f32 %v515_v42 }
 0x12e   : > { %v772_v46 = vpop.eup %771 }
 0x12f   : > { %v517_v48 = vmul.f32 %v772_v46, %v513_v44  ;;  %v518_v49 = vmul.f32 %v772_v46, %v514_v45 }
 0x131   : > { %v526_v50 = vadd.f32 %v666_v47, %v517_v48  ;;  %v527_v51 = vadd.f32 %v666_v47, %v518_v49 }
 0x133   : > { %vm528_vm0 = vcmp.ge.f32.partialorder %v526_v50, 0.0  ;;  %vm529_vm1 = vcmp.ge.f32.partialorder %v527_v51, 0.0  ;;  %v530_v52 = vmul.f32 0.2, %v526_v50  ;;  %v531_v53 = vmul.f32 0.2, %v527_v51 }
 0x135   : > { %v532_v54 = vsel %vm528_vm0, %v526_v50, %v530_v52  ;;  %v533_v55 = vsel %vm529_vm1, %v527_v51, %v531_v53 }
 0x136   : > { %534 = vst [vmem:[%s262_s26] sm:$0xff] %v532_v54  ;;  %535 = vst [vmem:[%s262_s26 + $0x8] sm:$0xff] %v533_v55 }
 0x137 PF: > { %s14_s17 = sadd.s32 1, %s795_s17   ;;  %s1078_s15 = smov %s791_s16 }
 0x138   : > { %p11_p5 = scmp.ge.s32.totalorder %s14_s17, 4   ;;  %s1079_s16 = smov %s1081_s18 }
 0x13a   :  { %13 = sbr.rel (!%p11_p5) target bundleno = 2 (0x2), region = 75 }

// kernel: discriminator_forward.9
= control target key start
LH: loop header
LB: loop body
LE: loop exit
PB: predicated region body
PF: predicated region fallthrough
CT: control target
= control target key end

     0   :  { %s1037_s15 = smov 0   ;;  %s1039_s16 = smov 0   ;;  %s1487_s0 = inlined_call_operand.vmem [shape: f32[2,1,1024], index: 0, kind: input, shape index: {}]   ;;  %s1488_s1 = inlined_call_operand.vmem [shape: f32[1024,128], index: 1, kind: input, shape index: {}]   ;;  %s1489_s2 = inlined_call_operand.vmem [shape: f32[1,128], index: 2, kind: input, shape index: {}]   ;;  %s1490_s3 = inlined_call_operand.vmem [shape: f32[1,128], index: 3, kind: input, shape index: {}]   ;;  %s1491_s4 = inlined_call_operand.vmem [shape: f32[2,1,128], index: 4, kind: output, shape index: {}]  }
   0x1   :  { %s1041_s17 = smov 0  }
   0x2 LB: > { %s26_s2 = sadd.s32 1, %s1006_s16  ;;  %p820_p0 = scmp.ge.s32.totalorder %s1010_s17, 1  ;;  %s1010_s17 = sphi %s1041_s17, %s14_s17   ;;  %s1006_s16 = sphi %s1039_s16, %s1493_s16   ;;  %s1002_s15 = sphi %s1037_s15, %s1492_s15  }
   0x3   : > { %p28_p1 = scmp.ge.s32.totalorder %s26_s2, 2  ;;  %p200_p2 = scmp.lt.s32.totalorder %s1010_s17, 3 }
   0x5   : > { %s1495_s2 = smov (%p28_p1, %s26_s2), 0  ;;  %p201_p3 = pnand %p820_p0, %p200_p2 }
   0x6   : > { %p236_p4 = scmp.lt.s32.totalorder (!%p201_p3), %s1002_s15, 1 }
   0x7   : > { %204 = sbr.rel (%p201_p3) target bundleno = 283 (0x11b), region = 36 }
   0xc   : > { %v288_v0 = vld [vmem:[%s1488_s1 + $0xf8] sm:$0xff]  ;;  %v287_v4 = vld [vmem:[%s1488_s1 + $0xf0] sm:$0xff]  ;;  %v286_v8 = vld [vmem:[%s1488_s1 + $0xe8] sm:$0xff]  ;;  %s1497_s15 = smov (!%p236_p4, %s1002_s15), 1  ;;  %v387_v38 = vlaneseq }
   0xd   : > { %v320_v1 = vld [vmem:[%s1488_s1 + $0x1f8] sm:$0xff]  ;;  %824 = vmatprep.subr.mxu0 %v288_v0  ;;  %v319_v5 = vld [vmem:[%s1488_s1 + $0x1f0] sm:$0xff]  ;;  %v318_v9 = vld [vmem:[%s1488_s1 + $0x1e8] sm:$0xff]  ;;  %s821_s11 = sshll.u32 %s1497_s15, 3 }
   0xe   : > { %v272_v2 = vld [vmem:[%s1488_s1 + $0x78] sm:$0xff]  ;;  %859 = vmatprep.subr.mxu1 %v320_v1  ;;  %v271_v6 = vld [vmem:[%s1488_s1 + $0x70] sm:$0xff]  ;;  %v270_v10 = vld [vmem:[%s1488_s1 + $0x68] sm:$0xff]  ;;  %v1202_v47 = vshrl.u32 %v387_v38, 7  ;;  %s239_s29 = scalar_lea.vmem %s1487_s0, %s821_s11 }
   0xf   : > { %v304_v3 = vld [vmem:[%s1488_s1 + $0x178] sm:$0xff]  ;;  %825 = vmatpush3.msra.mxu0 %v272_v2  ;;  %v303_v7 = vld [vmem:[%s1488_s1 + $0x170] sm:$0xff]  ;;  %v302_v11 = vld [vmem:[%s1488_s1 + $0x168] sm:$0xff] }
  0x10   : > { %860 = vmatpush3.msra.mxu1 %v304_v3  ;;  %826 = vmatprep.subr.mxu0 %v287_v4  ;;  %v285_v12 = vld [vmem:[%s1488_s1 + $0xe0] sm:$0xff]  ;;  %v284_v16 = vld [vmem:[%s1488_s1 + $0xd8] sm:$0xff]  ;;  %v283_v20 = vld [vmem:[%s1488_s1 + $0xd0] sm:$0xff]  ;;  %v393_v56 = vsub.s32 1, %v1202_v47  ;;  %v389_v60 = vsub.s32 0, %v1202_v47  ;;  %v401_v63 = vsub.s32 3, %v1202_v47 }
  0x11   : > { %861 = vmatprep.subr.mxu1 %v319_v5  ;;  %827 = vmatpush3.msra.mxu0 %v271_v6  ;;  %v317_v13 = vld [vmem:[%s1488_s1 + $0x1e0] sm:$0xff]  ;;  %v316_v17 = vld [vmem:[%s1488_s1 + $0x1d8] sm:$0xff]  ;;  %v315_v21 = vld [vmem:[%s1488_s1 + $0x1d0] sm:$0xff]  ;;  %v397_v2 = vsub.s32 2, %v1202_v47 }
  0x12   : > { %862 = vmatpush3.msra.mxu1 %v303_v7  ;;  %828 = vmatprep.subr.mxu0 %v286_v8  ;;  %v269_v14 = vld [vmem:[%s1488_s1 + $0x60] sm:$0xff]  ;;  %v268_v18 = vld [vmem:[%s1488_s1 + $0x58] sm:$0xff]  ;;  %v267_v22 = vld [vmem:[%s1488_s1 + $0x50] sm:$0xff] }
  0x13   : > { %863 = vmatprep.subr.mxu1 %v318_v9  ;;  %v301_v15 = vld [vmem:[%s1488_s1 + $0x160] sm:$0xff]  ;;  %829 = vmatpush3.msra.mxu0 %v270_v10  ;;  %v300_v19 = vld [vmem:[%s1488_s1 + $0x158] sm:$0xff]  ;;  %v299_v23 = vld [vmem:[%s1488_s1 + $0x150] sm:$0xff] }
  0x14   : > { %864 = vmatpush3.msra.mxu1 %v302_v11  ;;  %830 = vmatprep.subr.mxu0 %v285_v12  ;;  %v282_v24 = vld [vmem:[%s1488_s1 + $0xc8] sm:$0xff]  ;;  %v281_v28 = vld [vmem:[%s1488_s1 + $0xc0] sm:$0xff]  ;;  %v280_v32 = vld [vmem:[%s1488_s1 + $0xb8] sm:$0xff] }
  0x15   : > { %865 = vmatprep.subr.mxu1 %v317_v13  ;;  %831 = vmatpush3.msra.mxu0 %v269_v14  ;;  %v314_v25 = vld [vmem:[%s1488_s1 + $0x1c8] sm:$0xff]  ;;  %v313_v29 = vld [vmem:[%s1488_s1 + $0x1c0] sm:$0xff]  ;;  %v312_v33 = vld [vmem:[%s1488_s1 + $0x1b8] sm:$0xff] }
  0x16   : > { %866 = vmatpush3.msra.mxu1 %v301_v15  ;;  %832 = vmatprep.subr.mxu0 %v284_v16  ;;  %v266_v26 = vld [vmem:[%s1488_s1 + $0x48] sm:$0xff]  ;;  %v265_v30 = vld [vmem:[%s1488_s1 + $0x40] sm:$0xff]  ;;  %v264_v34 = vld [vmem:[%s1488_s1 + $0x38] sm:$0xff] }
  0x17   : > { %867 = vmatprep.subr.mxu1 %v316_v17  ;;  %833 = vmatpush3.msra.mxu0 %v268_v18  ;;  %v298_v27 = vld [vmem:[%s1488_s1 + $0x148] sm:$0xff]  ;;  %v297_v31 = vld [vmem:[%s1488_s1 + $0x140] sm:$0xff]  ;;  %v296_v35 = vld [vmem:[%s1488_s1 + $0x138] sm:$0xff] }
  0x18   : > { %868 = vmatpush3.msra.mxu1 %v300_v19  ;;  %834 = vmatprep.subr.mxu0 %v283_v20  ;;  %v279_v36 = vld [vmem:[%s1488_s1 + $0xb0] sm:$0xff]  ;;  %v278_v41 = vld [vmem:[%s1488_s1 + $0xa8] sm:$0xff]  ;;  %v277_v45 = vld [vmem:[%s1488_s1 + $0xa0] sm:$0xff] }
  0x19   : > { %869 = vmatprep.subr.mxu1 %v315_v21  ;;  %835 = vmatpush3.msra.mxu0 %v267_v22  ;;  %v311_v37 = vld [vmem:[%s1488_s1 + $0x1b0] sm:$0xff]  ;;  %v310_v42 = vld [vmem:[%s1488_s1 + $0x1a8] sm:$0xff]  ;;  %v309_v46 = vld [vmem:[%s1488_s1 + $0x1a0] sm:$0xff] }
  0x1a   : > { %870 = vmatpush3.msra.mxu1 %v299_v23  ;;  %836 = vmatprep.subr.mxu0 %v282_v24  ;;  %v263_v39 = vld [vmem:[%s1488_s1 + $0x30] sm:$0xff]  ;;  %v262_v43 = vld [vmem:[%s1488_s1 + $0x28] sm:$0xff]  ;;  %v261_v48 = vld [vmem:[%s1488_s1 + $0x20] sm:$0xff] }
  0x1b   : > { %871 = vmatprep.subr.mxu1 %v314_v25  ;;  %837 = vmatpush3.msra.mxu0 %v266_v26  ;;  %v295_v40 = vld [vmem:[%s1488_s1 + $0x130] sm:$0xff]  ;;  %v294_v44 = vld [vmem:[%s1488_s1 + $0x128] sm:$0xff]  ;;  %v293_v49 = vld [vmem:[%s1488_s1 + $0x120] sm:$0xff] }
  0x1c   : > { %872 = vmatpush3.msra.mxu1 %v298_v27  ;;  %838 = vmatprep.subr.mxu0 %v281_v28  ;;  %v276_v50 = vld [vmem:[%s1488_s1 + $0x98] sm:$0xff]  ;;  %v275_v54 = vld [vmem:[%s1488_s1 + $0x90] sm:$0xff]  ;;  %v1238_v59 = vld [vmem:[%s239_s29] sm:$0xff]  ;;  %s255_s29 = scalar_lea.vmem %s1491_s4, %s1497_s15 }
  0x1d   : > { %873 = vmatprep.subr.mxu1 %v313_v29  ;;  %839 = vmatpush3.msra.mxu0 %v265_v30  ;;  %v308_v51 = vld [vmem:[%s1488_s1 + $0x198] sm:$0xff]  ;;  %v307_v55 = vld [vmem:[%s1488_s1 + $0x190] sm:$0xff]  ;;  %v274_v61 = vld [vmem:[%s1488_s1 + $0x88] sm:$0xff]  ;;  %v394_v5 = vrot.slane %v1238_v59, %v393_v56  ;;  %v390_v7 = vrot.slane %v1238_v59, %v389_v60  ;;  %v402_v9 = vrot.slane %v1238_v59, %v401_v63 }
  0x1e   : > { %874 = vmatpush3.msra.mxu1 %v297_v31  ;;  %840 = vmatprep.subr.mxu0 %v280_v32  ;;  %v260_v52 = vld [vmem:[%s1488_s1 + $0x18] sm:$0xff]  ;;  %v259_v57 = vld [vmem:[%s1488_s1 + $0x10] sm:$0xff]  ;;  %v306_v62 = vld [vmem:[%s1488_s1 + $0x188] sm:$0xff]  ;;  %v398_v11 = vrot.slane %v1238_v59, %v397_v2 }
  0x1f   : > { %875 = vmatprep.subr.mxu1 %v312_v33  ;;  %841 = vmatpush3.msra.mxu0 %v264_v34  ;;  %v292_v53 = vld [vmem:[%s1488_s1 + $0x118] sm:$0xff]  ;;  %v291_v58 = vld [vmem:[%s1488_s1 + $0x110] sm:$0xff]  ;;  %v258_v0 = vld [vmem:[%s1488_s1 + $0x8] sm:$0xff] }
  0x20   : > { %876 = vmatpush3.msra.mxu1 %v296_v35  ;;  %842 = vmatprep.subr.mxu0 %v279_v36  ;;  %v290_v1 = vld [vmem:[%s1488_s1 + $0x108] sm:$0xff]  ;;  %v273_v3 = vld [vmem:[%s1488_s1 + $0x80] sm:$0xff]  ;;  %v352_v10 = vld [vmem:[%s1488_s1 + $0x2f8] sm:$0xff] }
  0x21   : > { %877 = vmatprep.subr.mxu1 %v311_v37  ;;  %843 = vmatpush3.msra.mxu0 %v263_v39  ;;  %v305_v4 = vld [vmem:[%s1488_s1 + $0x180] sm:$0xff]  ;;  %v384_v12 = vld [vmem:[%s1488_s1 + $0x3f8] sm:$0xff]  ;;  %v351_v15 = vld [vmem:[%s1488_s1 + $0x2f0] sm:$0xff] }
  0x22   : > { %878 = vmatpush3.msra.mxu1 %v295_v40  ;;  %844 = vmatprep.subr.mxu0 %v278_v41  ;;  %v257_v6 = vld [vmem:[%s1488_s1] sm:$0xff]  ;;  %v336_v13 = vld [vmem:[%s1488_s1 + $0x278] sm:$0xff]  ;;  %v383_v16 = vld [vmem:[%s1488_s1 + $0x3f0] sm:$0xff] }
  0x23   : > { %879 = vmatprep.subr.mxu1 %v310_v42  ;;  %845 = vmatpush3.msra.mxu0 %v262_v43  ;;  %v289_v8 = vld [vmem:[%s1488_s1 + $0x100] sm:$0xff]  ;;  %v368_v14 = vld [vmem:[%s1488_s1 + $0x378] sm:$0xff]  ;;  %v335_v17 = vld [vmem:[%s1488_s1 + $0x270] sm:$0xff] }
  0x24   : > { %880 = vmatpush3.msra.mxu1 %v294_v44  ;;  %846 = vmatprep.subr.mxu0 %v277_v45  ;;  %v367_v18 = vld [vmem:[%s1488_s1 + $0x370] sm:$0xff]  ;;  %v350_v19 = vld [vmem:[%s1488_s1 + $0x2e8] sm:$0xff]  ;;  %v349_v23 = vld [vmem:[%s1488_s1 + $0x2e0] sm:$0xff] }
  0x25   : > { %881 = vmatprep.subr.mxu1 %v309_v46  ;;  %847 = vmatpush3.msra.mxu0 %v261_v48  ;;  %v382_v20 = vld [vmem:[%s1488_s1 + $0x3e8] sm:$0xff]  ;;  %v381_v24 = vld [vmem:[%s1488_s1 + $0x3e0] sm:$0xff]  ;;  %v348_v27 = vld [vmem:[%s1488_s1 + $0x2d8] sm:$0xff] }
  0x26   : > { %882 = vmatpush3.msra.mxu1 %v293_v49  ;;  %848 = vmatprep.subr.mxu0 %v276_v50  ;;  %v334_v21 = vld [vmem:[%s1488_s1 + $0x268] sm:$0xff]  ;;  %v333_v25 = vld [vmem:[%s1488_s1 + $0x260] sm:$0xff]  ;;  %v380_v28 = vld [vmem:[%s1488_s1 + $0x3d8] sm:$0xff] }
  0x27   : > { %883 = vmatprep.subr.mxu1 %v308_v51  ;;  %849 = vmatpush3.msra.mxu0 %v260_v52  ;;  %v366_v22 = vld [vmem:[%s1488_s1 + $0x368] sm:$0xff]  ;;  %v365_v26 = vld [vmem:[%s1488_s1 + $0x360] sm:$0xff]  ;;  %v332_v29 = vld [vmem:[%s1488_s1 + $0x258] sm:$0xff] }
  0x28   : > { %884 = vmatpush3.msra.mxu1 %v292_v53  ;;  %850 = vmatprep.subr.mxu0 %v275_v54  ;;  %v364_v30 = vld [vmem:[%s1488_s1 + $0x358] sm:$0xff]  ;;  %v347_v31 = vld [vmem:[%s1488_s1 + $0x2d0] sm:$0xff]  ;;  %v346_v35 = vld [vmem:[%s1488_s1 + $0x2c8] sm:$0xff] }
  0x29   : > { %885 = vmatprep.subr.mxu1 %v307_v55  ;;  %851 = vmatpush3.msra.mxu0 %v259_v57  ;;  %v379_v32 = vld [vmem:[%s1488_s1 + $0x3d0] sm:$0xff]  ;;  %v378_v36 = vld [vmem:[%s1488_s1 + $0x3c8] sm:$0xff]  ;;  %v345_v39 = vld [vmem:[%s1488_s1 + $0x2c0] sm:$0xff] }
  0x2a   : > { %886 = vmatpush3.msra.mxu1 %v291_v58  ;;  %852 = vmatprep.subr.mxu0 %v274_v61  ;;  %v331_v33 = vld [vmem:[%s1488_s1 + $0x250] sm:$0xff]  ;;  %v330_v37 = vld [vmem:[%s1488_s1 + $0x248] sm:$0xff]  ;;  %v377_v40 = vld [vmem:[%s1488_s1 + $0x3c0] sm:$0xff] }
  0x2b   : > { %887 = vmatprep.subr.mxu1 %v306_v62  ;;  %853 = vmatpush3.msra.mxu0 %v258_v0  ;;  %v363_v34 = vld [vmem:[%s1488_s1 + $0x350] sm:$0xff]  ;;  %v362_v38 = vld [vmem:[%s1488_s1 + $0x348] sm:$0xff]  ;;  %v329_v41 = vld [vmem:[%s1488_s1 + $0x240] sm:$0xff] }
  0x2c   : > { %888 = vmatpush3.msra.mxu1 %v290_v1  ;;  %854 = vmatprep.subr.mxu0 %v273_v3  ;;  %v361_v42 = vld [vmem:[%s1488_s1 + $0x340] sm:$0xff]  ;;  %v344_v43 = vld [vmem:[%s1488_s1 + $0x2b8] sm:$0xff]  ;;  %v343_v48 = vld [vmem:[%s1488_s1 + $0x2b0] sm:$0xff]  ;;  %v409_v3 = vsub.s32 5, %v1202_v47 }
  0x2d   : > { %889 = vmatprep.subr.mxu1 %v305_v4  ;;  %855 = vmatpush3.msra.mxu0 %v257_v6  ;;  %v376_v44 = vld [vmem:[%s1488_s1 + $0x3b8] sm:$0xff]  ;;  %v375_v49 = vld [vmem:[%s1488_s1 + $0x3b0] sm:$0xff]  ;;  %v342_v52 = vld [vmem:[%s1488_s1 + $0x2a8] sm:$0xff]  ;;  %v417_v6 = vsub.s32 7, %v1202_v47 }
  0x2e   : > { %491 = vmatprep.mubr.f32.mxu0 %v394_v5  ;;  %890 = vmatpush3.msra.mxu1 %v289_v8  ;;  %v328_v45 = vld [vmem:[%s1488_s1 + $0x238] sm:$0xff]  ;;  %v327_v50 = vld [vmem:[%s1488_s1 + $0x230] sm:$0xff]  ;;  %v374_v53 = vld [vmem:[%s1488_s1 + $0x3a8] sm:$0xff] }
  0x2f   : > { %492 = vmatmul.mubr.f32.vlgmr.msra.gmra.mxu0 %v390_v7  ;;  %561 = vmatprep.mubr.f32.mxu1 %v402_v9  ;;  %v360_v46 = vld [vmem:[%s1488_s1 + $0x338] sm:$0xff]  ;;  %v359_v51 = vld [vmem:[%s1488_s1 + $0x330] sm:$0xff]  ;;  %v326_v54 = vld [vmem:[%s1488_s1 + $0x228] sm:$0xff]  ;;  %v405_v9 = vsub.s32 4, %v1202_v47 }
  0x30   : > { %894 = vmatprep.subr.mxu0 %v352_v10  ;;  %929 = vmatprep.subr.mxu1 %v384_v12  ;;  %v358_v55 = vld [vmem:[%s1488_s1 + $0x328] sm:$0xff]  ;;  %v341_v56 = vld [vmem:[%s1488_s1 + $0x2a0] sm:$0xff]  ;;  %v340_v61 = vld [vmem:[%s1488_s1 + $0x298] sm:$0xff]  ;;  %v413_v10 = vsub.s32 6, %v1202_v47 }
  0x31   : > { %562 = vmatmul.mubr.f32.vlgmr.msra.gmra.mxu1 %v398_v11  ;;  %895 = vmatpush3.msra.mxu0 %v336_v13  ;;  %v373_v57 = vld [vmem:[%s1488_s1 + $0x3a0] sm:$0xff]  ;;  %v372_v62 = vld [vmem:[%s1488_s1 + $0x398] sm:$0xff]  ;;  %v339_v1 = vld [vmem:[%s1488_s1 + $0x290] sm:$0xff] }
  0x32   : > { %930 = vmatpush3.msra.mxu1 %v368_v14  ;;  %896 = vmatprep.subr.mxu0 %v351_v15  ;;  %v325_v58 = vld [vmem:[%s1488_s1 + $0x220] sm:$0xff]  ;;  %v324_v63 = vld [vmem:[%s1488_s1 + $0x218] sm:$0xff]  ;;  %v371_v2 = vld [vmem:[%s1488_s1 + $0x390] sm:$0xff]  ;;  %v410_v14 = vrot.slane %v1238_v59, %v409_v3 }
  0x33   : > { %931 = vmatprep.subr.mxu1 %v383_v16  ;;  %897 = vmatpush3.msra.mxu0 %v335_v17  ;;  %v357_v60 = vld [vmem:[%s1488_s1 + $0x320] sm:$0xff]  ;;  %v356_v0 = vld [vmem:[%s1488_s1 + $0x318] sm:$0xff]  ;;  %v323_v4 = vld [vmem:[%s1488_s1 + $0x210] sm:$0xff]  ;;  %v418_v16 = vrot.slane %v1238_v59, %v417_v6 }
  0x34   : > { %932 = vmatpush3.msra.mxu1 %v367_v18  ;;  %898 = vmatprep.subr.mxu0 %v350_v19  ;;  %v355_v5 = vld [vmem:[%s1488_s1 + $0x310] sm:$0xff]  ;;  %v338_v7 = vld [vmem:[%s1488_s1 + $0x288] sm:$0xff]  ;;  %v337_v13 = vld [vmem:[%s1488_s1 + $0x280] sm:$0xff]  ;;  %v406_v18 = vrot.slane %v1238_v59, %v405_v9  ;;  %v414_v19 = vrot.slane %v1238_v59, %v413_v10 }
  0x35   : > { %933 = vmatprep.subr.mxu1 %v382_v20  ;;  %899 = vmatpush3.msra.mxu0 %v334_v21  ;;  %v370_v8 = vld [vmem:[%s1488_s1 + $0x388] sm:$0xff]  ;;  %v369_v47 = vld [vmem:[%s1488_s1 + $0x380] sm:$0xff] }
  0x36   : > { %934 = vmatpush3.msra.mxu1 %v366_v22  ;;  %900 = vmatprep.subr.mxu0 %v349_v23  ;;  %v322_v11 = vld [vmem:[%s1488_s1 + $0x208] sm:$0xff]  ;;  %v321_v15 = vld [vmem:[%s1488_s1 + $0x200] sm:$0xff] }
  0x37   : > { %935 = vmatprep.subr.mxu1 %v381_v24  ;;  %901 = vmatpush3.msra.mxu0 %v333_v25  ;;  %v354_v12 = vld [vmem:[%s1488_s1 + $0x308] sm:$0xff]  ;;  %v353_v17 = vld [vmem:[%s1488_s1 + $0x300] sm:$0xff] }
  0x38   : > { %936 = vmatpush3.msra.mxu1 %v365_v26  ;;  %902 = vmatprep.subr.mxu0 %v348_v27  ;;  %v385_v24 = vld [vmem:[%s1490_s3] sm:$0x1] }
  0x39   : > { %937 = vmatprep.subr.mxu1 %v380_v28  ;;  %903 = vmatpush3.msra.mxu0 %v332_v29 }
  0x3a   : > { %938 = vmatpush3.msra.mxu1 %v364_v30  ;;  %904 = vmatprep.subr.mxu0 %v347_v31 }
  0x3b   : > { %939 = vmatprep.subr.mxu1 %v379_v32  ;;  %905 = vmatpush3.msra.mxu0 %v331_v33 }
  0x3c   : > { %940 = vmatpush3.msra.mxu1 %v363_v34  ;;  %906 = vmatprep.subr.mxu0 %v346_v35 }
  0x3d   : > { %941 = vmatprep.subr.mxu1 %v378_v36  ;;  %907 = vmatpush3.msra.mxu0 %v330_v37 }
  0x3e   : > { %942 = vmatpush3.msra.mxu1 %v362_v38  ;;  %908 = vmatprep.subr.mxu0 %v345_v39 }
  0x3f   : > { %943 = vmatprep.subr.mxu1 %v377_v40  ;;  %909 = vmatpush3.msra.mxu0 %v329_v41 }
  0x40   : > { %944 = vmatpush3.msra.mxu1 %v361_v42  ;;  %910 = vmatprep.subr.mxu0 %v344_v43 }
  0x41   : > { %945 = vmatprep.subr.mxu1 %v376_v44  ;;  %911 = vmatpush3.msra.mxu0 %v328_v45 }
  0x42   : > { %946 = vmatpush3.msra.mxu1 %v360_v46  ;;  %912 = vmatprep.subr.mxu0 %v343_v48 }
  0x43   : > { %947 = vmatprep.subr.mxu1 %v375_v49  ;;  %913 = vmatpush3.msra.mxu0 %v327_v50 }
  0x44   : > { %948 = vmatpush3.msra.mxu1 %v359_v51  ;;  %914 = vmatprep.subr.mxu0 %v342_v52 }
  0x45   : > { %949 = vmatprep.subr.mxu1 %v374_v53  ;;  %915 = vmatpush3.msra.mxu0 %v326_v54 }
  0x46   : > { %950 = vmatpush3.msra.mxu1 %v358_v55  ;;  %916 = vmatprep.subr.mxu0 %v341_v56 }
  0x47   : > { %951 = vmatprep.subr.mxu1 %v373_v57  ;;  %917 = vmatpush3.msra.mxu0 %v325_v58 }
  0x48   : > { %952 = vmatpush3.msra.mxu1 %v357_v60  ;;  %918 = vmatprep.subr.mxu0 %v340_v61 }
  0x49   : > { %953 = vmatprep.subr.mxu1 %v372_v62  ;;  %919 = vmatpush3.msra.mxu0 %v324_v63 }
  0x4a   : > { %954 = vmatpush3.msra.mxu1 %v356_v0  ;;  %920 = vmatprep.subr.mxu0 %v339_v1 }
  0x4b   : > { %955 = vmatprep.subr.mxu1 %v371_v2  ;;  %921 = vmatpush3.msra.mxu0 %v323_v4 }
  0x4c   : > { %956 = vmatpush3.msra.mxu1 %v355_v5  ;;  %922 = vmatprep.subr.mxu0 %v338_v7 }
  0x4d   : > { %957 = vmatprep.subr.mxu1 %v370_v8  ;;  %923 = vmatpush3.msra.mxu0 %v322_v11 }
  0x4e   : > { %958 = vmatpush3.msra.mxu1 %v354_v12  ;;  %924 = vmatprep.subr.mxu0 %v337_v13 }
  0x4f   : > { %959 = vmatprep.subr.mxu1 %v369_v47  ;;  %925 = vmatpush3.msra.mxu0 %v321_v15 }
  0x50   : > { %631 = vmatprep.mubr.f32.mxu0 %v410_v14  ;;  %960 = vmatpush3.msra.mxu1 %v353_v17 }
  0x51   : > { %701 = vmatprep.mubr.f32.mxu1 %v418_v16  ;;  %632 = vmatmul.mubr.f32.vlgmr.msra.gmra.mxu0 %v406_v18 }
  0x52   : > { %702 = vmatmul.mubr.f32.vlgmr.msra.gmra.mxu1 %v414_v19 }
  0xef   : > { %v856_v20 = vpop.f32.mrf.mxu0 }
  0xf1   : > { %v891_v21 = vpop.f32.mrf.mxu1  ;;  %v857_v22 = vpop.f32.mrf.mxu0 }
  0xf2   : > { %v858_v23 = vadd.f32 %v857_v22, %v856_v20 }
  0xf3   : > { %v892_v25 = vpop.f32.mrf.mxu1 }
  0xf4   : > { %v494_v26 = vadd.f32 %v858_v23, %v385_v24  ;;  %v893_v59 = vadd.f32 %v892_v25, %v891_v21 }
  0xf6   : > { %v564_v31 = vadd.f32 %v893_v59, %v494_v26 }
 0x111   : > { %v926_v27 = vpop.f32.mrf.mxu0 }
 0x112   : > { %v961_v28 = vpop.f32.mrf.mxu1 }
 0x113   : > { %v927_v29 = vpop.f32.mrf.mxu0 }
 0x114   : > { %v962_v30 = vpop.f32.mrf.mxu1  ;;  %v928_v32 = vadd.f32 %v927_v29, %v926_v27 }
 0x115   : > { %v963_v34 = vadd.f32 %v962_v30, %v961_v28 }
 0x116   : > { %v634_v33 = vadd.f32 %v928_v32, %v564_v31 }
 0x118   : > { %v704_v35 = vadd.f32 %v963_v34, %v634_v33 }
 0x11a   : > { %707 = vst [vmem:[%s255_s29] sm:$0x1] %v704_v35 }
 0x11b PF: > { %s14_s17 = sadd.s32 1, %s1010_s17   ;;  %s1492_s15 = smov %s1006_s16 }
 0x11c   : > { %p11_p5 = scmp.ge.s32.totalorder %s14_s17, 4   ;;  %s1493_s16 = smov %s1495_s2 }
 0x11e   :  { %13 = sbr.rel (!%p11_p5) target bundleno = 2 (0x2), region = 75 }

</bundles_post_ra>
